<compile_context>
chip_gen: v7x
topology: tpu7x:2x2x1
jax: 0.10.0
libtpu: 0.0.40
codegen_flags: <defaults>
</compile_context>

<pallas_src>
import jax
import jax.numpy as jnp
import numpy as np
from jax import lax
from jax.experimental import pallas as pl
from jax.experimental.pallas import tpu as pltpu


# -----------------------------------------------------------------------------
# helpers
# -----------------------------------------------------------------------------
def _round_up(x, m):
    return ((x + m - 1) // m) * m


def _choose_tc(T, max_tc=32):
    """Largest chunk size <= max_tc that divides T."""
    for tc in range(min(T, max_tc), 0, -1):
        if T % tc == 0:
            return tc
    return 1


# -----------------------------------------------------------------------------
# Fused LSTM (+ dense head) kernel
# -----------------------------------------------------------------------------
def _make_lstm_head_kernel(num_layers, Tc, Bp, Hp, Vp):
    """Fused multi-layer LSTM over Tc time steps per grid iteration, with the
    dense head applied to the freshly produced top-layer hidden chunk.

    Ref order: x, h0, c0, wih0_t, whh0_t, b0, [wcat_t_l, b_l]*(L-1),
               dense_w_t, dense_b, out, h_n, c_n, h_sc, c_sc, gx_sc, y_sc.
    """
    nL = num_layers

    def kernel(*refs):
        x_ref, h0_ref, c0_ref, wih0_ref, whh0_ref, b0_ref = refs[:6]
        deep = refs[6:6 + 2 * (nL - 1)]
        dw_ref, db_ref = refs[6 + 2 * (nL - 1):8 + 2 * (nL - 1)]
        out_ref, hn_ref, cn_ref = refs[8 + 2 * (nL - 1):11 + 2 * (nL - 1)]
        h_sc, c_sc, gx_sc, y_sc = refs[11 + 2 * (nL - 1):]

        c = pl.program_id(0)

        @pl.when(c == 0)
        def _():
            h_sc[...] = h0_ref[...]
            c_sc[...] = c0_ref[...]

        # ---- hoisted layer-0 input projection for the WHOLE chunk ----------
        # one tall bf16 GEMM (MXU, f32 accumulate), bias folded in, staged to
        # VMEM scratch so it does not sit in vregs across the unrolled loop.
        x2d = x_ref[...].reshape(Tc * Bp, Vp)                       # bf16
        gx_sc[...] = (jnp.dot(x2d, wih0_ref[...],
                              preferred_element_type=jnp.float32)
                      + b0_ref[...]).reshape(Tc, Bp, 4 * Hp)

        # ---- loop-invariant reads / broadcasts hoisted out of the unroll ---
        whh0 = whh0_ref[...]                                        # (Hp, 4Hp) bf16
        wcats = [deep[2 * i][...] for i in range(nL - 1)]           # (2Hp, 4Hp) bf16
        bdeep = [jnp.broadcast_to(deep[2 * i + 1][...], (Bp, 4 * Hp))
                 for i in range(nL - 1)]                            # f32

        h = [h_sc[l] for l in range(nL)]
        cs = [c_sc[l] for l in range(nL)]

        def cell(gates, c_prev):
            # PyTorch gate layout along 4Hp: [i | f | g | o]; Hp-wide,
            # lane-aligned slices.  Element-wise math in f32.
            i = jax.nn.sigmoid(gates[:, 0 * Hp:1 * Hp])
            f = jax.nn.sigmoid(gates[:, 1 * Hp:2 * Hp])
            g = jnp.tanh(gates[:, 2 * Hp:3 * Hp])
            o = jax.nn.sigmoid(gates[:, 3 * Hp:4 * Hp])
            c_new = f * c_prev + i * g
            return o * jnp.tanh(c_new), c_new

        for k in range(Tc):
            # layer 0: input projection precomputed above, only the recurrent
            # matmul is on the serial path.
            gates = gx_sc[k] + jnp.dot(h[0].astype(jnp.bfloat16), whh0,
                                       preferred_element_type=jnp.float32)
            h[0], cs[0] = cell(gates, cs[0])
            layer_in = h[0]
            # layers >= 1: single fused matmul  [layer_in | h_l] @ [wih; whh]
            for l in range(1, nL):
                xh = jnp.concatenate([layer_in, h[l]],
                                     axis=-1).astype(jnp.bfloat16)   # (Bp, 2Hp)
                gates = (jnp.dot(xh, wcats[l - 1],
                                 preferred_element_type=jnp.float32)
                         + bdeep[l - 1])
                h[l], cs[l] = cell(gates, cs[l])
                layer_in = h[l]
            y_sc[k] = layer_in.astype(jnp.bfloat16)

        # carry state to the next chunk
        for l in range(nL):
            h_sc[l] = h[l]
            c_sc[l] = cs[l]

        # ---- fused dense head epilogue over the chunk -----------------------
        y2d = y_sc[...].reshape(Tc * Bp, Hp)                        # bf16
        logits = (jnp.dot(y2d, dw_ref[...],
                          preferred_element_type=jnp.float32)
                  + db_ref[...])
        out_ref[...] = logits.reshape(Tc, Bp, Vp)

        # final state materialized only on the last chunk (resident outputs)
        @pl.when(c == pl.num_programs(0) - 1)
        def _():
            for l in range(nL):
                hn_ref[l] = h[l]
                cn_ref[l] = cs[l]

    return kernel


# -----------------------------------------------------------------------------
# Forward wrapper
# -----------------------------------------------------------------------------
@jax.jit
def text_generation_forward(x, prepped, h0, c0):
    """Forward matching TextGenerationModel.forward.

    x: (B, T, vocab) batch-first float input (one-hot characters in practice).
    prepped: pre-padded / pre-transposed / pre-stacked weights (prepare_params).
    h0, c0: (num_layers, B, H).
    Returns: out (B, T, vocab), (h_n, c_n) each (num_layers, B, H).
    """
    B, T, V = x.shape
    L, _, H = h0.shape
    Hp = prepped["whh0_t"].shape[0]
    Vp = prepped["wih0_t"].shape[0]
    Bp = _round_up(B, 8)
    Tc = _choose_tc(T, 32)

    # pad to lane/sublane friendly shapes, time-major for the recurrence;
    # bf16 x halves the input DMA (one-hot values are exact in bf16).
    x_tm = jnp.transpose(x, (1, 0, 2)).astype(jnp.bfloat16)          # (T, B, V)
    x_p = jnp.pad(x_tm, ((0, 0), (0, Bp - B), (0, Vp - V)))          # (T, Bp, Vp)
    h0_p = jnp.pad(h0.astype(jnp.float32), ((0, 0), (0, Bp - B), (0, Hp - H)))
    c0_p = jnp.pad(c0.astype(jnp.float32), ((0, 0), (0, Bp - B), (0, Hp - H)))

    w_args = [prepped["wih0_t"], prepped["whh0_t"], prepped["b0"]]
    in_specs = [
        pl.BlockSpec((Tc, Bp, Vp), lambda c: (c, 0, 0)),    # x chunk
        pl.BlockSpec((L, Bp, Hp), lambda c: (0, 0, 0)),     # h0 (resident)
        pl.BlockSpec((L, Bp, Hp), lambda c: (0, 0, 0)),     # c0 (resident)
        pl.BlockSpec((Vp, 4 * Hp), lambda c: (0, 0)),       # wih0_t
        pl.BlockSpec((Hp, 4 * Hp), lambda c: (0, 0)),       # whh0_t
        pl.BlockSpec((1, 4 * Hp), lambda c: (0, 0)),        # b0
    ]
    for l in range(1, L):
        w_args += [prepped[f"wcat_t_{l}"], prepped[f"b_{l}"]]
        in_specs += [
            pl.BlockSpec((2 * Hp, 4 * Hp), lambda c: (0, 0)),
            pl.BlockSpec((1, 4 * Hp), lambda c: (0, 0)),
        ]
    w_args += [prepped["dense_w_t"], prepped["dense_b"]]
    in_specs += [
        pl.BlockSpec((Hp, Vp), lambda c: (0, 0)),
        pl.BlockSpec((1, Vp), lambda c: (0, 0)),
    ]

    kernel = _make_lstm_head_kernel(L, Tc, Bp, Hp, Vp)
    out_tm, h_n, c_n = pl.pallas_call(
        kernel,
        grid=(T // Tc,),
        in_specs=in_specs,
        out_specs=[
            pl.BlockSpec((Tc, Bp, Vp), lambda c: (c, 0, 0)),   # logits chunk
            pl.BlockSpec((L, Bp, Hp), lambda c: (0, 0, 0)),    # h_n
            pl.BlockSpec((L, Bp, Hp), lambda c: (0, 0, 0)),    # c_n
        ],
        out_shape=[
            jax.ShapeDtypeStruct((T, Bp, Vp), jnp.float32),
            jax.ShapeDtypeStruct((L, Bp, Hp), jnp.float32),
            jax.ShapeDtypeStruct((L, Bp, Hp), jnp.float32),
        ],
        scratch_shapes=[
            pltpu.VMEM((L, Bp, Hp), jnp.float32),        # carried h state
            pltpu.VMEM((L, Bp, Hp), jnp.float32),        # carried c state
            pltpu.VMEM((Tc, Bp, 4 * Hp), jnp.float32),   # staged layer-0 gx chunk
            pltpu.VMEM((Tc, Bp, Hp), jnp.bfloat16),      # top-layer hidden chunk
        ],
        compiler_params=pltpu.CompilerParams(
            dimension_semantics=("arbitrary",),          # time recurrence serial
            vmem_limit_bytes=32 * 1024 * 1024),          # v5e scoped default is 16 MiB
    )(x_p, h0_p, c0_p, *w_args)

    out = jnp.transpose(out_tm, (1, 0, 2))[:B, :, :V]
    return out, (h_n[:, :B, :H], c_n[:, :B, :H])


# -----------------------------------------------------------------------------
# One-time weight preparation (outside the jitted forward)
# -----------------------------------------------------------------------------
def _pad_gate_rows(w, H, Hp):
    """(4H, ...) -> (4Hp, ...): each PyTorch gate block [i|f|g|o] zero-padded to
    Hp rows so gate slices are lane-aligned.  Zero padding is REQUIRED for
    correctness (keeps padded h/c lanes exactly 0 through the recurrence)."""
    pads = ((0, Hp - H),) + ((0, 0),) * (w.ndim - 1)
    blocks = [jnp.pad(w[g * H:(g + 1) * H], pads) for g in range(4)]
    return jnp.concatenate(blocks, axis=0)


def prepare_params(params, vocab, hidden, num_layers):
    """Pad (H, vocab -> multiples of 128), pre-transpose, stack recurrent
    weights of deep layers, and cast matmul operands to bf16."""
    Hp = _round_up(hidden, 128)
    Vp = _round_up(vocab, 128)
    prepped = {}

    # layer 0
    w_ih0 = _pad_gate_rows(jnp.asarray(params["weight_ih_l0"]), hidden, Hp)
    w_ih0 = jnp.pad(w_ih0, ((0, 0), (0, Vp - vocab)))                 # (4Hp, Vp)
    w_hh0 = _pad_gate_rows(jnp.asarray(params["weight_hh_l0"]), hidden, Hp)
    w_hh0 = jnp.pad(w_hh0, ((0, 0), (0, Hp - hidden)))                # (4Hp, Hp)
    b0 = _pad_gate_rows(jnp.asarray(params["bias_ih_l0"])
                        + jnp.asarray(params["bias_hh_l0"]), hidden, Hp)
    prepped["wih0_t"] = jnp.transpose(w_ih0).astype(jnp.bfloat16)     # (Vp, 4Hp)
    prepped["whh0_t"] = jnp.transpose(w_hh0).astype(jnp.bfloat16)     # (Hp, 4Hp)
    prepped["b0"] = b0.reshape(1, 4 * Hp).astype(jnp.float32)

    # layers >= 1: stack [wih_t; whh_t] so each step uses ONE matmul
    for l in range(1, num_layers):
        w_ih = _pad_gate_rows(jnp.asarray(params[f"weight_ih_l{l}"]), hidden, Hp)
        w_ih = jnp.pad(w_ih, ((0, 0), (0, Hp - hidden)))              # (4Hp, Hp)
        w_hh = _pad_gate_rows(jnp.asarray(params[f"weight_hh_l{l}"]), hidden, Hp)
        w_hh = jnp.pad(w_hh, ((0, 0), (0, Hp - hidden)))              # (4Hp, Hp)
        b = _pad_gate_rows(jnp.asarray(params[f"bias_ih_l{l}"])
                           + jnp.asarray(params[f"bias_hh_l{l}"]), hidden, Hp)
        w_cat = jnp.concatenate([jnp.transpose(w_ih), jnp.transpose(w_hh)],
                                axis=0)                               # (2Hp, 4Hp)
        prepped[f"wcat_t_{l}"] = w_cat.astype(jnp.bfloat16)
        prepped[f"b_{l}"] = b.reshape(1, 4 * Hp).astype(jnp.float32)

    # dense head
    w_d = jnp.pad(jnp.asarray(params["dense_weight"]),
                  ((0, Vp - vocab), (0, Hp - hidden)))                # (Vp, Hp)
    prepped["dense_w_t"] = jnp.transpose(w_d).astype(jnp.bfloat16)    # (Hp, Vp)
    prepped["dense_b"] = jnp.pad(jnp.asarray(params["dense_bias"]),
                                 (0, Vp - vocab)).reshape(1, Vp).astype(jnp.float32)
    return prepped


# -----------------------------------------------------------------------------
# Pure-JAX reference (correctness check)
# -----------------------------------------------------------------------------
def _lstm_layer_ref(x_tm, h0, c0, w_ih, w_hh, b_ih, b_hh):
    H = h0.shape[-1]

    def step(carry, x_t):
        h, c = carry
        gates = x_t @ w_ih.T + b_ih + h @ w_hh.T + b_hh
        i = jax.nn.sigmoid(gates[:, 0 * H:1 * H])
        f = jax.nn.sigmoid(gates[:, 1 * H:2 * H])
        g = jnp.tanh(gates[:, 2 * H:3 * H])
        o = jax.nn.sigmoid(gates[:, 3 * H:4 * H])
        c_new = f * c + i * g
        h_new = o * jnp.tanh(c_new)
        return (h_new, c_new), h_new

    (h_n, c_n), ys = lax.scan(step, (h0, c0), x_tm)
    return ys, h_n, c_n


def text_generation_forward_ref(x, params, h0, c0):
    num_layers = h0.shape[0]
    x_tm = jnp.transpose(x, (1, 0, 2))
    hs, cs = [], []
    layer_in = x_tm
    for l in range(num_layers):
        layer_in, h_n, c_n = _lstm_layer_ref(
            layer_in, h0[l], c0[l],
            params[f"weight_ih_l{l}"], params[f"weight_hh_l{l}"],
            params[f"bias_ih_l{l}"], params[f"bias_hh_l{l}"])
        hs.append(h_n)
        cs.append(c_n)
    out = layer_in @ params["dense_weight"].T + params["dense_bias"]
    return jnp.transpose(out, (1, 0, 2)), (jnp.stack(hs), jnp.stack(cs))


# -----------------------------------------------------------------------------
# Parameter init (deterministic, PyTorch shapes / uniform init)
# -----------------------------------------------------------------------------
def init_params(key, vocab, hidden, num_layers):
    params = {}
    k = 1.0 / np.sqrt(hidden)
    for l in range(num_layers):
        in_dim = vocab if l == 0 else hidden
        for name, shape in [
            (f"weight_ih_l{l}", (4 * hidden, in_dim)),
            (f"weight_hh_l{l}", (4 * hidden, hidden)),
            (f"bias_ih_l{l}", (4 * hidden,)),
            (f"bias_hh_l{l}", (4 * hidden,)),
        ]:
            key, sub = jax.random.split(key)
            params[name] = jax.random.uniform(sub, shape, jnp.float32, -k, k)
    key, sub = jax.random.split(key)
    params["dense_weight"] = jax.random.uniform(sub, (vocab, hidden), jnp.float32, -k, k)
    key, sub = jax.random.split(key)
    params["dense_bias"] = jax.random.uniform(sub, (vocab,), jnp.float32, -k, k)
    return params


# -----------------------------------------------------------------------------
if __name__ == "__main__":
    batch_size = 2
    seq_length = 8
    vocab_size = 32
    lstm_num_hidden = 32
    lstm_num_layers = 2

    root = jax.random.PRNGKey(0)
    k_param, k_x = jax.random.split(root)

    params = init_params(k_param, vocab_size, lstm_num_hidden, lstm_num_layers)
    # done ONCE, outside the jitted forward (no per-call weight transposes)
    prepped = prepare_params(params, vocab_size, lstm_num_hidden, lstm_num_layers)

    # One-hot character input, batch-first: (B, T, vocab), like nn.LSTM(batch_first=True)
    ids = jax.random.randint(k_x, (batch_size, seq_length), 0, vocab_size)
    x = jax.nn.one_hot(ids, vocab_size, dtype=jnp.float32)

    # prev_state=None -> zeros (reset_lstm)
    h0 = jnp.zeros((lstm_num_layers, batch_size, lstm_num_hidden), jnp.float32)
    c0 = jnp.zeros((lstm_num_layers, batch_size, lstm_num_hidden), jnp.float32)

    out, (h_n, c_n) = text_generation_forward(x, prepped, h0, c0)
    jax.block_until_ready((out, h_n, c_n))

    # reference is pure f32; kernel uses bf16 MXU operands with f32 accumulate,
    # so compare with a bf16-appropriate tolerance.
    out_ref, (h_ref, c_ref) = text_generation_forward_ref(x, params, h0, c0)
    np.testing.assert_allclose(np.asarray(out), np.asarray(out_ref), atol=2e-2, rtol=2e-2)
    np.testing.assert_allclose(np.asarray(h_n), np.asarray(h_ref), atol=2e-2, rtol=2e-2)
    np.testing.assert_allclose(np.asarray(c_n), np.asarray(c_ref), atol=2e-2, rtol=2e-2)

    assert out.shape == (batch_size, seq_length, vocab_size)
    assert h_n.shape == (lstm_num_layers, batch_size, lstm_num_hidden)
    assert c_n.shape == (lstm_num_layers, batch_size, lstm_num_hidden)

    print("KERNEL_OK")
</pallas_src>

<mosaic_0001>
module attributes {stable_mosaic.version = 11 : i64} {
  func.func @kernel(%arg0: i32, %arg1: memref<8x8x128xbf16, #tpu.memory_space<vmem>>, %arg2: memref<2x8x128xf32, #tpu.memory_space<vmem>>, %arg3: memref<2x8x128xf32, #tpu.memory_space<vmem>>, %arg4: memref<128x512xbf16, #tpu.memory_space<vmem>>, %arg5: memref<128x512xbf16, #tpu.memory_space<vmem>>, %arg6: memref<1x512xf32, #tpu.memory_space<vmem>>, %arg7: memref<256x512xbf16, #tpu.memory_space<vmem>>, %arg8: memref<1x512xf32, #tpu.memory_space<vmem>>, %arg9: memref<128x128xbf16, #tpu.memory_space<vmem>>, %arg10: memref<1x128xf32, #tpu.memory_space<vmem>>, %arg11: memref<8x8x128xf32, #tpu.memory_space<vmem>>, %arg12: memref<2x8x128xf32, #tpu.memory_space<vmem>>, %arg13: memref<2x8x128xf32, #tpu.memory_space<vmem>>, %arg14: memref<2x8x128xf32, #tpu.memory_space<vmem>>, %arg15: memref<2x8x128xf32, #tpu.memory_space<vmem>>, %arg16: memref<8x8x512xf32, #tpu.memory_space<vmem>>, %arg17: memref<8x8x128xbf16, #tpu.memory_space<vmem>>) attributes {dimension_semantics = [#tpu.dimension_semantics<arbitrary>], iteration_bounds = array<i64: 1>, scalar_prefetch = 0 : i64, scratch_operands = 4 : i64, tpu.core_type = #tpu.core_type<tc>, window_params = [{transform_indices = @transform_0, window_bounds = array<i64: 8, 8, 128>}, {pipeline_mode = #tpu.pipeline_mode<synchronous>, transform_indices = @transform_1, window_bounds = array<i64: 2, 8, 128>}, {pipeline_mode = #tpu.pipeline_mode<synchronous>, transform_indices = @transform_2, window_bounds = array<i64: 2, 8, 128>}, {pipeline_mode = #tpu.pipeline_mode<synchronous>, transform_indices = @transform_3, window_bounds = array<i64: 128, 512>}, {pipeline_mode = #tpu.pipeline_mode<synchronous>, transform_indices = @transform_4, window_bounds = array<i64: 128, 512>}, {pipeline_mode = #tpu.pipeline_mode<synchronous>, transform_indices = @transform_5, window_bounds = array<i64: 1, 512>}, {pipeline_mode = #tpu.pipeline_mode<synchronous>, transform_indices = @transform_6, window_bounds = array<i64: 256, 512>}, {pipeline_mode = #tpu.pipeline_mode<synchronous>, transform_indices = @transform_7, window_bounds = array<i64: 1, 512>}, {pipeline_mode = #tpu.pipeline_mode<synchronous>, transform_indices = @transform_8, window_bounds = array<i64: 128, 128>}, {pipeline_mode = #tpu.pipeline_mode<synchronous>, transform_indices = @transform_9, window_bounds = array<i64: 1, 128>}, {transform_indices = @transform_10, window_bounds = array<i64: 8, 8, 128>}, {pipeline_mode = #tpu.pipeline_mode<synchronous>, transform_indices = @transform_11, window_bounds = array<i64: 2, 8, 128>}, {pipeline_mode = #tpu.pipeline_mode<synchronous>, transform_indices = @transform_12, window_bounds = array<i64: 2, 8, 128>}]} {
    %c0_i32 = arith.constant 0 : i32
    %0 = arith.cmpi eq, %arg0, %c0_i32 : i32
    %1 = arith.extui %0 : i1 to i32
    %c0_i32_0 = arith.constant 0 : i32
    %2 = arith.cmpi ne, %1, %c0_i32_0 : i32
    scf.if %2 {
      %c0_158 = arith.constant 0 : index
      %c0_159 = arith.constant 0 : index
      %c0_160 = arith.constant 0 : index
      %553 = vector.load %arg2[%c0_158, %c0_159, %c0_160] : memref<2x8x128xf32, #tpu.memory_space<vmem>>, vector<2x8x128xf32>
      %c0_161 = arith.constant 0 : index
      %c0_162 = arith.constant 0 : index
      %c0_163 = arith.constant 0 : index
      %554 = vector.load %arg14[%c0_161, %c0_162, %c0_163] : memref<2x8x128xf32, #tpu.memory_space<vmem>>, vector<2x8x128xf32>
      tpu.vector_store %arg14[%c0_161, %c0_162, %c0_163], %553 {strides = array<i32>} : memref<2x8x128xf32, #tpu.memory_space<vmem>>, vector<2x8x128xf32>,
      %c0_164 = arith.constant 0 : index
      %c0_165 = arith.constant 0 : index
      %c0_166 = arith.constant 0 : index
      %555 = vector.load %arg3[%c0_164, %c0_165, %c0_166] : memref<2x8x128xf32, #tpu.memory_space<vmem>>, vector<2x8x128xf32>
      %c0_167 = arith.constant 0 : index
      %c0_168 = arith.constant 0 : index
      %c0_169 = arith.constant 0 : index
      %556 = vector.load %arg15[%c0_167, %c0_168, %c0_169] : memref<2x8x128xf32, #tpu.memory_space<vmem>>, vector<2x8x128xf32>
      tpu.vector_store %arg15[%c0_167, %c0_168, %c0_169], %555 {strides = array<i32>} : memref<2x8x128xf32, #tpu.memory_space<vmem>>, vector<2x8x128xf32>,
    } else {
    }
    %c0 = arith.constant 0 : index
    %c0_1 = arith.constant 0 : index
    %c0_2 = arith.constant 0 : index
    %3 = vector.load %arg1[%c0, %c0_1, %c0_2] : memref<8x8x128xbf16, #tpu.memory_space<vmem>>, vector<8x8x128xbf16>
    %4 = vector.shape_cast %3 : vector<8x8x128xbf16> to vector<64x128xbf16>
    %c0_3 = arith.constant 0 : index
    %c0_4 = arith.constant 0 : index
    %5 = vector.load %arg4[%c0_3, %c0_4] : memref<128x512xbf16, #tpu.memory_space<vmem>>, vector<128x512xbf16>
    %cst = arith.constant dense<0.000000e+00> : vector<64x512xf32>
    %6 = tpu.matmul %4, %5, %cst {dimension_numbers = #tpu.dot_dimension_numbers<[1], [0], [0], [1], [0, 0, 1, 1], [], []>} : vector<64x128xbf16>, vector<128x512xbf16>, vector<64x512xf32> -> vector<64x512xf32>
    %c0_5 = arith.constant 0 : index
    %c0_6 = arith.constant 0 : index
    %7 = vector.load %arg6[%c0_5, %c0_6] : memref<1x512xf32, #tpu.memory_space<vmem>>, vector<1x512xf32>
    %8 = vector.broadcast %7 : vector<1x512xf32> to vector<64x512xf32>
    %9 = arith.addf %6, %8 : vector<64x512xf32>
    %10 = vector.shape_cast %9 : vector<64x512xf32> to vector<8x8x512xf32>
    %c0_7 = arith.constant 0 : index
    %c0_8 = arith.constant 0 : index
    %c0_9 = arith.constant 0 : index
    %11 = vector.load %arg16[%c0_7, %c0_8, %c0_9] : memref<8x8x512xf32, #tpu.memory_space<vmem>>, vector<8x8x512xf32>
    tpu.vector_store %arg16[%c0_7, %c0_8, %c0_9], %10 {strides = array<i32>} : memref<8x8x512xf32, #tpu.memory_space<vmem>>, vector<8x8x512xf32>,
    %c0_10 = arith.constant 0 : index
    %c0_11 = arith.constant 0 : index
    %12 = vector.load %arg5[%c0_10, %c0_11] : memref<128x512xbf16, #tpu.memory_space<vmem>>, vector<128x512xbf16>
    %c0_12 = arith.constant 0 : index
    %c0_13 = arith.constant 0 : index
    %13 = vector.load %arg7[%c0_12, %c0_13] : memref<256x512xbf16, #tpu.memory_space<vmem>>, vector<256x512xbf16>
    %c0_14 = arith.constant 0 : index
    %c0_15 = arith.constant 0 : index
    %14 = vector.load %arg8[%c0_14, %c0_15] : memref<1x512xf32, #tpu.memory_space<vmem>>, vector<1x512xf32>
    %15 = vector.shape_cast %14 : vector<1x512xf32> to vector<1x512xf32>
    %16 = vector.broadcast %15 : vector<1x512xf32> to vector<8x512xf32>
    %c0_16 = arith.constant 0 : index
    %c0_17 = arith.constant 0 : index
    %c0_18 = arith.constant 0 : index
    %17 = vector.load %arg14[%c0_16, %c0_17, %c0_18] : memref<2x8x128xf32, #tpu.memory_space<vmem>>, vector<1x8x128xf32>
    %18 = vector.shape_cast %17 : vector<1x8x128xf32> to vector<8x128xf32>
    %c1 = arith.constant 1 : index
    %c0_19 = arith.constant 0 : index
    %c0_20 = arith.constant 0 : index
    %19 = vector.load %arg14[%c1, %c0_19, %c0_20] : memref<2x8x128xf32, #tpu.memory_space<vmem>>, vector<1x8x128xf32>
    %20 = vector.shape_cast %19 : vector<1x8x128xf32> to vector<8x128xf32>
    %c0_21 = arith.constant 0 : index
    %c0_22 = arith.constant 0 : index
    %c0_23 = arith.constant 0 : index
    %21 = vector.load %arg15[%c0_21, %c0_22, %c0_23] : memref<2x8x128xf32, #tpu.memory_space<vmem>>, vector<1x8x128xf32>
    %22 = vector.shape_cast %21 : vector<1x8x128xf32> to vector<8x128xf32>
    %c1_24 = arith.constant 1 : index
    %c0_25 = arith.constant 0 : index
    %c0_26 = arith.constant 0 : index
    %23 = vector.load %arg15[%c1_24, %c0_25, %c0_26] : memref<2x8x128xf32, #tpu.memory_space<vmem>>, vector<1x8x128xf32>
    %24 = vector.shape_cast %23 : vector<1x8x128xf32> to vector<8x128xf32>
    %c0_27 = arith.constant 0 : index
    %c0_28 = arith.constant 0 : index
    %c0_29 = arith.constant 0 : index
    %25 = vector.load %arg16[%c0_27, %c0_28, %c0_29] : memref<8x8x512xf32, #tpu.memory_space<vmem>>, vector<1x8x512xf32>
    %26 = vector.shape_cast %25 : vector<1x8x512xf32> to vector<8x512xf32>
    %27 = arith.truncf %18 : vector<8x128xf32> to vector<8x128xbf16>
    %cst_30 = arith.constant dense<0.000000e+00> : vector<8x512xf32>
    %28 = tpu.matmul %27, %12, %cst_30 {dimension_numbers = #tpu.dot_dimension_numbers<[1], [0], [0], [1], [0, 0, 1, 1], [], []>} : vector<8x128xbf16>, vector<128x512xbf16>, vector<8x512xf32> -> vector<8x512xf32>
    %29 = arith.addf %26, %28 : vector<8x512xf32>
    %30 = vector.extract_strided_slice %29 {offsets = [0, 0], sizes = [8, 128], strides = [1, 1]} : vector<8x512xf32> to vector<8x128xf32>
    %31 = arith.negf %30 : vector<8x128xf32>
    %32 = math.exp %31 : vector<8x128xf32>
    %cst_31 = arith.constant 1.000000e+00 : f32
    %33 = vector.broadcast %cst_31 : f32 to vector<8x128xf32>
    %34 = arith.addf %33, %32 : vector<8x128xf32>
    %35 = arith.divf %33, %34 : vector<8x128xf32>
    %36 = vector.extract_strided_slice %29 {offsets = [0, 128], sizes = [8, 128], strides = [1, 1]} : vector<8x512xf32> to vector<8x128xf32>
    %37 = arith.negf %36 : vector<8x128xf32>
    %38 = math.exp %37 : vector<8x128xf32>
    %cst_32 = arith.constant 1.000000e+00 : f32
    %39 = vector.broadcast %cst_32 : f32 to vector<8x128xf32>
    %40 = arith.addf %39, %38 : vector<8x128xf32>
    %41 = arith.divf %39, %40 : vector<8x128xf32>
    %42 = vector.extract_strided_slice %29 {offsets = [0, 256], sizes = [8, 128], strides = [1, 1]} : vector<8x512xf32> to vector<8x128xf32>
    %43 = math.tanh %42 : vector<8x128xf32>
    %44 = vector.extract_strided_slice %29 {offsets = [0, 384], sizes = [8, 128], strides = [1, 1]} : vector<8x512xf32> to vector<8x128xf32>
    %45 = arith.negf %44 : vector<8x128xf32>
    %46 = math.exp %45 : vector<8x128xf32>
    %cst_33 = arith.constant 1.000000e+00 : f32
    %47 = vector.broadcast %cst_33 : f32 to vector<8x128xf32>
    %48 = arith.addf %47, %46 : vector<8x128xf32>
    %49 = arith.divf %47, %48 : vector<8x128xf32>
    %50 = arith.mulf %41, %22 : vector<8x128xf32>
    %51 = arith.mulf %35, %43 : vector<8x128xf32>
    %52 = arith.addf %50, %51 : vector<8x128xf32>
    %53 = math.tanh %52 : vector<8x128xf32>
    %54 = arith.mulf %49, %53 : vector<8x128xf32>
    %55 = tpu.concatenate %54, %20 in 1 : vector<8x128xf32>, vector<8x128xf32> -> vector<8x256xf32>
    %56 = arith.truncf %55 : vector<8x256xf32> to vector<8x256xbf16>
    %cst_34 = arith.constant dense<0.000000e+00> : vector<8x512xf32>
    %57 = tpu.matmul %56, %13, %cst_34 {dimension_numbers = #tpu.dot_dimension_numbers<[1], [0], [0], [1], [0, 0, 1, 1], [], []>} : vector<8x256xbf16>, vector<256x512xbf16>, vector<8x512xf32> -> vector<8x512xf32>
    %58 = arith.addf %57, %16 : vector<8x512xf32>
    %59 = vector.extract_strided_slice %58 {offsets = [0, 0], sizes = [8, 128], strides = [1, 1]} : vector<8x512xf32> to vector<8x128xf32>
    %60 = arith.negf %59 : vector<8x128xf32>
    %61 = math.exp %60 : vector<8x128xf32>
    %cst_35 = arith.constant 1.000000e+00 : f32
    %62 = vector.broadcast %cst_35 : f32 to vector<8x128xf32>
    %63 = arith.addf %62, %61 : vector<8x128xf32>
    %64 = arith.divf %62, %63 : vector<8x128xf32>
    %65 = vector.extract_strided_slice %58 {offsets = [0, 128], sizes = [8, 128], strides = [1, 1]} : vector<8x512xf32> to vector<8x128xf32>
    %66 = arith.negf %65 : vector<8x128xf32>
    %67 = math.exp %66 : vector<8x128xf32>
    %cst_36 = arith.constant 1.000000e+00 : f32
    %68 = vector.broadcast %cst_36 : f32 to vector<8x128xf32>
    %69 = arith.addf %68, %67 : vector<8x128xf32>
    %70 = arith.divf %68, %69 : vector<8x128xf32>
    %71 = vector.extract_strided_slice %58 {offsets = [0, 256], sizes = [8, 128], strides = [1, 1]} : vector<8x512xf32> to vector<8x128xf32>
    %72 = math.tanh %71 : vector<8x128xf32>
    %73 = vector.extract_strided_slice %58 {offsets = [0, 384], sizes = [8, 128], strides = [1, 1]} : vector<8x512xf32> to vector<8x128xf32>
    %74 = arith.negf %73 : vector<8x128xf32>
    %75 = math.exp %74 : vector<8x128xf32>
    %cst_37 = arith.constant 1.000000e+00 : f32
    %76 = vector.broadcast %cst_37 : f32 to vector<8x128xf32>
    %77 = arith.addf %76, %75 : vector<8x128xf32>
    %78 = arith.divf %76, %77 : vector<8x128xf32>
    %79 = arith.mulf %70, %24 : vector<8x128xf32>
    %80 = arith.mulf %64, %72 : vector<8x128xf32>
    %81 = arith.addf %79, %80 : vector<8x128xf32>
    %82 = math.tanh %81 : vector<8x128xf32>
    %83 = arith.mulf %78, %82 : vector<8x128xf32>
    %84 = arith.truncf %83 : vector<8x128xf32> to vector<8x128xbf16>
    %c0_38 = arith.constant 0 : index
    %c0_39 = arith.constant 0 : index
    %c0_40 = arith.constant 0 : index
    %85 = vector.load %arg17[%c0_38, %c0_39, %c0_40] : memref<8x8x128xbf16, #tpu.memory_space<vmem>>, vector<1x8x128xbf16>
    %86 = vector.shape_cast %85 : vector<1x8x128xbf16> to vector<8x128xbf16>
    %87 = vector.shape_cast %84 : vector<8x128xbf16> to vector<1x8x128xbf16>
    tpu.vector_store %arg17[%c0_38, %c0_39, %c0_40], %87 {strides = array<i32>} : memref<8x8x128xbf16, #tpu.memory_space<vmem>>, vector<1x8x128xbf16>,
    %c1_41 = arith.constant 1 : index
    %c0_42 = arith.constant 0 : index
    %c0_43 = arith.constant 0 : index
    %88 = vector.load %arg16[%c1_41, %c0_42, %c0_43] : memref<8x8x512xf32, #tpu.memory_space<vmem>>, vector<1x8x512xf32>
    %89 = vector.shape_cast %88 : vector<1x8x512xf32> to vector<8x512xf32>
    %90 = arith.truncf %54 : vector<8x128xf32> to vector<8x128xbf16>
    %cst_44 = arith.constant dense<0.000000e+00> : vector<8x512xf32>
    %91 = tpu.matmul %90, %12, %cst_44 {dimension_numbers = #tpu.dot_dimension_numbers<[1], [0], [0], [1], [0, 0, 1, 1], [], []>} : vector<8x128xbf16>, vector<128x512xbf16>, vector<8x512xf32> -> vector<8x512xf32>
    %92 = arith.addf %89, %91 : vector<8x512xf32>
    %93 = vector.extract_strided_slice %92 {offsets = [0, 0], sizes = [8, 128], strides = [1, 1]} : vector<8x512xf32> to vector<8x128xf32>
    %94 = arith.negf %93 : vector<8x128xf32>
    %95 = math.exp %94 : vector<8x128xf32>
    %cst_45 = arith.constant 1.000000e+00 : f32
    %96 = vector.broadcast %cst_45 : f32 to vector<8x128xf32>
    %97 = arith.addf %96, %95 : vector<8x128xf32>
    %98 = arith.divf %96, %97 : vector<8x128xf32>
    %99 = vector.extract_strided_slice %92 {offsets = [0, 128], sizes = [8, 128], strides = [1, 1]} : vector<8x512xf32> to vector<8x128xf32>
    %100 = arith.negf %99 : vector<8x128xf32>
    %101 = math.exp %100 : vector<8x128xf32>
    %cst_46 = arith.constant 1.000000e+00 : f32
    %102 = vector.broadcast %cst_46 : f32 to vector<8x128xf32>
    %103 = arith.addf %102, %101 : vector<8x128xf32>
    %104 = arith.divf %102, %103 : vector<8x128xf32>
    %105 = vector.extract_strided_slice %92 {offsets = [0, 256], sizes = [8, 128], strides = [1, 1]} : vector<8x512xf32> to vector<8x128xf32>
    %106 = math.tanh %105 : vector<8x128xf32>
    %107 = vector.extract_strided_slice %92 {offsets = [0, 384], sizes = [8, 128], strides = [1, 1]} : vector<8x512xf32> to vector<8x128xf32>
    %108 = arith.negf %107 : vector<8x128xf32>
    %109 = math.exp %108 : vector<8x128xf32>
    %cst_47 = arith.constant 1.000000e+00 : f32
    %110 = vector.broadcast %cst_47 : f32 to vector<8x128xf32>
    %111 = arith.addf %110, %109 : vector<8x128xf32>
    %112 = arith.divf %110, %111 : vector<8x128xf32>
    %113 = arith.mulf %104, %52 : vector<8x128xf32>
    %114 = arith.mulf %98, %106 : vector<8x128xf32>
    %115 = arith.addf %113, %114 : vector<8x128xf32>
    %116 = math.tanh %115 : vector<8x128xf32>
    %117 = arith.mulf %112, %116 : vector<8x128xf32>
    %118 = tpu.concatenate %117, %83 in 1 : vector<8x128xf32>, vector<8x128xf32> -> vector<8x256xf32>
    %119 = arith.truncf %118 : vector<8x256xf32> to vector<8x256xbf16>
    %cst_48 = arith.constant dense<0.000000e+00> : vector<8x512xf32>
    %120 = tpu.matmul %119, %13, %cst_48 {dimension_numbers = #tpu.dot_dimension_numbers<[1], [0], [0], [1], [0, 0, 1, 1], [], []>} : vector<8x256xbf16>, vector<256x512xbf16>, vector<8x512xf32> -> vector<8x512xf32>
    %121 = arith.addf %120, %16 : vector<8x512xf32>
    %122 = vector.extract_strided_slice %121 {offsets = [0, 0], sizes = [8, 128], strides = [1, 1]} : vector<8x512xf32> to vector<8x128xf32>
    %123 = arith.negf %122 : vector<8x128xf32>
    %124 = math.exp %123 : vector<8x128xf32>
    %cst_49 = arith.constant 1.000000e+00 : f32
    %125 = vector.broadcast %cst_49 : f32 to vector<8x128xf32>
    %126 = arith.addf %125, %124 : vector<8x128xf32>
    %127 = arith.divf %125, %126 : vector<8x128xf32>
    %128 = vector.extract_strided_slice %121 {offsets = [0, 128], sizes = [8, 128], strides = [1, 1]} : vector<8x512xf32> to vector<8x128xf32>
    %129 = arith.negf %128 : vector<8x128xf32>
    %130 = math.exp %129 : vector<8x128xf32>
    %cst_50 = arith.constant 1.000000e+00 : f32
    %131 = vector.broadcast %cst_50 : f32 to vector<8x128xf32>
    %132 = arith.addf %131, %130 : vector<8x128xf32>
    %133 = arith.divf %131, %132 : vector<8x128xf32>
    %134 = vector.extract_strided_slice %121 {offsets = [0, 256], sizes = [8, 128], strides = [1, 1]} : vector<8x512xf32> to vector<8x128xf32>
    %135 = math.tanh %134 : vector<8x128xf32>
    %136 = vector.extract_strided_slice %121 {offsets = [0, 384], sizes = [8, 128], strides = [1, 1]} : vector<8x512xf32> to vector<8x128xf32>
    %137 = arith.negf %136 : vector<8x128xf32>
    %138 = math.exp %137 : vector<8x128xf32>
    %cst_51 = arith.constant 1.000000e+00 : f32
    %139 = vector.broadcast %cst_51 : f32 to vector<8x128xf32>
    %140 = arith.addf %139, %138 : vector<8x128xf32>
    %141 = arith.divf %139, %140 : vector<8x128xf32>
    %142 = arith.mulf %133, %81 : vector<8x128xf32>
    %143 = arith.mulf %127, %135 : vector<8x128xf32>
    %144 = arith.addf %142, %143 : vector<8x128xf32>
    %145 = math.tanh %144 : vector<8x128xf32>
    %146 = arith.mulf %141, %145 : vector<8x128xf32>
    %147 = arith.truncf %146 : vector<8x128xf32> to vector<8x128xbf16>
    %c1_52 = arith.constant 1 : index
    %c0_53 = arith.constant 0 : index
    %c0_54 = arith.constant 0 : index
    %148 = vector.load %arg17[%c1_52, %c0_53, %c0_54] : memref<8x8x128xbf16, #tpu.memory_space<vmem>>, vector<1x8x128xbf16>
    %149 = vector.shape_cast %148 : vector<1x8x128xbf16> to vector<8x128xbf16>
    %150 = vector.shape_cast %147 : vector<8x128xbf16> to vector<1x8x128xbf16>
    tpu.vector_store %arg17[%c1_52, %c0_53, %c0_54], %150 {strides = array<i32>} : memref<8x8x128xbf16, #tpu.memory_space<vmem>>, vector<1x8x128xbf16>,
    %c2 = arith.constant 2 : index
    %c0_55 = arith.constant 0 : index
    %c0_56 = arith.constant 0 : index
    %151 = vector.load %arg16[%c2, %c0_55, %c0_56] : memref<8x8x512xf32, #tpu.memory_space<vmem>>, vector<1x8x512xf32>
    %152 = vector.shape_cast %151 : vector<1x8x512xf32> to vector<8x512xf32>
    %153 = arith.truncf %117 : vector<8x128xf32> to vector<8x128xbf16>
    %cst_57 = arith.constant dense<0.000000e+00> : vector<8x512xf32>
    %154 = tpu.matmul %153, %12, %cst_57 {dimension_numbers = #tpu.dot_dimension_numbers<[1], [0], [0], [1], [0, 0, 1, 1], [], []>} : vector<8x128xbf16>, vector<128x512xbf16>, vector<8x512xf32> -> vector<8x512xf32>
    %155 = arith.addf %152, %154 : vector<8x512xf32>
    %156 = vector.extract_strided_slice %155 {offsets = [0, 0], sizes = [8, 128], strides = [1, 1]} : vector<8x512xf32> to vector<8x128xf32>
    %157 = arith.negf %156 : vector<8x128xf32>
    %158 = math.exp %157 : vector<8x128xf32>
    %cst_58 = arith.constant 1.000000e+00 : f32
    %159 = vector.broadcast %cst_58 : f32 to vector<8x128xf32>
    %160 = arith.addf %159, %158 : vector<8x128xf32>
    %161 = arith.divf %159, %160 : vector<8x128xf32>
    %162 = vector.extract_strided_slice %155 {offsets = [0, 128], sizes = [8, 128], strides = [1, 1]} : vector<8x512xf32> to vector<8x128xf32>
    %163 = arith.negf %162 : vector<8x128xf32>
    %164 = math.exp %163 : vector<8x128xf32>
    %cst_59 = arith.constant 1.000000e+00 : f32
    %165 = vector.broadcast %cst_59 : f32 to vector<8x128xf32>
    %166 = arith.addf %165, %164 : vector<8x128xf32>
    %167 = arith.divf %165, %166 : vector<8x128xf32>
    %168 = vector.extract_strided_slice %155 {offsets = [0, 256], sizes = [8, 128], strides = [1, 1]} : vector<8x512xf32> to vector<8x128xf32>
    %169 = math.tanh %168 : vector<8x128xf32>
    %170 = vector.extract_strided_slice %155 {offsets = [0, 384], sizes = [8, 128], strides = [1, 1]} : vector<8x512xf32> to vector<8x128xf32>
    %171 = arith.negf %170 : vector<8x128xf32>
    %172 = math.exp %171 : vector<8x128xf32>
    %cst_60 = arith.constant 1.000000e+00 : f32
    %173 = vector.broadcast %cst_60 : f32 to vector<8x128xf32>
    %174 = arith.addf %173, %172 : vector<8x128xf32>
    %175 = arith.divf %173, %174 : vector<8x128xf32>
    %176 = arith.mulf %167, %115 : vector<8x128xf32>
    %177 = arith.mulf %161, %169 : vector<8x128xf32>
    %178 = arith.addf %176, %177 : vector<8x128xf32>
    %179 = math.tanh %178 : vector<8x128xf32>
    %180 = arith.mulf %175, %179 : vector<8x128xf32>
    %181 = tpu.concatenate %180, %146 in 1 : vector<8x128xf32>, vector<8x128xf32> -> vector<8x256xf32>
    %182 = arith.truncf %181 : vector<8x256xf32> to vector<8x256xbf16>
    %cst_61 = arith.constant dense<0.000000e+00> : vector<8x512xf32>
    %183 = tpu.matmul %182, %13, %cst_61 {dimension_numbers = #tpu.dot_dimension_numbers<[1], [0], [0], [1], [0, 0, 1, 1], [], []>} : vector<8x256xbf16>, vector<256x512xbf16>, vector<8x512xf32> -> vector<8x512xf32>
    %184 = arith.addf %183, %16 : vector<8x512xf32>
    %185 = vector.extract_strided_slice %184 {offsets = [0, 0], sizes = [8, 128], strides = [1, 1]} : vector<8x512xf32> to vector<8x128xf32>
    %186 = arith.negf %185 : vector<8x128xf32>
    %187 = math.exp %186 : vector<8x128xf32>
    %cst_62 = arith.constant 1.000000e+00 : f32
    %188 = vector.broadcast %cst_62 : f32 to vector<8x128xf32>
    %189 = arith.addf %188, %187 : vector<8x128xf32>
    %190 = arith.divf %188, %189 : vector<8x128xf32>
    %191 = vector.extract_strided_slice %184 {offsets = [0, 128], sizes = [8, 128], strides = [1, 1]} : vector<8x512xf32> to vector<8x128xf32>
    %192 = arith.negf %191 : vector<8x128xf32>
    %193 = math.exp %192 : vector<8x128xf32>
    %cst_63 = arith.constant 1.000000e+00 : f32
    %194 = vector.broadcast %cst_63 : f32 to vector<8x128xf32>
    %195 = arith.addf %194, %193 : vector<8x128xf32>
    %196 = arith.divf %194, %195 : vector<8x128xf32>
    %197 = vector.extract_strided_slice %184 {offsets = [0, 256], sizes = [8, 128], strides = [1, 1]} : vector<8x512xf32> to vector<8x128xf32>
    %198 = math.tanh %197 : vector<8x128xf32>
    %199 = vector.extract_strided_slice %184 {offsets = [0, 384], sizes = [8, 128], strides = [1, 1]} : vector<8x512xf32> to vector<8x128xf32>
    %200 = arith.negf %199 : vector<8x128xf32>
    %201 = math.exp %200 : vector<8x128xf32>
    %cst_64 = arith.constant 1.000000e+00 : f32
    %202 = vector.broadcast %cst_64 : f32 to vector<8x128xf32>
    %203 = arith.addf %202, %201 : vector<8x128xf32>
    %204 = arith.divf %202, %203 : vector<8x128xf32>
    %205 = arith.mulf %196, %144 : vector<8x128xf32>
    %206 = arith.mulf %190, %198 : vector<8x128xf32>
    %207 = arith.addf %205, %206 : vector<8x128xf32>
    %208 = math.tanh %207 : vector<8x128xf32>
    %209 = arith.mulf %204, %208 : vector<8x128xf32>
    %210 = arith.truncf %209 : vector<8x128xf32> to vector<8x128xbf16>
    %c2_65 = arith.constant 2 : index
    %c0_66 = arith.constant 0 : index
    %c0_67 = arith.constant 0 : index
    %211 = vector.load %arg17[%c2_65, %c0_66, %c0_67] : memref<8x8x128xbf16, #tpu.memory_space<vmem>>, vector<1x8x128xbf16>
    %212 = vector.shape_cast %211 : vector<1x8x128xbf16> to vector<8x128xbf16>
    %213 = vector.shape_cast %210 : vector<8x128xbf16> to vector<1x8x128xbf16>
    tpu.vector_store %arg17[%c2_65, %c0_66, %c0_67], %213 {strides = array<i32>} : memref<8x8x128xbf16, #tpu.memory_space<vmem>>, vector<1x8x128xbf16>,
    %c3 = arith.constant 3 : index
    %c0_68 = arith.constant 0 : index
    %c0_69 = arith.constant 0 : index
    %214 = vector.load %arg16[%c3, %c0_68, %c0_69] : memref<8x8x512xf32, #tpu.memory_space<vmem>>, vector<1x8x512xf32>
    %215 = vector.shape_cast %214 : vector<1x8x512xf32> to vector<8x512xf32>
    %216 = arith.truncf %180 : vector<8x128xf32> to vector<8x128xbf16>
    %cst_70 = arith.constant dense<0.000000e+00> : vector<8x512xf32>
    %217 = tpu.matmul %216, %12, %cst_70 {dimension_numbers = #tpu.dot_dimension_numbers<[1], [0], [0], [1], [0, 0, 1, 1], [], []>} : vector<8x128xbf16>, vector<128x512xbf16>, vector<8x512xf32> -> vector<8x512xf32>
    %218 = arith.addf %215, %217 : vector<8x512xf32>
    %219 = vector.extract_strided_slice %218 {offsets = [0, 0], sizes = [8, 128], strides = [1, 1]} : vector<8x512xf32> to vector<8x128xf32>
    %220 = arith.negf %219 : vector<8x128xf32>
    %221 = math.exp %220 : vector<8x128xf32>
    %cst_71 = arith.constant 1.000000e+00 : f32
    %222 = vector.broadcast %cst_71 : f32 to vector<8x128xf32>
    %223 = arith.addf %222, %221 : vector<8x128xf32>
    %224 = arith.divf %222, %223 : vector<8x128xf32>
    %225 = vector.extract_strided_slice %218 {offsets = [0, 128], sizes = [8, 128], strides = [1, 1]} : vector<8x512xf32> to vector<8x128xf32>
    %226 = arith.negf %225 : vector<8x128xf32>
    %227 = math.exp %226 : vector<8x128xf32>
    %cst_72 = arith.constant 1.000000e+00 : f32
    %228 = vector.broadcast %cst_72 : f32 to vector<8x128xf32>
    %229 = arith.addf %228, %227 : vector<8x128xf32>
    %230 = arith.divf %228, %229 : vector<8x128xf32>
    %231 = vector.extract_strided_slice %218 {offsets = [0, 256], sizes = [8, 128], strides = [1, 1]} : vector<8x512xf32> to vector<8x128xf32>
    %232 = math.tanh %231 : vector<8x128xf32>
    %233 = vector.extract_strided_slice %218 {offsets = [0, 384], sizes = [8, 128], strides = [1, 1]} : vector<8x512xf32> to vector<8x128xf32>
    %234 = arith.negf %233 : vector<8x128xf32>
    %235 = math.exp %234 : vector<8x128xf32>
    %cst_73 = arith.constant 1.000000e+00 : f32
    %236 = vector.broadcast %cst_73 : f32 to vector<8x128xf32>
    %237 = arith.addf %236, %235 : vector<8x128xf32>
    %238 = arith.divf %236, %237 : vector<8x128xf32>
    %239 = arith.mulf %230, %178 : vector<8x128xf32>
    %240 = arith.mulf %224, %232 : vector<8x128xf32>
    %241 = arith.addf %239, %240 : vector<8x128xf32>
    %242 = math.tanh %241 : vector<8x128xf32>
    %243 = arith.mulf %238, %242 : vector<8x128xf32>
    %244 = tpu.concatenate %243, %209 in 1 : vector<8x128xf32>, vector<8x128xf32> -> vector<8x256xf32>
    %245 = arith.truncf %244 : vector<8x256xf32> to vector<8x256xbf16>
    %cst_74 = arith.constant dense<0.000000e+00> : vector<8x512xf32>
    %246 = tpu.matmul %245, %13, %cst_74 {dimension_numbers = #tpu.dot_dimension_numbers<[1], [0], [0], [1], [0, 0, 1, 1], [], []>} : vector<8x256xbf16>, vector<256x512xbf16>, vector<8x512xf32> -> vector<8x512xf32>
    %247 = arith.addf %246, %16 : vector<8x512xf32>
    %248 = vector.extract_strided_slice %247 {offsets = [0, 0], sizes = [8, 128], strides = [1, 1]} : vector<8x512xf32> to vector<8x128xf32>
    %249 = arith.negf %248 : vector<8x128xf32>
    %250 = math.exp %249 : vector<8x128xf32>
    %cst_75 = arith.constant 1.000000e+00 : f32
    %251 = vector.broadcast %cst_75 : f32 to vector<8x128xf32>
    %252 = arith.addf %251, %250 : vector<8x128xf32>
    %253 = arith.divf %251, %252 : vector<8x128xf32>
    %254 = vector.extract_strided_slice %247 {offsets = [0, 128], sizes = [8, 128], strides = [1, 1]} : vector<8x512xf32> to vector<8x128xf32>
    %255 = arith.negf %254 : vector<8x128xf32>
    %256 = math.exp %255 : vector<8x128xf32>
    %cst_76 = arith.constant 1.000000e+00 : f32
    %257 = vector.broadcast %cst_76 : f32 to vector<8x128xf32>
    %258 = arith.addf %257, %256 : vector<8x128xf32>
    %259 = arith.divf %257, %258 : vector<8x128xf32>
    %260 = vector.extract_strided_slice %247 {offsets = [0, 256], sizes = [8, 128], strides = [1, 1]} : vector<8x512xf32> to vector<8x128xf32>
    %261 = math.tanh %260 : vector<8x128xf32>
    %262 = vector.extract_strided_slice %247 {offsets = [0, 384], sizes = [8, 128], strides = [1, 1]} : vector<8x512xf32> to vector<8x128xf32>
    %263 = arith.negf %262 : vector<8x128xf32>
    %264 = math.exp %263 : vector<8x128xf32>
    %cst_77 = arith.constant 1.000000e+00 : f32
    %265 = vector.broadcast %cst_77 : f32 to vector<8x128xf32>
    %266 = arith.addf %265, %264 : vector<8x128xf32>
    %267 = arith.divf %265, %266 : vector<8x128xf32>
    %268 = arith.mulf %259, %207 : vector<8x128xf32>
    %269 = arith.mulf %253, %261 : vector<8x128xf32>
    %270 = arith.addf %268, %269 : vector<8x128xf32>
    %271 = math.tanh %270 : vector<8x128xf32>
    %272 = arith.mulf %267, %271 : vector<8x128xf32>
    %273 = arith.truncf %272 : vector<8x128xf32> to vector<8x128xbf16>
    %c3_78 = arith.constant 3 : index
    %c0_79 = arith.constant 0 : index
    %c0_80 = arith.constant 0 : index
    %274 = vector.load %arg17[%c3_78, %c0_79, %c0_80] : memref<8x8x128xbf16, #tpu.memory_space<vmem>>, vector<1x8x128xbf16>
    %275 = vector.shape_cast %274 : vector<1x8x128xbf16> to vector<8x128xbf16>
    %276 = vector.shape_cast %273 : vector<8x128xbf16> to vector<1x8x128xbf16>
    tpu.vector_store %arg17[%c3_78, %c0_79, %c0_80], %276 {strides = array<i32>} : memref<8x8x128xbf16, #tpu.memory_space<vmem>>, vector<1x8x128xbf16>,
    %c4 = arith.constant 4 : index
    %c0_81 = arith.constant 0 : index
    %c0_82 = arith.constant 0 : index
    %277 = vector.load %arg16[%c4, %c0_81, %c0_82] : memref<8x8x512xf32, #tpu.memory_space<vmem>>, vector<1x8x512xf32>
    %278 = vector.shape_cast %277 : vector<1x8x512xf32> to vector<8x512xf32>
    %279 = arith.truncf %243 : vector<8x128xf32> to vector<8x128xbf16>
    %cst_83 = arith.constant dense<0.000000e+00> : vector<8x512xf32>
    %280 = tpu.matmul %279, %12, %cst_83 {dimension_numbers = #tpu.dot_dimension_numbers<[1], [0], [0], [1], [0, 0, 1, 1], [], []>} : vector<8x128xbf16>, vector<128x512xbf16>, vector<8x512xf32> -> vector<8x512xf32>
    %281 = arith.addf %278, %280 : vector<8x512xf32>
    %282 = vector.extract_strided_slice %281 {offsets = [0, 0], sizes = [8, 128], strides = [1, 1]} : vector<8x512xf32> to vector<8x128xf32>
    %283 = arith.negf %282 : vector<8x128xf32>
    %284 = math.exp %283 : vector<8x128xf32>
    %cst_84 = arith.constant 1.000000e+00 : f32
    %285 = vector.broadcast %cst_84 : f32 to vector<8x128xf32>
    %286 = arith.addf %285, %284 : vector<8x128xf32>
    %287 = arith.divf %285, %286 : vector<8x128xf32>
    %288 = vector.extract_strided_slice %281 {offsets = [0, 128], sizes = [8, 128], strides = [1, 1]} : vector<8x512xf32> to vector<8x128xf32>
    %289 = arith.negf %288 : vector<8x128xf32>
    %290 = math.exp %289 : vector<8x128xf32>
    %cst_85 = arith.constant 1.000000e+00 : f32
    %291 = vector.broadcast %cst_85 : f32 to vector<8x128xf32>
    %292 = arith.addf %291, %290 : vector<8x128xf32>
    %293 = arith.divf %291, %292 : vector<8x128xf32>
    %294 = vector.extract_strided_slice %281 {offsets = [0, 256], sizes = [8, 128], strides = [1, 1]} : vector<8x512xf32> to vector<8x128xf32>
    %295 = math.tanh %294 : vector<8x128xf32>
    %296 = vector.extract_strided_slice %281 {offsets = [0, 384], sizes = [8, 128], strides = [1, 1]} : vector<8x512xf32> to vector<8x128xf32>
    %297 = arith.negf %296 : vector<8x128xf32>
    %298 = math.exp %297 : vector<8x128xf32>
    %cst_86 = arith.constant 1.000000e+00 : f32
    %299 = vector.broadcast %cst_86 : f32 to vector<8x128xf32>
    %300 = arith.addf %299, %298 : vector<8x128xf32>
    %301 = arith.divf %299, %300 : vector<8x128xf32>
    %302 = arith.mulf %293, %241 : vector<8x128xf32>
    %303 = arith.mulf %287, %295 : vector<8x128xf32>
    %304 = arith.addf %302, %303 : vector<8x128xf32>
    %305 = math.tanh %304 : vector<8x128xf32>
    %306 = arith.mulf %301, %305 : vector<8x128xf32>
    %307 = tpu.concatenate %306, %272 in 1 : vector<8x128xf32>, vector<8x128xf32> -> vector<8x256xf32>
    %308 = arith.truncf %307 : vector<8x256xf32> to vector<8x256xbf16>
    %cst_87 = arith.constant dense<0.000000e+00> : vector<8x512xf32>
    %309 = tpu.matmul %308, %13, %cst_87 {dimension_numbers = #tpu.dot_dimension_numbers<[1], [0], [0], [1], [0, 0, 1, 1], [], []>} : vector<8x256xbf16>, vector<256x512xbf16>, vector<8x512xf32> -> vector<8x512xf32>
    %310 = arith.addf %309, %16 : vector<8x512xf32>
    %311 = vector.extract_strided_slice %310 {offsets = [0, 0], sizes = [8, 128], strides = [1, 1]} : vector<8x512xf32> to vector<8x128xf32>
    %312 = arith.negf %311 : vector<8x128xf32>
    %313 = math.exp %312 : vector<8x128xf32>
    %cst_88 = arith.constant 1.000000e+00 : f32
    %314 = vector.broadcast %cst_88 : f32 to vector<8x128xf32>
    %315 = arith.addf %314, %313 : vector<8x128xf32>
    %316 = arith.divf %314, %315 : vector<8x128xf32>
    %317 = vector.extract_strided_slice %310 {offsets = [0, 128], sizes = [8, 128], strides = [1, 1]} : vector<8x512xf32> to vector<8x128xf32>
    %318 = arith.negf %317 : vector<8x128xf32>
    %319 = math.exp %318 : vector<8x128xf32>
    %cst_89 = arith.constant 1.000000e+00 : f32
    %320 = vector.broadcast %cst_89 : f32 to vector<8x128xf32>
    %321 = arith.addf %320, %319 : vector<8x128xf32>
    %322 = arith.divf %320, %321 : vector<8x128xf32>
    %323 = vector.extract_strided_slice %310 {offsets = [0, 256], sizes = [8, 128], strides = [1, 1]} : vector<8x512xf32> to vector<8x128xf32>
    %324 = math.tanh %323 : vector<8x128xf32>
    %325 = vector.extract_strided_slice %310 {offsets = [0, 384], sizes = [8, 128], strides = [1, 1]} : vector<8x512xf32> to vector<8x128xf32>
    %326 = arith.negf %325 : vector<8x128xf32>
    %327 = math.exp %326 : vector<8x128xf32>
    %cst_90 = arith.constant 1.000000e+00 : f32
    %328 = vector.broadcast %cst_90 : f32 to vector<8x128xf32>
    %329 = arith.addf %328, %327 : vector<8x128xf32>
    %330 = arith.divf %328, %329 : vector<8x128xf32>
    %331 = arith.mulf %322, %270 : vector<8x128xf32>
    %332 = arith.mulf %316, %324 : vector<8x128xf32>
    %333 = arith.addf %331, %332 : vector<8x128xf32>
    %334 = math.tanh %333 : vector<8x128xf32>
    %335 = arith.mulf %330, %334 : vector<8x128xf32>
    %336 = arith.truncf %335 : vector<8x128xf32> to vector<8x128xbf16>
    %c4_91 = arith.constant 4 : index
    %c0_92 = arith.constant 0 : index
    %c0_93 = arith.constant 0 : index
    %337 = vector.load %arg17[%c4_91, %c0_92, %c0_93] : memref<8x8x128xbf16, #tpu.memory_space<vmem>>, vector<1x8x128xbf16>
    %338 = vector.shape_cast %337 : vector<1x8x128xbf16> to vector<8x128xbf16>
    %339 = vector.shape_cast %336 : vector<8x128xbf16> to vector<1x8x128xbf16>
    tpu.vector_store %arg17[%c4_91, %c0_92, %c0_93], %339 {strides = array<i32>} : memref<8x8x128xbf16, #tpu.memory_space<vmem>>, vector<1x8x128xbf16>,
    %c5 = arith.constant 5 : index
    %c0_94 = arith.constant 0 : index
    %c0_95 = arith.constant 0 : index
    %340 = vector.load %arg16[%c5, %c0_94, %c0_95] : memref<8x8x512xf32, #tpu.memory_space<vmem>>, vector<1x8x512xf32>
    %341 = vector.shape_cast %340 : vector<1x8x512xf32> to vector<8x512xf32>
    %342 = arith.truncf %306 : vector<8x128xf32> to vector<8x128xbf16>
    %cst_96 = arith.constant dense<0.000000e+00> : vector<8x512xf32>
    %343 = tpu.matmul %342, %12, %cst_96 {dimension_numbers = #tpu.dot_dimension_numbers<[1], [0], [0], [1], [0, 0, 1, 1], [], []>} : vector<8x128xbf16>, vector<128x512xbf16>, vector<8x512xf32> -> vector<8x512xf32>
    %344 = arith.addf %341, %343 : vector<8x512xf32>
    %345 = vector.extract_strided_slice %344 {offsets = [0, 0], sizes = [8, 128], strides = [1, 1]} : vector<8x512xf32> to vector<8x128xf32>
    %346 = arith.negf %345 : vector<8x128xf32>
    %347 = math.exp %346 : vector<8x128xf32>
    %cst_97 = arith.constant 1.000000e+00 : f32
    %348 = vector.broadcast %cst_97 : f32 to vector<8x128xf32>
    %349 = arith.addf %348, %347 : vector<8x128xf32>
    %350 = arith.divf %348, %349 : vector<8x128xf32>
    %351 = vector.extract_strided_slice %344 {offsets = [0, 128], sizes = [8, 128], strides = [1, 1]} : vector<8x512xf32> to vector<8x128xf32>
    %352 = arith.negf %351 : vector<8x128xf32>
    %353 = math.exp %352 : vector<8x128xf32>
    %cst_98 = arith.constant 1.000000e+00 : f32
    %354 = vector.broadcast %cst_98 : f32 to vector<8x128xf32>
    %355 = arith.addf %354, %353 : vector<8x128xf32>
    %356 = arith.divf %354, %355 : vector<8x128xf32>
    %357 = vector.extract_strided_slice %344 {offsets = [0, 256], sizes = [8, 128], strides = [1, 1]} : vector<8x512xf32> to vector<8x128xf32>
    %358 = math.tanh %357 : vector<8x128xf32>
    %359 = vector.extract_strided_slice %344 {offsets = [0, 384], sizes = [8, 128], strides = [1, 1]} : vector<8x512xf32> to vector<8x128xf32>
    %360 = arith.negf %359 : vector<8x128xf32>
    %361 = math.exp %360 : vector<8x128xf32>
    %cst_99 = arith.constant 1.000000e+00 : f32
    %362 = vector.broadcast %cst_99 : f32 to vector<8x128xf32>
    %363 = arith.addf %362, %361 : vector<8x128xf32>
    %364 = arith.divf %362, %363 : vector<8x128xf32>
    %365 = arith.mulf %356, %304 : vector<8x128xf32>
    %366 = arith.mulf %350, %358 : vector<8x128xf32>
    %367 = arith.addf %365, %366 : vector<8x128xf32>
    %368 = math.tanh %367 : vector<8x128xf32>
    %369 = arith.mulf %364, %368 : vector<8x128xf32>
    %370 = tpu.concatenate %369, %335 in 1 : vector<8x128xf32>, vector<8x128xf32> -> vector<8x256xf32>
    %371 = arith.truncf %370 : vector<8x256xf32> to vector<8x256xbf16>
    %cst_100 = arith.constant dense<0.000000e+00> : vector<8x512xf32>
    %372 = tpu.matmul %371, %13, %cst_100 {dimension_numbers = #tpu.dot_dimension_numbers<[1], [0], [0], [1], [0, 0, 1, 1], [], []>} : vector<8x256xbf16>, vector<256x512xbf16>, vector<8x512xf32> -> vector<8x512xf32>
    %373 = arith.addf %372, %16 : vector<8x512xf32>
    %374 = vector.extract_strided_slice %373 {offsets = [0, 0], sizes = [8, 128], strides = [1, 1]} : vector<8x512xf32> to vector<8x128xf32>
    %375 = arith.negf %374 : vector<8x128xf32>
    %376 = math.exp %375 : vector<8x128xf32>
    %cst_101 = arith.constant 1.000000e+00 : f32
    %377 = vector.broadcast %cst_101 : f32 to vector<8x128xf32>
    %378 = arith.addf %377, %376 : vector<8x128xf32>
    %379 = arith.divf %377, %378 : vector<8x128xf32>
    %380 = vector.extract_strided_slice %373 {offsets = [0, 128], sizes = [8, 128], strides = [1, 1]} : vector<8x512xf32> to vector<8x128xf32>
    %381 = arith.negf %380 : vector<8x128xf32>
    %382 = math.exp %381 : vector<8x128xf32>
    %cst_102 = arith.constant 1.000000e+00 : f32
    %383 = vector.broadcast %cst_102 : f32 to vector<8x128xf32>
    %384 = arith.addf %383, %382 : vector<8x128xf32>
    %385 = arith.divf %383, %384 : vector<8x128xf32>
    %386 = vector.extract_strided_slice %373 {offsets = [0, 256], sizes = [8, 128], strides = [1, 1]} : vector<8x512xf32> to vector<8x128xf32>
    %387 = math.tanh %386 : vector<8x128xf32>
    %388 = vector.extract_strided_slice %373 {offsets = [0, 384], sizes = [8, 128], strides = [1, 1]} : vector<8x512xf32> to vector<8x128xf32>
    %389 = arith.negf %388 : vector<8x128xf32>
    %390 = math.exp %389 : vector<8x128xf32>
    %cst_103 = arith.constant 1.000000e+00 : f32
    %391 = vector.broadcast %cst_103 : f32 to vector<8x128xf32>
    %392 = arith.addf %391, %390 : vector<8x128xf32>
    %393 = arith.divf %391, %392 : vector<8x128xf32>
    %394 = arith.mulf %385, %333 : vector<8x128xf32>
    %395 = arith.mulf %379, %387 : vector<8x128xf32>
    %396 = arith.addf %394, %395 : vector<8x128xf32>
    %397 = math.tanh %396 : vector<8x128xf32>
    %398 = arith.mulf %393, %397 : vector<8x128xf32>
    %399 = arith.truncf %398 : vector<8x128xf32> to vector<8x128xbf16>
    %c5_104 = arith.constant 5 : index
    %c0_105 = arith.constant 0 : index
    %c0_106 = arith.constant 0 : index
    %400 = vector.load %arg17[%c5_104, %c0_105, %c0_106] : memref<8x8x128xbf16, #tpu.memory_space<vmem>>, vector<1x8x128xbf16>
    %401 = vector.shape_cast %400 : vector<1x8x128xbf16> to vector<8x128xbf16>
    %402 = vector.shape_cast %399 : vector<8x128xbf16> to vector<1x8x128xbf16>
    tpu.vector_store %arg17[%c5_104, %c0_105, %c0_106], %402 {strides = array<i32>} : memref<8x8x128xbf16, #tpu.memory_space<vmem>>, vector<1x8x128xbf16>,
    %c6 = arith.constant 6 : index
    %c0_107 = arith.constant 0 : index
    %c0_108 = arith.constant 0 : index
    %403 = vector.load %arg16[%c6, %c0_107, %c0_108] : memref<8x8x512xf32, #tpu.memory_space<vmem>>, vector<1x8x512xf32>
    %404 = vector.shape_cast %403 : vector<1x8x512xf32> to vector<8x512xf32>
    %405 = arith.truncf %369 : vector<8x128xf32> to vector<8x128xbf16>
    %cst_109 = arith.constant dense<0.000000e+00> : vector<8x512xf32>
    %406 = tpu.matmul %405, %12, %cst_109 {dimension_numbers = #tpu.dot_dimension_numbers<[1], [0], [0], [1], [0, 0, 1, 1], [], []>} : vector<8x128xbf16>, vector<128x512xbf16>, vector<8x512xf32> -> vector<8x512xf32>
    %407 = arith.addf %404, %406 : vector<8x512xf32>
    %408 = vector.extract_strided_slice %407 {offsets = [0, 0], sizes = [8, 128], strides = [1, 1]} : vector<8x512xf32> to vector<8x128xf32>
    %409 = arith.negf %408 : vector<8x128xf32>
    %410 = math.exp %409 : vector<8x128xf32>
    %cst_110 = arith.constant 1.000000e+00 : f32
    %411 = vector.broadcast %cst_110 : f32 to vector<8x128xf32>
    %412 = arith.addf %411, %410 : vector<8x128xf32>
    %413 = arith.divf %411, %412 : vector<8x128xf32>
    %414 = vector.extract_strided_slice %407 {offsets = [0, 128], sizes = [8, 128], strides = [1, 1]} : vector<8x512xf32> to vector<8x128xf32>
    %415 = arith.negf %414 : vector<8x128xf32>
    %416 = math.exp %415 : vector<8x128xf32>
    %cst_111 = arith.constant 1.000000e+00 : f32
    %417 = vector.broadcast %cst_111 : f32 to vector<8x128xf32>
    %418 = arith.addf %417, %416 : vector<8x128xf32>
    %419 = arith.divf %417, %418 : vector<8x128xf32>
    %420 = vector.extract_strided_slice %407 {offsets = [0, 256], sizes = [8, 128], strides = [1, 1]} : vector<8x512xf32> to vector<8x128xf32>
    %421 = math.tanh %420 : vector<8x128xf32>
    %422 = vector.extract_strided_slice %407 {offsets = [0, 384], sizes = [8, 128], strides = [1, 1]} : vector<8x512xf32> to vector<8x128xf32>
    %423 = arith.negf %422 : vector<8x128xf32>
    %424 = math.exp %423 : vector<8x128xf32>
    %cst_112 = arith.constant 1.000000e+00 : f32
    %425 = vector.broadcast %cst_112 : f32 to vector<8x128xf32>
    %426 = arith.addf %425, %424 : vector<8x128xf32>
    %427 = arith.divf %425, %426 : vector<8x128xf32>
    %428 = arith.mulf %419, %367 : vector<8x128xf32>
    %429 = arith.mulf %413, %421 : vector<8x128xf32>
    %430 = arith.addf %428, %429 : vector<8x128xf32>
    %431 = math.tanh %430 : vector<8x128xf32>
    %432 = arith.mulf %427, %431 : vector<8x128xf32>
    %433 = tpu.concatenate %432, %398 in 1 : vector<8x128xf32>, vector<8x128xf32> -> vector<8x256xf32>
    %434 = arith.truncf %433 : vector<8x256xf32> to vector<8x256xbf16>
    %cst_113 = arith.constant dense<0.000000e+00> : vector<8x512xf32>
    %435 = tpu.matmul %434, %13, %cst_113 {dimension_numbers = #tpu.dot_dimension_numbers<[1], [0], [0], [1], [0, 0, 1, 1], [], []>} : vector<8x256xbf16>, vector<256x512xbf16>, vector<8x512xf32> -> vector<8x512xf32>
    %436 = arith.addf %435, %16 : vector<8x512xf32>
    %437 = vector.extract_strided_slice %436 {offsets = [0, 0], sizes = [8, 128], strides = [1, 1]} : vector<8x512xf32> to vector<8x128xf32>
    %438 = arith.negf %437 : vector<8x128xf32>
    %439 = math.exp %438 : vector<8x128xf32>
    %cst_114 = arith.constant 1.000000e+00 : f32
    %440 = vector.broadcast %cst_114 : f32 to vector<8x128xf32>
    %441 = arith.addf %440, %439 : vector<8x128xf32>
    %442 = arith.divf %440, %441 : vector<8x128xf32>
    %443 = vector.extract_strided_slice %436 {offsets = [0, 128], sizes = [8, 128], strides = [1, 1]} : vector<8x512xf32> to vector<8x128xf32>
    %444 = arith.negf %443 : vector<8x128xf32>
    %445 = math.exp %444 : vector<8x128xf32>
    %cst_115 = arith.constant 1.000000e+00 : f32
    %446 = vector.broadcast %cst_115 : f32 to vector<8x128xf32>
    %447 = arith.addf %446, %445 : vector<8x128xf32>
    %448 = arith.divf %446, %447 : vector<8x128xf32>
    %449 = vector.extract_strided_slice %436 {offsets = [0, 256], sizes = [8, 128], strides = [1, 1]} : vector<8x512xf32> to vector<8x128xf32>
    %450 = math.tanh %449 : vector<8x128xf32>
    %451 = vector.extract_strided_slice %436 {offsets = [0, 384], sizes = [8, 128], strides = [1, 1]} : vector<8x512xf32> to vector<8x128xf32>
    %452 = arith.negf %451 : vector<8x128xf32>
    %453 = math.exp %452 : vector<8x128xf32>
    %cst_116 = arith.constant 1.000000e+00 : f32
    %454 = vector.broadcast %cst_116 : f32 to vector<8x128xf32>
    %455 = arith.addf %454, %453 : vector<8x128xf32>
    %456 = arith.divf %454, %455 : vector<8x128xf32>
    %457 = arith.mulf %448, %396 : vector<8x128xf32>
    %458 = arith.mulf %442, %450 : vector<8x128xf32>
    %459 = arith.addf %457, %458 : vector<8x128xf32>
    %460 = math.tanh %459 : vector<8x128xf32>
    %461 = arith.mulf %456, %460 : vector<8x128xf32>
    %462 = arith.truncf %461 : vector<8x128xf32> to vector<8x128xbf16>
    %c6_117 = arith.constant 6 : index
    %c0_118 = arith.constant 0 : index
    %c0_119 = arith.constant 0 : index
    %463 = vector.load %arg17[%c6_117, %c0_118, %c0_119] : memref<8x8x128xbf16, #tpu.memory_space<vmem>>, vector<1x8x128xbf16>
    %464 = vector.shape_cast %463 : vector<1x8x128xbf16> to vector<8x128xbf16>
    %465 = vector.shape_cast %462 : vector<8x128xbf16> to vector<1x8x128xbf16>
    tpu.vector_store %arg17[%c6_117, %c0_118, %c0_119], %465 {strides = array<i32>} : memref<8x8x128xbf16, #tpu.memory_space<vmem>>, vector<1x8x128xbf16>,
    %c7 = arith.constant 7 : index
    %c0_120 = arith.constant 0 : index
    %c0_121 = arith.constant 0 : index
    %466 = vector.load %arg16[%c7, %c0_120, %c0_121] : memref<8x8x512xf32, #tpu.memory_space<vmem>>, vector<1x8x512xf32>
    %467 = vector.shape_cast %466 : vector<1x8x512xf32> to vector<8x512xf32>
    %468 = arith.truncf %432 : vector<8x128xf32> to vector<8x128xbf16>
    %cst_122 = arith.constant dense<0.000000e+00> : vector<8x512xf32>
    %469 = tpu.matmul %468, %12, %cst_122 {dimension_numbers = #tpu.dot_dimension_numbers<[1], [0], [0], [1], [0, 0, 1, 1], [], []>} : vector<8x128xbf16>, vector<128x512xbf16>, vector<8x512xf32> -> vector<8x512xf32>
    %470 = arith.addf %467, %469 : vector<8x512xf32>
    %471 = vector.extract_strided_slice %470 {offsets = [0, 0], sizes = [8, 128], strides = [1, 1]} : vector<8x512xf32> to vector<8x128xf32>
    %472 = arith.negf %471 : vector<8x128xf32>
    %473 = math.exp %472 : vector<8x128xf32>
    %cst_123 = arith.constant 1.000000e+00 : f32
    %474 = vector.broadcast %cst_123 : f32 to vector<8x128xf32>
    %475 = arith.addf %474, %473 : vector<8x128xf32>
    %476 = arith.divf %474, %475 : vector<8x128xf32>
    %477 = vector.extract_strided_slice %470 {offsets = [0, 128], sizes = [8, 128], strides = [1, 1]} : vector<8x512xf32> to vector<8x128xf32>
    %478 = arith.negf %477 : vector<8x128xf32>
    %479 = math.exp %478 : vector<8x128xf32>
    %cst_124 = arith.constant 1.000000e+00 : f32
    %480 = vector.broadcast %cst_124 : f32 to vector<8x128xf32>
    %481 = arith.addf %480, %479 : vector<8x128xf32>
    %482 = arith.divf %480, %481 : vector<8x128xf32>
    %483 = vector.extract_strided_slice %470 {offsets = [0, 256], sizes = [8, 128], strides = [1, 1]} : vector<8x512xf32> to vector<8x128xf32>
    %484 = math.tanh %483 : vector<8x128xf32>
    %485 = vector.extract_strided_slice %470 {offsets = [0, 384], sizes = [8, 128], strides = [1, 1]} : vector<8x512xf32> to vector<8x128xf32>
    %486 = arith.negf %485 : vector<8x128xf32>
    %487 = math.exp %486 : vector<8x128xf32>
    %cst_125 = arith.constant 1.000000e+00 : f32
    %488 = vector.broadcast %cst_125 : f32 to vector<8x128xf32>
    %489 = arith.addf %488, %487 : vector<8x128xf32>
    %490 = arith.divf %488, %489 : vector<8x128xf32>
    %491 = arith.mulf %482, %430 : vector<8x128xf32>
    %492 = arith.mulf %476, %484 : vector<8x128xf32>
    %493 = arith.addf %491, %492 : vector<8x128xf32>
    %494 = math.tanh %493 : vector<8x128xf32>
    %495 = arith.mulf %490, %494 : vector<8x128xf32>
    %496 = tpu.concatenate %495, %461 in 1 : vector<8x128xf32>, vector<8x128xf32> -> vector<8x256xf32>
    %497 = arith.truncf %496 : vector<8x256xf32> to vector<8x256xbf16>
    %cst_126 = arith.constant dense<0.000000e+00> : vector<8x512xf32>
    %498 = tpu.matmul %497, %13, %cst_126 {dimension_numbers = #tpu.dot_dimension_numbers<[1], [0], [0], [1], [0, 0, 1, 1], [], []>} : vector<8x256xbf16>, vector<256x512xbf16>, vector<8x512xf32> -> vector<8x512xf32>
    %499 = arith.addf %498, %16 : vector<8x512xf32>
    %500 = vector.extract_strided_slice %499 {offsets = [0, 0], sizes = [8, 128], strides = [1, 1]} : vector<8x512xf32> to vector<8x128xf32>
    %501 = arith.negf %500 : vector<8x128xf32>
    %502 = math.exp %501 : vector<8x128xf32>
    %cst_127 = arith.constant 1.000000e+00 : f32
    %503 = vector.broadcast %cst_127 : f32 to vector<8x128xf32>
    %504 = arith.addf %503, %502 : vector<8x128xf32>
    %505 = arith.divf %503, %504 : vector<8x128xf32>
    %506 = vector.extract_strided_slice %499 {offsets = [0, 128], sizes = [8, 128], strides = [1, 1]} : vector<8x512xf32> to vector<8x128xf32>
    %507 = arith.negf %506 : vector<8x128xf32>
    %508 = math.exp %507 : vector<8x128xf32>
    %cst_128 = arith.constant 1.000000e+00 : f32
    %509 = vector.broadcast %cst_128 : f32 to vector<8x128xf32>
    %510 = arith.addf %509, %508 : vector<8x128xf32>
    %511 = arith.divf %509, %510 : vector<8x128xf32>
    %512 = vector.extract_strided_slice %499 {offsets = [0, 256], sizes = [8, 128], strides = [1, 1]} : vector<8x512xf32> to vector<8x128xf32>
    %513 = math.tanh %512 : vector<8x128xf32>
    %514 = vector.extract_strided_slice %499 {offsets = [0, 384], sizes = [8, 128], strides = [1, 1]} : vector<8x512xf32> to vector<8x128xf32>
    %515 = arith.negf %514 : vector<8x128xf32>
    %516 = math.exp %515 : vector<8x128xf32>
    %cst_129 = arith.constant 1.000000e+00 : f32
    %517 = vector.broadcast %cst_129 : f32 to vector<8x128xf32>
    %518 = arith.addf %517, %516 : vector<8x128xf32>
    %519 = arith.divf %517, %518 : vector<8x128xf32>
    %520 = arith.mulf %511, %459 : vector<8x128xf32>
    %521 = arith.mulf %505, %513 : vector<8x128xf32>
    %522 = arith.addf %520, %521 : vector<8x128xf32>
    %523 = math.tanh %522 : vector<8x128xf32>
    %524 = arith.mulf %519, %523 : vector<8x128xf32>
    %525 = arith.truncf %524 : vector<8x128xf32> to vector<8x128xbf16>
    %c7_130 = arith.constant 7 : index
    %c0_131 = arith.constant 0 : index
    %c0_132 = arith.constant 0 : index
    %526 = vector.load %arg17[%c7_130, %c0_131, %c0_132] : memref<8x8x128xbf16, #tpu.memory_space<vmem>>, vector<1x8x128xbf16>
    %527 = vector.shape_cast %526 : vector<1x8x128xbf16> to vector<8x128xbf16>
    %528 = vector.shape_cast %525 : vector<8x128xbf16> to vector<1x8x128xbf16>
    tpu.vector_store %arg17[%c7_130, %c0_131, %c0_132], %528 {strides = array<i32>} : memref<8x8x128xbf16, #tpu.memory_space<vmem>>, vector<1x8x128xbf16>,
    %c0_133 = arith.constant 0 : index
    %c0_134 = arith.constant 0 : index
    %c0_135 = arith.constant 0 : index
    %529 = vector.load %arg14[%c0_133, %c0_134, %c0_135] : memref<2x8x128xf32, #tpu.memory_space<vmem>>, vector<1x8x128xf32>
    %530 = vector.shape_cast %529 : vector<1x8x128xf32> to vector<8x128xf32>
    %531 = vector.shape_cast %495 : vector<8x128xf32> to vector<1x8x128xf32>
    tpu.vector_store %arg14[%c0_133, %c0_134, %c0_135], %531 {strides = array<i32>} : memref<2x8x128xf32, #tpu.memory_space<vmem>>, vector<1x8x128xf32>,
    %c0_136 = arith.constant 0 : index
    %c0_137 = arith.constant 0 : index
    %c0_138 = arith.constant 0 : index
    %532 = vector.load %arg15[%c0_136, %c0_137, %c0_138] : memref<2x8x128xf32, #tpu.memory_space<vmem>>, vector<1x8x128xf32>
    %533 = vector.shape_cast %532 : vector<1x8x128xf32> to vector<8x128xf32>
    %534 = vector.shape_cast %493 : vector<8x128xf32> to vector<1x8x128xf32>
    tpu.vector_store %arg15[%c0_136, %c0_137, %c0_138], %534 {strides = array<i32>} : memref<2x8x128xf32, #tpu.memory_space<vmem>>, vector<1x8x128xf32>,
    %c1_139 = arith.constant 1 : index
    %c0_140 = arith.constant 0 : index
    %c0_141 = arith.constant 0 : index
    %535 = vector.load %arg14[%c1_139, %c0_140, %c0_141] : memref<2x8x128xf32, #tpu.memory_space<vmem>>, vector<1x8x128xf32>
    %536 = vector.shape_cast %535 : vector<1x8x128xf32> to vector<8x128xf32>
    %537 = vector.shape_cast %524 : vector<8x128xf32> to vector<1x8x128xf32>
    tpu.vector_store %arg14[%c1_139, %c0_140, %c0_141], %537 {strides = array<i32>} : memref<2x8x128xf32, #tpu.memory_space<vmem>>, vector<1x8x128xf32>,
    %c1_142 = arith.constant 1 : index
    %c0_143 = arith.constant 0 : index
    %c0_144 = arith.constant 0 : index
    %538 = vector.load %arg15[%c1_142, %c0_143, %c0_144] : memref<2x8x128xf32, #tpu.memory_space<vmem>>, vector<1x8x128xf32>
    %539 = vector.shape_cast %538 : vector<1x8x128xf32> to vector<8x128xf32>
    %540 = vector.shape_cast %522 : vector<8x128xf32> to vector<1x8x128xf32>
    tpu.vector_store %arg15[%c1_142, %c0_143, %c0_144], %540 {strides = array<i32>} : memref<2x8x128xf32, #tpu.memory_space<vmem>>, vector<1x8x128xf32>,
    %c0_145 = arith.constant 0 : index
    %c0_146 = arith.constant 0 : index
    %c0_147 = arith.constant 0 : index
    %541 = vector.load %arg17[%c0_145, %c0_146, %c0_147] : memref<8x8x128xbf16, #tpu.memory_space<vmem>>, vector<8x8x128xbf16>
    %542 = vector.shape_cast %541 : vector<8x8x128xbf16> to vector<64x128xbf16>
    %c0_148 = arith.constant 0 : index
    %c0_149 = arith.constant 0 : index
    %543 = vector.load %arg9[%c0_148, %c0_149] : memref<128x128xbf16, #tpu.memory_space<vmem>>, vector<128x128xbf16>
    %cst_150 = arith.constant dense<0.000000e+00> : vector<64x128xf32>
    %544 = tpu.matmul %542, %543, %cst_150 {dimension_numbers = #tpu.dot_dimension_numbers<[1], [0], [0], [1], [0, 0, 1, 1], [], []>} : vector<64x128xbf16>, vector<128x128xbf16>, vector<64x128xf32> -> vector<64x128xf32>
    %c0_151 = arith.constant 0 : index
    %c0_152 = arith.constant 0 : index
    %545 = vector.load %arg10[%c0_151, %c0_152] : memref<1x128xf32, #tpu.memory_space<vmem>>, vector<1x128xf32>
    %546 = vector.broadcast %545 : vector<1x128xf32> to vector<64x128xf32>
    %547 = arith.addf %544, %546 : vector<64x128xf32>
    %548 = vector.shape_cast %547 : vector<64x128xf32> to vector<8x8x128xf32>
    %c0_153 = arith.constant 0 : index
    %c0_154 = arith.constant 0 : index
    %c0_155 = arith.constant 0 : index
    %549 = vector.load %arg11[%c0_153, %c0_154, %c0_155] : memref<8x8x128xf32, #tpu.memory_space<vmem>>, vector<8x8x128xf32>
    tpu.vector_store %arg11[%c0_153, %c0_154, %c0_155], %548 {strides = array<i32>} : memref<8x8x128xf32, #tpu.memory_space<vmem>>, vector<8x8x128xf32>,
    %c0_i32_156 = arith.constant 0 : i32
    %550 = arith.cmpi eq, %arg0, %c0_i32_156 : i32
    %551 = arith.extui %550 : i1 to i32
    %c0_i32_157 = arith.constant 0 : i32
    %552 = arith.cmpi ne, %551, %c0_i32_157 : i32
    scf.if %552 {
      %c0_158 = arith.constant 0 : index
      %c0_159 = arith.constant 0 : index
      %c0_160 = arith.constant 0 : index
      %553 = vector.load %arg12[%c0_158, %c0_159, %c0_160] : memref<2x8x128xf32, #tpu.memory_space<vmem>>, vector<1x8x128xf32>
      %554 = vector.shape_cast %553 : vector<1x8x128xf32> to vector<8x128xf32>
      %555 = vector.shape_cast %495 : vector<8x128xf32> to vector<1x8x128xf32>
      tpu.vector_store %arg12[%c0_158, %c0_159, %c0_160], %555 {strides = array<i32>} : memref<2x8x128xf32, #tpu.memory_space<vmem>>, vector<1x8x128xf32>,
      %c0_161 = arith.constant 0 : index
      %c0_162 = arith.constant 0 : index
      %c0_163 = arith.constant 0 : index
      %556 = vector.load %arg13[%c0_161, %c0_162, %c0_163] : memref<2x8x128xf32, #tpu.memory_space<vmem>>, vector<1x8x128xf32>
      %557 = vector.shape_cast %556 : vector<1x8x128xf32> to vector<8x128xf32>
      %558 = vector.shape_cast %493 : vector<8x128xf32> to vector<1x8x128xf32>
      tpu.vector_store %arg13[%c0_161, %c0_162, %c0_163], %558 {strides = array<i32>} : memref<2x8x128xf32, #tpu.memory_space<vmem>>, vector<1x8x128xf32>,
      %c1_164 = arith.constant 1 : index
      %c0_165 = arith.constant 0 : index
      %c0_166 = arith.constant 0 : index
      %559 = vector.load %arg12[%c1_164, %c0_165, %c0_166] : memref<2x8x128xf32, #tpu.memory_space<vmem>>, vector<1x8x128xf32>
      %560 = vector.shape_cast %559 : vector<1x8x128xf32> to vector<8x128xf32>
      %561 = vector.shape_cast %524 : vector<8x128xf32> to vector<1x8x128xf32>
      tpu.vector_store %arg12[%c1_164, %c0_165, %c0_166], %561 {strides = array<i32>} : memref<2x8x128xf32, #tpu.memory_space<vmem>>, vector<1x8x128xf32>,
      %c1_167 = arith.constant 1 : index
      %c0_168 = arith.constant 0 : index
      %c0_169 = arith.constant 0 : index
      %562 = vector.load %arg13[%c1_167, %c0_168, %c0_169] : memref<2x8x128xf32, #tpu.memory_space<vmem>>, vector<1x8x128xf32>
      %563 = vector.shape_cast %562 : vector<1x8x128xf32> to vector<8x128xf32>
      %564 = vector.shape_cast %522 : vector<8x128xf32> to vector<1x8x128xf32>
      tpu.vector_store %arg13[%c1_167, %c0_168, %c0_169], %564 {strides = array<i32>} : memref<2x8x128xf32, #tpu.memory_space<vmem>>, vector<1x8x128xf32>,
    } else {
    }
    return
  }
  func.func @transform_0(%arg0: i32) -> (i32, i32, i32) {
    %c0_i32 = arith.constant 0 : i32
    %c0_i32_0 = arith.constant 0 : i32
    %c0_i32_1 = arith.constant 0 : i32
    return %arg0, %c0_i32, %c0_i32_0 : i32, i32, i32
  }
  func.func @transform_1(%arg0: i32) -> (i32, i32, i32) {
    %c0_i32 = arith.constant 0 : i32
    %c0_i32_0 = arith.constant 0 : i32
    %c0_i32_1 = arith.constant 0 : i32
    %c0_i32_2 = arith.constant 0 : i32
    return %c0_i32, %c0_i32_0, %c0_i32_1 : i32, i32, i32
  }
  func.func @transform_2(%arg0: i32) -> (i32, i32, i32) {
    %c0_i32 = arith.constant 0 : i32
    %c0_i32_0 = arith.constant 0 : i32
    %c0_i32_1 = arith.constant 0 : i32
    %c0_i32_2 = arith.constant 0 : i32
    return %c0_i32, %c0_i32_0, %c0_i32_1 : i32, i32, i32
  }
  func.func @transform_3(%arg0: i32) -> (i32, i32) {
    %c0_i32 = arith.constant 0 : i32
    %c0_i32_0 = arith.constant 0 : i32
    %c0_i32_1 = arith.constant 0 : i32
    return %c0_i32, %c0_i32_0 : i32, i32
  }
  func.func @transform_4(%arg0: i32) -> (i32, i32) {
    %c0_i32 = arith.constant 0 : i32
    %c0_i32_0 = arith.constant 0 : i32
    %c0_i32_1 = arith.constant 0 : i32
    return %c0_i32, %c0_i32_0 : i32, i32
  }
  func.func @transform_5(%arg0: i32) -> (i32, i32) {
    %c0_i32 = arith.constant 0 : i32
    %c0_i32_0 = arith.constant 0 : i32
    %c0_i32_1 = arith.constant 0 : i32
    return %c0_i32, %c0_i32_0 : i32, i32
  }
  func.func @transform_6(%arg0: i32) -> (i32, i32) {
    %c0_i32 = arith.constant 0 : i32
    %c0_i32_0 = arith.constant 0 : i32
    %c0_i32_1 = arith.constant 0 : i32
    return %c0_i32, %c0_i32_0 : i32, i32
  }
  func.func @transform_7(%arg0: i32) -> (i32, i32) {
    %c0_i32 = arith.constant 0 : i32
    %c0_i32_0 = arith.constant 0 : i32
    %c0_i32_1 = arith.constant 0 : i32
    return %c0_i32, %c0_i32_0 : i32, i32
  }
  func.func @transform_8(%arg0: i32) -> (i32, i32) {
    %c0_i32 = arith.constant 0 : i32
    %c0_i32_0 = arith.constant 0 : i32
    %c0_i32_1 = arith.constant 0 : i32
    return %c0_i32, %c0_i32_0 : i32, i32
  }
  func.func @transform_9(%arg0: i32) -> (i32, i32) {
    %c0_i32 = arith.constant 0 : i32
    %c0_i32_0 = arith.constant 0 : i32
    %c0_i32_1 = arith.constant 0 : i32
    return %c0_i32, %c0_i32_0 : i32, i32
  }
  func.func @transform_10(%arg0: i32) -> (i32, i32, i32) {
    %c0_i32 = arith.constant 0 : i32
    %c0_i32_0 = arith.constant 0 : i32
    %c0_i32_1 = arith.constant 0 : i32
    return %arg0, %c0_i32, %c0_i32_0 : i32, i32, i32
  }
  func.func @transform_11(%arg0: i32) -> (i32, i32, i32) {
    %c0_i32 = arith.constant 0 : i32
    %c0_i32_0 = arith.constant 0 : i32
    %c0_i32_1 = arith.constant 0 : i32
    %c0_i32_2 = arith.constant 0 : i32
    return %c0_i32, %c0_i32_0, %c0_i32_1 : i32, i32, i32
  }
  func.func @transform_12(%arg0: i32) -> (i32, i32, i32) {
    %c0_i32 = arith.constant 0 : i32
    %c0_i32_0 = arith.constant 0 : i32
    %c0_i32_1 = arith.constant 0 : i32
    %c0_i32_2 = arith.constant 0 : i32
    return %c0_i32, %c0_i32_0, %c0_i32_1 : i32, i32, i32
  }
}

</mosaic_0001>

<bundles_post_ra>
// kernel: text_generation_forward.1
= control target key start
LH: loop header
LB: loop body
LE: loop exit
PB: predicated region body
PF: predicated region fallthrough
CT: control target
= control target key end

     0   :  { %18 = vsyncpa [#allocation7], 0  ;;  %s5856_s0 = inlined_call_operand.vmem [shape: bf16[8,8,128], index: 0, kind: input, shape index: {}]   ;;  %s5857_s1 = inlined_call_operand.vmem [shape: f32[2,8,128], index: 1, kind: input, shape index: {}]   ;;  %s5858_s2 = inlined_call_operand.vmem [shape: f32[2,8,128], index: 2, kind: input, shape index: {}]   ;;  %s5859_s3 = inlined_call_operand.hbm [shape: bf16[128,512], index: 3, kind: input, shape index: {}]   ;;  %s5860_s4 = inlined_call_operand.hbm [shape: bf16[128,512], index: 4, kind: input, shape index: {}]   ;;  %s5861_s5 = inlined_call_operand.vmem [shape: f32[1,512], index: 5, kind: input, shape index: {}]   ;;  %s5862_s6 = inlined_call_operand.hbm [shape: bf16[256,512], index: 6, kind: input, shape index: {}]   ;;  %s5863_s7 = inlined_call_operand.vmem [shape: f32[1,512], index: 7, kind: input, shape index: {}]   ;;  %s5864_s8 = inlined_call_operand.vmem [shape: bf16[128,128], index: 8, kind: input, shape index: {}]   ;;  %s5865_s9 = inlined_call_operand.vmem [shape: f32[1,128], index: 9, kind: input, shape index: {}]   ;;  %s5866_s10 = inlined_call_operand.vmem [shape: f32[8,8,128], index: 10, kind: output, shape index: {0}]   ;;  %s5867_s11 = inlined_call_operand.vmem [shape: f32[2,8,128], index: 11, kind: output, shape index: {1}]   ;;  %s5868_s12 = inlined_call_operand.vmem [shape: f32[2,8,128], index: 12, kind: output, shape index: {2}]  }
   0x1   :  { %19 = vsyncpa [#allocation9], 0  ;;  %s4094_s21 = smov [#allocation8]   ;;  %s4095_s23 = smov [#allocation6]  }
   0x2   :  { %s43_s22 = sshll.u32 %s4094_s21, 4  ;;  %s31_s24 = sshll.u32 %s4095_s23, 4  ;;  %s44_s22 = int_to_ptr.vmem [resolvable:$true] %s43_s22  ;;  %s4165_s24 = int_to_ptr.vmem [resolvable:$true] %s31_s24 }
   0x3   :  { %s4024_s27 = scalar_lea.hbm %s5860_s4, 4096 }
   0x4   :  { %p4025_p0 = scmp.ne.s32.totalorder %s5860_s4, %s4024_s27  ;;  %p4028_p1 = scmp.lt.u32.totalorder %s4024_s27, %s5860_s4 }
   0x6   :  { %p4030_p2 = pnand %p4028_p1, %p4025_p0 }
   0x8   :  { %4033 = shalt.err (!%p4030_p2)
}
   0x9   :  { %s4034_s14 = scalar_lea.vmem %s44_s22, 4096  ;;  %p4039_p4 = scmp.lt.s32.totalorder %s44_s22, %s44_s22 }
   0xa   :  { %p4035_p3 = scmp.ne.s32.totalorder %s44_s22, %s4034_s14  ;;  %p4040_p5 = scmp.lt.s32.totalorder %s4034_s14, %s4034_s14 }
   0xc   :  { %p4041_p6 = por %p4040_p5, %p4039_p4 }
   0xe   :  { %p4042_p7 = pnand %p4041_p6, %p4035_p3 }
  0x10   :  { %4045 = shalt.err (!%p4042_p7)
}
  0x11   :  { %s4096_s15 = smov 256   ;;  %s4097_s16 = smov 16  }
  0x12   :  { %49 = dma.hbm_to_vmem [thread:$0]  %s5860_s4, 4096, %s44_s22, [#allocation9], %s4096_s15, %s4096_s15, %s4097_s16  }
  0x13   :  { %s4046_s21 = scalar_lea.hbm %s5859_s3, 4096 }
  0x14   :  { %p4047_p8 = scmp.ne.s32.totalorder %s5859_s3, %s4046_s21  ;;  %p4050_p9 = scmp.lt.u32.totalorder %s4046_s21, %s5859_s3 }
  0x16   :  { %p4052_p10 = pnand %p4050_p9, %p4047_p8 }
  0x18   :  { %4055 = shalt.err (!%p4052_p10)
}
  0x19   :  { %s4056_s28 = scalar_lea.vmem %s4165_s24, 4096  ;;  %p4061_p12 = scmp.lt.s32.totalorder %s4165_s24, %s4165_s24 }
  0x1a   :  { %p4057_p11 = scmp.ne.s32.totalorder %s4165_s24, %s4056_s28  ;;  %p4062_p13 = scmp.lt.s32.totalorder %s4056_s28, %s4056_s28 }
  0x1c   :  { %p4063_p0 = por %p4062_p13, %p4061_p12 }
  0x1e   :  { %p4064_p1 = pnand %p4063_p0, %p4057_p11 }
  0x20   :  { %4067 = shalt.err (!%p4064_p1)
}
  0x21   :  { %37 = dma.hbm_to_vmem [thread:$0]  %s5859_s3, 4096, %s4165_s24, [#allocation7], %s4096_s15, %s4096_s15, %s4097_s16  }
  0x22   :  { %s4098_s29 = smov [#allocation10]   ;;  %s4068_s17 = scalar_lea.hbm %s5862_s6, 8192 }
  0x23   :  { %s57_s30 = sshll.u32 %s4098_s29, 4  ;;  %p4069_p2 = scmp.ne.s32.totalorder %s5862_s6, %s4068_s17  ;;  %s58_s30 = int_to_ptr.vmem [resolvable:$true] %s57_s30 }
  0x24   :  { %p4072_p3 = scmp.lt.u32.totalorder %s4068_s17, %s5862_s6 }
  0x26   :  { %p4074_p4 = pnand %p4072_p3, %p4069_p2 }
  0x28   :  { %4077 = shalt.err (!%p4074_p4)
}
  0x29   :  { %s4078_s23 = scalar_lea.vmem %s58_s30, 8192  ;;  %p4083_p6 = scmp.lt.s32.totalorder %s58_s30, %s58_s30 }
  0x2a   :  { %p4079_p5 = scmp.ne.s32.totalorder %s58_s30, %s4078_s23  ;;  %p4084_p7 = scmp.lt.s32.totalorder %s4078_s23, %s4078_s23 }
  0x2c   :  { %p4085_p8 = por %p4084_p7, %p4083_p6 }
  0x2e   :  { %p4086_p9 = pnand %p4085_p8, %p4079_p5 }
  0x30   :  { %4089 = shalt.err (!%p4086_p9)
}
  0x31   :  { %63 = dma.hbm_to_vmem [thread:$0]  %s5862_s6, 8192, %s58_s30, [#allocation9], %s4096_s15, %s4096_s15, %s4097_s16  }
  0x32   :  { %4090 = dma.done.wait [#allocation7], 4096  }
  0x33   :  { %4091 = vsyncadd [#allocation7], 4294963200 }
  0x34   :  { %4092 = dma.done.wait [#allocation9], 12288  }
  0x35   :  { %4093 = vsyncadd [#allocation9], 4294955008  ;;  %v5869_v0 = vmov 0   ;;  %v3360_v1 = vld [vmem:[#allocation6 + $0x4] ss:$16 sps:$4 sm:$0xff]   ;;  %v3415_v41 = vld [vmem:[%s5856_s0 + $0x8] sm:$0xff]  }
  0x36   :  { %370 = vmatprep.mubr.bf16.mxu1 %v5869_v0  ;;  %837 = vmatprep.mubr.bf16.mxu0 %v5869_v0  ;;  %v3362_v2 = vld [vmem:[#allocation6] ss:$16 sps:$4 sm:$0xff]   ;;  %v4219_v3 = vld [vmem:[#allocation8 + $0x4] ss:$16 sps:$4 sm:$0xff]   ;;  %v3411_v33 = vld [vmem:[#allocation6 + $0xc] ss:$16 sps:$4 sm:$0xff]  }
  0x37   :  { %338 = vmatprep.subr.bf16.mxu1 %v3360_v1  ;;  %v3365_v4 = vld [vmem:[#allocation8] ss:$16 sps:$4 sm:$0xff]   ;;  %v3366_v5 = vld [vmem:[#allocation6 + $0x24] ss:$16 sps:$4 sm:$0xff]   ;;  %805 = vmatprep.subr.bf16.mxu0 %v4219_v3  ;;  %v3409_v36 = vld [vmem:[#allocation6 + $0x8] ss:$16 sps:$4 sm:$0xff]  }
  0x38   :  { %339 = vmatpush1.bf16.msra.mxu1 %v3362_v2  ;;  %v3368_v6 = vld [vmem:[#allocation6 + $0x20] ss:$16 sps:$4 sm:$0xff]   ;;  %v3369_v7 = vld [vmem:[#allocation8 + $0x24] ss:$16 sps:$4 sm:$0xff]   ;;  %806 = vmatpush1.bf16.msra.mxu0 %v3365_v4  ;;  %v3414_v38 = vld [vmem:[#allocation6 + $0x2c] ss:$16 sps:$4 sm:$0xff]  }
  0x39   :  { %340 = vmatprep.subr.bf16.mxu1 %v3366_v5  ;;  %v3371_v8 = vld [vmem:[#allocation8 + $0x20] ss:$16 sps:$4 sm:$0xff]   ;;  %807 = vmatprep.subr.bf16.mxu0 %v3369_v7  ;;  %v3372_v9 = vld [vmem:[#allocation6 + $0x44] ss:$16 sps:$4 sm:$0xff]   ;;  %v3412_v39 = vld [vmem:[#allocation6 + $0x28] ss:$16 sps:$4 sm:$0xff]  }
  0x3a   :  { %v3374_v10 = vld [vmem:[#allocation6 + $0x40] ss:$16 sps:$4 sm:$0xff]   ;;  %v3375_v11 = vld [vmem:[#allocation8 + $0x44] ss:$16 sps:$4 sm:$0xff]   ;;  %v3418_v40 = vld [vmem:[#allocation6 + $0x4c] ss:$16 sps:$4 sm:$0xff]  }
  0x3b   :  { %v3378_v12 = vld [vmem:[#allocation6 + $0x64] ss:$16 sps:$4 sm:$0xff]   ;;  %v3377_v13 = vld [vmem:[#allocation8 + $0x40] ss:$16 sps:$4 sm:$0xff]   ;;  %v3416_v42 = vld [vmem:[#allocation6 + $0x48] ss:$16 sps:$4 sm:$0xff]  }
  0x3c   :  { %341 = vmatpush1.bf16.msra.mxu1 %v3368_v6  ;;  %808 = vmatpush1.bf16.msra.mxu0 %v3371_v8  ;;  %v3381_v14 = vld [vmem:[#allocation8 + $0x64] ss:$16 sps:$4 sm:$0xff]   ;;  %v3380_v15 = vld [vmem:[#allocation6 + $0x60] ss:$16 sps:$4 sm:$0xff]   ;;  %v3421_v43 = vld [vmem:[#allocation6 + $0x6c] ss:$16 sps:$4 sm:$0xff]  }
  0x3d   :  { %342 = vmatprep.subr.bf16.mxu1 %v3372_v9  ;;  %809 = vmatprep.subr.bf16.mxu0 %v3375_v11  ;;  %v3384_v16 = vld [vmem:[#allocation6 + $0x84] ss:$16 sps:$4 sm:$0xff]   ;;  %v3383_v17 = vld [vmem:[#allocation8 + $0x60] ss:$16 sps:$4 sm:$0xff]   ;;  %v3419_v44 = vld [vmem:[#allocation6 + $0x68] ss:$16 sps:$4 sm:$0xff]  }
  0x3e   :  { %v3387_v18 = vld [vmem:[#allocation8 + $0x84] ss:$16 sps:$4 sm:$0xff]   ;;  %v3386_v19 = vld [vmem:[#allocation6 + $0x80] ss:$16 sps:$4 sm:$0xff]   ;;  %v3425_v45 = vld [vmem:[#allocation6 + $0x8c] ss:$16 sps:$4 sm:$0xff]  }
  0x3f   :  { %v3390_v20 = vld [vmem:[#allocation6 + $0xa4] ss:$16 sps:$4 sm:$0xff]   ;;  %v4222_v21 = vld [vmem:[#allocation8 + $0x80] ss:$16 sps:$4 sm:$0xff]   ;;  %v3423_v47 = vld [vmem:[#allocation6 + $0x88] ss:$16 sps:$4 sm:$0xff]  }
  0x40   :  { %343 = vmatpush1.bf16.msra.mxu1 %v3374_v10  ;;  %810 = vmatpush1.bf16.msra.mxu0 %v3377_v13  ;;  %v4224_v22 = vld [vmem:[#allocation8 + $0xa4] ss:$16 sps:$4 sm:$0xff]   ;;  %v3392_v23 = vld [vmem:[#allocation6 + $0xa0] ss:$16 sps:$4 sm:$0xff]   ;;  %v3428_v48 = vld [vmem:[#allocation6 + $0xac] ss:$16 sps:$4 sm:$0xff]  }
  0x41   :  { %344 = vmatprep.subr.bf16.mxu1 %v3378_v12  ;;  %811 = vmatprep.subr.bf16.mxu0 %v3381_v14  ;;  %v3396_v24 = vld [vmem:[#allocation6 + $0xc4] ss:$16 sps:$4 sm:$0xff]   ;;  %v4227_v25 = vld [vmem:[#allocation8 + $0xa0] ss:$16 sps:$4 sm:$0xff]   ;;  %v3426_v49 = vld [vmem:[#allocation6 + $0xa8] ss:$16 sps:$4 sm:$0xff]  }
  0x42   :  { %v4230_v26 = vld [vmem:[#allocation8 + $0xc4] ss:$16 sps:$4 sm:$0xff]   ;;  %v3398_v27 = vld [vmem:[#allocation6 + $0xc0] ss:$16 sps:$4 sm:$0xff]   ;;  %v3432_v50 = vld [vmem:[#allocation6 + $0xcc] ss:$16 sps:$4 sm:$0xff]  }
  0x43   :  { %v3402_v28 = vld [vmem:[#allocation6 + $0xe4] ss:$16 sps:$4 sm:$0xff]   ;;  %v4233_v29 = vld [vmem:[#allocation8 + $0xc0] ss:$16 sps:$4 sm:$0xff]   ;;  %v3429_v51 = vld [vmem:[%s5856_s0 + $0x18] sm:$0xff]  }
  0x44   :  { %345 = vmatpush1.bf16.msra.mxu1 %v3380_v15  ;;  %812 = vmatpush1.bf16.msra.mxu0 %v3383_v17  ;;  %v4236_v30 = vld [vmem:[#allocation8 + $0xe4] ss:$16 sps:$4 sm:$0xff]   ;;  %v3404_v31 = vld [vmem:[#allocation6 + $0xe0] ss:$16 sps:$4 sm:$0xff]   ;;  %v3430_v52 = vld [vmem:[#allocation6 + $0xc8] ss:$16 sps:$4 sm:$0xff]  }
  0x45   :  { %346 = vmatprep.subr.bf16.mxu1 %v3384_v16  ;;  %813 = vmatprep.subr.bf16.mxu0 %v3387_v18  ;;  %v4238_v32 = vld [vmem:[#allocation8 + $0xe0] ss:$16 sps:$4 sm:$0xff]   ;;  %v3435_v53 = vld [vmem:[#allocation6 + $0xec] ss:$16 sps:$4 sm:$0xff]   ;;  %v3433_v54 = vld [vmem:[#allocation6 + $0xe8] ss:$16 sps:$4 sm:$0xff]  }
  0x46   :  { %v84_v34 = vld [vmem:[%s5857_s1] sm:$0xff]  ;;  %v3422_v46 = vld [vmem:[%s5856_s0 + $0x10] sm:$0xff]   ;;  %v4264_v55 = vld [vmem:[#allocation8 + $0xc] ss:$16 sps:$4 sm:$0xff]  }
  0x47   :  { %v3408_v35 = vld [vmem:[%s5856_s0] sm:$0xff]   ;;  %v4248_v37 = vpack.c.bf16 %v84_v34, %v84_v34  ;;  %6125 = vst [vmem:[#allocation13_spill] sm:$0xff] %v4264_v55  ;;  %v4267_v56 = vld [vmem:[#allocation8 + $0x8] ss:$16 sps:$4 sm:$0xff]   ;;  %v4269_v57 = vld [vmem:[#allocation8 + $0x2c] ss:$16 sps:$4 sm:$0xff]  }
  0x48   :  { %347 = vmatpush1.bf16.msra.mxu1 %v3386_v19  ;;  %814 = vmatpush1.bf16.msra.mxu0 %v4222_v21  ;;  %v4272_v58 = vld [vmem:[#allocation8 + $0x28] ss:$16 sps:$4 sm:$0xff]   ;;  %v4274_v59 = vld [vmem:[#allocation8 + $0x4c] ss:$16 sps:$4 sm:$0xff]   ;;  %v4318_v9 = vld [vmem:[#allocation10 + $0x4] ss:$16 sps:$4 sm:$0xff]  }
  0x49   :  { %348 = vmatprep.subr.bf16.mxu1 %v3390_v20  ;;  %815 = vmatprep.subr.bf16.mxu0 %v4224_v22  ;;  %v4279_v60 = vld [vmem:[#allocation8 + $0x48] ss:$16 sps:$4 sm:$0xff]   ;;  %v4281_v61 = vld [vmem:[#allocation8 + $0x6c] ss:$16 sps:$4 sm:$0xff]   ;;  %v4322_v11 = vld [vmem:[#allocation10] ss:$16 sps:$4 sm:$0xff]  }
  0x4a   :  { %v4286_v62 = vld [vmem:[#allocation8 + $0x68] ss:$16 sps:$4 sm:$0xff]   ;;  %v4290_v63 = vld [vmem:[#allocation8 + $0x8c] ss:$16 sps:$4 sm:$0xff]   ;;  %v4330_v13 = vld [vmem:[#allocation10 + $0x24] ss:$16 sps:$4 sm:$0xff]  }
  0x4b   :  { %v4293_v1 = vld [vmem:[#allocation8 + $0x88] ss:$16 sps:$4 sm:$0xff]   ;;  %v4296_v2 = vld [vmem:[#allocation8 + $0xac] ss:$16 sps:$4 sm:$0xff]   ;;  %v4334_v15 = vld [vmem:[#allocation10 + $0x20] ss:$16 sps:$4 sm:$0xff]  }
  0x4c   :  { %349 = vmatpush1.bf16.msra.mxu1 %v3392_v23  ;;  %816 = vmatpush1.bf16.msra.mxu0 %v4227_v25  ;;  %v4299_v4 = vld [vmem:[#allocation8 + $0xa8] ss:$16 sps:$4 sm:$0xff]   ;;  %v4303_v5 = vld [vmem:[#allocation8 + $0xcc] ss:$16 sps:$4 sm:$0xff]   ;;  %v4342_v17 = vld [vmem:[#allocation10 + $0x44] ss:$16 sps:$4 sm:$0xff]  }
  0x4d   :  { %350 = vmatprep.subr.bf16.mxu1 %v3396_v24  ;;  %817 = vmatprep.subr.bf16.mxu0 %v4230_v26  ;;  %v4306_v6 = vld [vmem:[#allocation8 + $0xc8] ss:$16 sps:$4 sm:$0xff]   ;;  %v4309_v7 = vld [vmem:[#allocation8 + $0xec] ss:$16 sps:$4 sm:$0xff]   ;;  %v4346_v19 = vld [vmem:[#allocation10 + $0x40] ss:$16 sps:$4 sm:$0xff]  }
  0x4e   :  { %v4312_v8 = vld [vmem:[#allocation8 + $0xe8] ss:$16 sps:$4 sm:$0xff]   ;;  %v4320_v10 = vld [vmem:[#allocation10 + $0xc] ss:$16 sps:$4 sm:$0xff]   ;;  %v4354_v23 = vld [vmem:[#allocation10 + $0x64] ss:$16 sps:$4 sm:$0xff]  }
  0x4f   :  { %v4324_v12 = vld [vmem:[#allocation10 + $0x8] ss:$16 sps:$4 sm:$0xff]   ;;  %v4332_v14 = vld [vmem:[#allocation10 + $0x2c] ss:$16 sps:$4 sm:$0xff]   ;;  %v4370_v34 = vld [vmem:[#allocation10 + $0x80] ss:$16 sps:$4 sm:$0xff]  }
  0x50   :  { %351 = vmatpush1.bf16.msra.mxu1 %v3398_v27  ;;  %818 = vmatpush1.bf16.msra.mxu0 %v4233_v29  ;;  %v4336_v16 = vld [vmem:[#allocation10 + $0x28] ss:$16 sps:$4 sm:$0xff]   ;;  %v4344_v18 = vld [vmem:[#allocation10 + $0x4c] ss:$16 sps:$4 sm:$0xff]   ;;  %v4358_v27 = vld [vmem:[#allocation10 + $0x60] ss:$16 sps:$4 sm:$0xff]  }
  0x51   :  { %352 = vmatprep.subr.bf16.mxu1 %v3402_v28  ;;  %819 = vmatprep.subr.bf16.mxu0 %v4236_v30  ;;  %v4348_v20 = vld [vmem:[#allocation10 + $0x48] ss:$16 sps:$4 sm:$0xff]   ;;  %v4356_v24 = vld [vmem:[#allocation10 + $0x6c] ss:$16 sps:$4 sm:$0xff]  }
  0x52   :  { %v4360_v28 = vld [vmem:[#allocation10 + $0x68] ss:$16 sps:$4 sm:$0xff]  }
  0x54   :  { %353 = vmatpush1.bf16.msra.mxu1 %v3404_v31  ;;  %820 = vmatpush1.bf16.msra.mxu0 %v4238_v32  ;;  %v4366_v31 = vld [vmem:[#allocation10 + $0x84] ss:$16 sps:$4 sm:$0xff]  }
  0x55   :  { %411 = vmatprep.subr.bf16.mxu1 %v3411_v33  ;;  %1237 = vmatprep.subr.bf16.mxu0 %v4318_v9  ;;  %v4368_v33 = vld [vmem:[#allocation10 + $0x8c] ss:$16 sps:$4 sm:$0xff]  }
  0x57   :  { %371 = vmatmul.mubr.bf16.vlgmr.msra.gmra.mrb[0].mxu1 %v3408_v35  ;;  %838 = vmatmul.mubr.bf16.vlgmr.msra.gmra.mrb[0].mxu0 %v4248_v37 }
  0x58   :  { %412 = vmatpush1.bf16.msra.mxu1 %v3409_v36  ;;  %380 = vmatprep.mubr.bf16.mxu1 %v5869_v0  ;;  %v4378_v36 = vld [vmem:[#allocation10 + $0xa4] ss:$16 sps:$4 sm:$0xff]  }
  0x59   :  { %413 = vmatprep.subr.bf16.mxu1 %v3414_v38  ;;  %1238 = vmatpush1.bf16.msra.mxu0 %v4322_v11  ;;  %6127 = vst [vmem:[#allocation15_spill] sm:$0xff] %v4378_v36  ;;  %v4382_v38 = vld [vmem:[#allocation10 + $0xa0] ss:$16 sps:$4 sm:$0xff]  }
  0x5a   :  { %1239 = vmatprep.subr.bf16.mxu0 %v4330_v13  ;;  %6129 = vst [vmem:[#allocation17_spill] sm:$0xff] %v4382_v38 }
  0x5c   :  { %414 = vmatpush1.bf16.msra.mxu1 %v3412_v39  ;;  %v4384_v39 = vld [vmem:[#allocation10 + $0xa8] ss:$16 sps:$4 sm:$0xff]  }
  0x5d   :  { %415 = vmatprep.subr.bf16.mxu1 %v3418_v40  ;;  %1240 = vmatpush1.bf16.msra.mxu0 %v4334_v15  ;;  %6130 = vst [vmem:[#allocation18_spill] sm:$0xff] %v4384_v39  ;;  %v4390_v40 = vld [vmem:[#allocation10 + $0xc4] ss:$16 sps:$4 sm:$0xff]  }
  0x5e   :  { %1241 = vmatprep.subr.bf16.mxu0 %v4342_v17  ;;  %6131 = vst [vmem:[#allocation19_spill] sm:$0xff] %v4390_v40 }
  0x5f   :  { %381 = vmatmul.mubr.bf16.gmra.mrb[4].mxu1 %v3415_v41 }
  0x60   :  { %416 = vmatpush1.bf16.msra.mxu1 %v3416_v42  ;;  %390 = vmatprep.mubr.bf16.mxu1 %v5869_v0  ;;  %v4394_v42 = vld [vmem:[#allocation10 + $0xc0] ss:$16 sps:$4 sm:$0xff]  }
  0x61   :  { %417 = vmatprep.subr.bf16.mxu1 %v3421_v43  ;;  %1242 = vmatpush1.bf16.msra.mxu0 %v4346_v19  ;;  %6133 = vst [vmem:[#allocation21_spill] sm:$0xff] %v4394_v42  ;;  %v4396_v43 = vld [vmem:[#allocation10 + $0xc8] ss:$16 sps:$4 sm:$0xff]  }
  0x62   :  { %1243 = vmatprep.subr.bf16.mxu0 %v4354_v23  ;;  %6134 = vst [vmem:[#allocation22_spill] sm:$0xff] %v4396_v43 }
  0x64   :  { %418 = vmatpush1.bf16.msra.mxu1 %v3419_v44  ;;  %v4402_v44 = vld [vmem:[#allocation10 + $0xe4] ss:$16 sps:$4 sm:$0xff]  }
  0x65   :  { %419 = vmatprep.subr.bf16.mxu1 %v3425_v45  ;;  %1244 = vmatpush1.bf16.msra.mxu0 %v4358_v27  ;;  %6135 = vst [vmem:[#allocation23_spill] sm:$0xff] %v4402_v44  ;;  %v4404_v45 = vld [vmem:[#allocation10 + $0xec] ss:$16 sps:$4 sm:$0xff]  }
  0x66   :  { %1245 = vmatprep.subr.bf16.mxu0 %v4366_v31  ;;  %6136 = vst [vmem:[#allocation24_spill] sm:$0xff] %v4404_v45 }
  0x67   :  { %391 = vmatmul.mubr.bf16.gmra.mrb[8].mxu1 %v3422_v46 }
  0x68   :  { %420 = vmatpush1.bf16.msra.mxu1 %v3423_v47  ;;  %400 = vmatprep.mubr.bf16.mxu1 %v5869_v0  ;;  %v4408_v47 = vld [vmem:[#allocation10 + $0xe8] ss:$16 sps:$4 sm:$0xff]  }
  0x69   :  { %421 = vmatprep.subr.bf16.mxu1 %v3428_v48  ;;  %1246 = vmatpush1.bf16.msra.mxu0 %v4370_v34  ;;  %6138 = vst [vmem:[#allocation26_spill] sm:$0xff] %v4408_v47  ;;  %v4414_v48 = vld [vmem:[#allocation10 + $0x104] ss:$16 sps:$4 sm:$0xff]  }
  0x6a   :  { %1247 = vmatprep.subr.bf16.mxu0 %v4378_v36  ;;  %6139 = vst [vmem:[#allocation27_spill] sm:$0xff] %v4414_v48 }
  0x6c   :  { %422 = vmatpush1.bf16.msra.mxu1 %v3426_v49  ;;  %v4416_v49 = vld [vmem:[#allocation10 + $0x10c] ss:$16 sps:$4 sm:$0xff]  }
  0x6d   :  { %423 = vmatprep.subr.bf16.mxu1 %v3432_v50  ;;  %1248 = vmatpush1.bf16.msra.mxu0 %v4382_v38  ;;  %6140 = vst [vmem:[#allocation28_spill] sm:$0xff] %v4416_v49  ;;  %v4418_v50 = vld [vmem:[#allocation10 + $0x100] ss:$16 sps:$4 sm:$0xff]  }
  0x6e   :  { %1249 = vmatprep.subr.bf16.mxu0 %v4390_v40  ;;  %6141 = vst [vmem:[#allocation29_spill] sm:$0xff] %v4418_v50 }
  0x6f   :  { %401 = vmatmul.mubr.bf16.gmra.mrb[12].mxu1 %v3429_v51 }
  0x70   :  { %424 = vmatpush1.bf16.msra.mxu1 %v3430_v52  ;;  %443 = vmatprep.mubr.bf16.mxu1 %v5869_v0  ;;  %v4426_v52 = vld [vmem:[#allocation10 + $0x124] ss:$16 sps:$4 sm:$0xff]  }
  0x71   :  { %425 = vmatprep.subr.bf16.mxu1 %v3435_v53  ;;  %1250 = vmatpush1.bf16.msra.mxu0 %v4394_v42  ;;  %6143 = vst [vmem:[#allocation31_spill] sm:$0xff] %v4426_v52  ;;  %v4428_v53 = vld [vmem:[#allocation10 + $0x12c] ss:$16 sps:$4 sm:$0xff]  }
  0x72   :  { %1251 = vmatprep.subr.bf16.mxu0 %v4402_v44  ;;  %6144 = vst [vmem:[#allocation32_spill] sm:$0xff] %v4428_v53 }
  0x74   :  { %426 = vmatpush1.bf16.msra.mxu1 %v3433_v54  ;;  %v4430_v54 = vld [vmem:[#allocation10 + $0x120] ss:$16 sps:$4 sm:$0xff]  }
  0x75   :  { %846 = vmatprep.subr.bf16.mxu1 %v4264_v55  ;;  %6145 = vst [vmem:[#allocation33_spill] sm:$0xff] %v4430_v54 }
  0x77   :  { %444 = vmatmul.mubr.bf16.vlgmr.msra.gmra.mrb[16].mxu1 %v3408_v35  ;;  %v4372_v35 = vld [vmem:[#allocation10 + $0x88] ss:$16 sps:$4 sm:$0xff]  }
  0x78   :  { %847 = vmatpush1.bf16.msra.mxu1 %v4267_v56  ;;  %453 = vmatprep.mubr.bf16.mxu1 %v5869_v0  ;;  %6126 = vst [vmem:[#allocation14_spill] sm:$0xff] %v4372_v35 }
  0x79   :  { %848 = vmatprep.subr.bf16.mxu1 %v4269_v57 }
  0x7c   :  { %849 = vmatpush1.bf16.msra.mxu1 %v4272_v58 }
  0x7d   :  { %850 = vmatprep.subr.bf16.mxu1 %v4274_v59 }
  0x7f   :  { %454 = vmatmul.mubr.bf16.gmra.mrb[20].mxu1 %v3415_v41  ;;  %v4392_v41 = vld [vmem:[#allocation10 + $0xcc] ss:$16 sps:$4 sm:$0xff]  }
  0x80   :  { %851 = vmatpush1.bf16.msra.mxu1 %v4279_v60  ;;  %463 = vmatprep.mubr.bf16.mxu1 %v5869_v0  ;;  %6132 = vst [vmem:[#allocation20_spill] sm:$0xff] %v4392_v41 }
  0x81   :  { %852 = vmatprep.subr.bf16.mxu1 %v4281_v61 }
  0x84   :  { %853 = vmatpush1.bf16.msra.mxu1 %v4286_v62 }
  0x85   :  { %854 = vmatprep.subr.bf16.mxu1 %v4290_v63 }
  0x87   :  { %464 = vmatmul.mubr.bf16.gmra.mrb[24].mxu1 %v3422_v46  ;;  %v4406_v46 = vld [vmem:[#allocation10 + $0xe0] ss:$16 sps:$4 sm:$0xff]  }
  0x88   :  { %855 = vmatpush1.bf16.msra.mxu1 %v4293_v1  ;;  %473 = vmatprep.mubr.bf16.mxu1 %v5869_v0  ;;  %6137 = vst [vmem:[#allocation25_spill] sm:$0xff] %v4406_v46 }
  0x89   :  { %856 = vmatprep.subr.bf16.mxu1 %v4296_v2  ;;  %1252 = vmatpush1.bf16.msra.mxu0 %v4406_v46  ;;  %v4484_v46 = vld [vmem:[#allocation10 + $0x1cc] ss:$16 sps:$4 sm:$0xff]  }
  0x8a   :  { %1253 = vmatprep.subr.bf16.mxu0 %v4414_v48  ;;  %v4444_v48 = vld [vmem:[#allocation10 + $0x148] ss:$16 sps:$4 sm:$0xff]   ;;  %6164 = vst [vmem:[#allocation52_spill] sm:$0xff] %v4484_v46 }
  0x8b   :  { %6150 = vst [vmem:[#allocation38_spill] sm:$0xff] %v4444_v48 }
  0x8c   :  { %857 = vmatpush1.bf16.msra.mxu1 %v4299_v4 }
  0x8d   :  { %858 = vmatprep.subr.bf16.mxu1 %v4303_v5  ;;  %1254 = vmatpush1.bf16.msra.mxu0 %v4418_v50  ;;  %v4440_v50 = vld [vmem:[#allocation10 + $0x14c] ss:$16 sps:$4 sm:$0xff]  }
  0x8e   :  { %1255 = vmatprep.subr.bf16.mxu0 %v4426_v52  ;;  %6148 = vst [vmem:[#allocation36_spill] sm:$0xff] %v4440_v50  ;;  %v4456_v52 = vld [vmem:[#allocation10 + $0x168] ss:$16 sps:$4 sm:$0xff]  }
  0x8f   :  { %474 = vmatmul.mubr.bf16.gmra.mrb[28].mxu1 %v3429_v51  ;;  %v4420_v51 = vld [vmem:[#allocation10 + $0x108] ss:$16 sps:$4 sm:$0xff]   ;;  %6154 = vst [vmem:[#allocation42_spill] sm:$0xff] %v4456_v52 }
  0x90   :  { %859 = vmatpush1.bf16.msra.mxu1 %v4306_v6  ;;  %878 = vmatprep.mubr.bf16.mxu1 %v5869_v0  ;;  %6142 = vst [vmem:[#allocation30_spill] sm:$0xff] %v4420_v51  ;;  %v4432_v0 = vld [vmem:[#allocation10 + $0x128] ss:$16 sps:$4 sm:$0xff]  }
  0x91   :  { %860 = vmatprep.subr.bf16.mxu1 %v4309_v7  ;;  %6146 = vst [vmem:[#allocation34_spill] sm:$0xff] %v4432_v0  ;;  %1256 = vmatpush1.bf16.msra.mxu0 %v4430_v54  ;;  %v4452_v54 = vld [vmem:[#allocation10 + $0x16c] ss:$16 sps:$4 sm:$0xff]  }
  0x92   :  { %6152 = vst [vmem:[#allocation40_spill] sm:$0xff] %v4452_v54 }
  0x94   :  { %861 = vmatpush1.bf16.msra.mxu1 %v4312_v8 }
  0x95   :  { %1278 = vmatprep.subr.bf16.mxu1 %v4320_v10 }
  0x97   :  { %879 = vmatmul.mubr.bf16.vlgmr.msra.gmra.mrb[32].mxu1 %v4248_v37  ;;  %v4380_v37 = vld [vmem:[#allocation10 + $0xac] ss:$16 sps:$4 sm:$0xff]  }
  0x98   :  { %1279 = vmatpush1.bf16.msra.mxu1 %v4324_v12  ;;  %6128 = vst [vmem:[#allocation16_spill] sm:$0xff] %v4380_v37 }
  0x99   :  { %1280 = vmatprep.subr.bf16.mxu1 %v4332_v14 }
  0x9c   :  { %1281 = vmatpush1.bf16.msra.mxu1 %v4336_v16 }
  0x9d   :  { %1282 = vmatprep.subr.bf16.mxu1 %v4344_v18 }
  0xa0   :  { %1283 = vmatpush1.bf16.msra.mxu1 %v4348_v20 }
  0xa1   :  { %1284 = vmatprep.subr.bf16.mxu1 %v4356_v24 }
  0xa4   :  { %1285 = vmatpush1.bf16.msra.mxu1 %v4360_v28 }
  0xa5   :  { %1286 = vmatprep.subr.bf16.mxu1 %v4368_v33 }
  0xa8   :  { %1287 = vmatpush1.bf16.msra.mxu1 %v4372_v35 }
  0xa9   :  { %1288 = vmatprep.subr.bf16.mxu1 %v4380_v37 }
  0xac   :  { %1289 = vmatpush1.bf16.msra.mxu1 %v4384_v39 }
  0xad   :  { %1290 = vmatprep.subr.bf16.mxu1 %v4392_v41 }
  0xb0   :  { %1291 = vmatpush1.bf16.msra.mxu1 %v4396_v43 }
  0xb1   :  { %1292 = vmatprep.subr.bf16.mxu1 %v4404_v45 }
  0xb4   :  { %1293 = vmatpush1.bf16.msra.mxu1 %v4408_v47  ;;  %v4482_v47 = vld [vmem:[#allocation10 + $0x1c4] ss:$16 sps:$4 sm:$0xff]  }
  0xb5   :  { %1294 = vmatprep.subr.bf16.mxu1 %v4416_v49  ;;  %v4438_v49 = vld [vmem:[#allocation10 + $0x144] ss:$16 sps:$4 sm:$0xff]   ;;  %6163 = vst [vmem:[#allocation51_spill] sm:$0xff] %v4482_v47 }
  0xb6   :  { %6147 = vst [vmem:[#allocation35_spill] sm:$0xff] %v4438_v49  ;;  %1257 = vmatprep.subr.bf16.mxu0 %v4438_v49  ;;  %v4468_v49 = vld [vmem:[#allocation10 + $0x188] ss:$16 sps:$4 sm:$0xff]  }
  0xb7   :  { %6158 = vst [vmem:[#allocation46_spill] sm:$0xff] %v4468_v49 }
  0xb8   :  { %1295 = vmatpush1.bf16.msra.mxu1 %v4420_v51  ;;  %v4442_v51 = vld [vmem:[#allocation10 + $0x140] ss:$16 sps:$4 sm:$0xff]  }
  0xb9   :  { %1296 = vmatprep.subr.bf16.mxu1 %v4428_v53  ;;  %6149 = vst [vmem:[#allocation37_spill] sm:$0xff] %v4442_v51  ;;  %1258 = vmatpush1.bf16.msra.mxu0 %v4442_v51  ;;  %v4450_v53 = vld [vmem:[#allocation10 + $0x164] ss:$16 sps:$4 sm:$0xff]   ;;  %v4464_v51 = vld [vmem:[#allocation10 + $0x18c] ss:$16 sps:$4 sm:$0xff]  }
  0xba   :  { %6151 = vst [vmem:[#allocation39_spill] sm:$0xff] %v4450_v53  ;;  %1259 = vmatprep.subr.bf16.mxu0 %v4450_v53  ;;  %6156 = vst [vmem:[#allocation44_spill] sm:$0xff] %v4464_v51  ;;  %v4480_v53 = vld [vmem:[#allocation10 + $0x1a8] ss:$16 sps:$4 sm:$0xff]  }
  0xbb   :  { %6162 = vst [vmem:[#allocation50_spill] sm:$0xff] %v4480_v53 }
  0xbc   :  { %1297 = vmatpush1.bf16.msra.mxu1 %v4432_v0  ;;  %v4454_v0 = vld [vmem:[#allocation10 + $0x160] ss:$16 sps:$4 sm:$0xff]  }
  0xbd   :  { %1298 = vmatprep.subr.bf16.mxu1 %v4440_v50  ;;  %6153 = vst [vmem:[#allocation41_spill] sm:$0xff] %v4454_v0  ;;  %1260 = vmatpush1.bf16.msra.mxu0 %v4454_v0  ;;  %v4462_v50 = vld [vmem:[#allocation10 + $0x184] ss:$16 sps:$4 sm:$0xff]   ;;  %v4476_v0 = vld [vmem:[#allocation10 + $0x1ac] ss:$16 sps:$4 sm:$0xff]  }
  0xbe   :  { %6155 = vst [vmem:[#allocation43_spill] sm:$0xff] %v4462_v50  ;;  %1261 = vmatprep.subr.bf16.mxu0 %v4462_v50  ;;  %6160 = vst [vmem:[#allocation48_spill] sm:$0xff] %v4476_v0  ;;  %v4498_v50 = vld [vmem:[#allocation10 + $0x1ec] ss:$16 sps:$4 sm:$0xff]  }
  0xbf   :  { %6168 = vst [vmem:[#allocation56_spill] sm:$0xff] %v4498_v50 }
  0xc0   :  { %1299 = vmatpush1.bf16.msra.mxu1 %v4444_v48  ;;  %v4466_v48 = vld [vmem:[#allocation10 + $0x180] ss:$16 sps:$4 sm:$0xff]  }
  0xc1   :  { %1300 = vmatprep.subr.bf16.mxu1 %v4452_v54  ;;  %6157 = vst [vmem:[#allocation45_spill] sm:$0xff] %v4466_v48  ;;  %1262 = vmatpush1.bf16.msra.mxu0 %v4466_v48  ;;  %v4474_v54 = vld [vmem:[#allocation10 + $0x1a4] ss:$16 sps:$4 sm:$0xff]   ;;  %v4492_v48 = vld [vmem:[#allocation10 + $0x1c8] ss:$16 sps:$4 sm:$0xff]  }
  0xc2   :  { %6159 = vst [vmem:[#allocation47_spill] sm:$0xff] %v4474_v54  ;;  %1263 = vmatprep.subr.bf16.mxu0 %v4474_v54  ;;  %6166 = vst [vmem:[#allocation54_spill] sm:$0xff] %v4492_v48 }
  0xc4   :  { %1301 = vmatpush1.bf16.msra.mxu1 %v4456_v52  ;;  %v4478_v52 = vld [vmem:[#allocation10 + $0x1a0] ss:$16 sps:$4 sm:$0xff]  }
  0xc5   :  { %1302 = vmatprep.subr.bf16.mxu1 %v4464_v51  ;;  %6161 = vst [vmem:[#allocation49_spill] sm:$0xff] %v4478_v52  ;;  %1264 = vmatpush1.bf16.msra.mxu0 %v4478_v52  ;;  %v4496_v51 = vld [vmem:[#allocation10 + $0x1e4] ss:$16 sps:$4 sm:$0xff]   ;;  %v4507_v52 = vld [vmem:[#allocation10 + $0x1e8] ss:$16 sps:$4 sm:$0xff]  }
  0xc6   :  { %1265 = vmatprep.subr.bf16.mxu0 %v4482_v47  ;;  %6167 = vst [vmem:[#allocation55_spill] sm:$0xff] %v4496_v51  ;;  %6170 = vst [vmem:[#allocation58_spill] sm:$0xff] %v4507_v52 }
  0xc8   :  { %1303 = vmatpush1.bf16.msra.mxu1 %v4468_v49  ;;  %v4490_v49 = vld [vmem:[#allocation10 + $0x1c0] ss:$16 sps:$4 sm:$0xff]  }
  0xc9   :  { %1304 = vmatprep.subr.bf16.mxu1 %v4476_v0  ;;  %6165 = vst [vmem:[#allocation53_spill] sm:$0xff] %v4490_v49  ;;  %v85_v0 = vld [vmem:[%s5857_s1 + $0x8] sm:$0xff]  ;;  %1266 = vmatpush1.bf16.msra.mxu0 %v4490_v49 }
  0xca   :  { %v916_v54 = vpack.c.bf16 %v85_v0, %v85_v0  ;;  %1267 = vmatprep.subr.bf16.mxu0 %v4496_v51  ;;  %v134_v0 = vlaneseq  ;;  %v132_v51 = vld [vmem:[%s5861_s5] sm:$0xf] }
  0xcc   :  { %1305 = vmatpush1.bf16.msra.mxu1 %v4480_v53  ;;  %v4505_v53 = vld [vmem:[#allocation10 + $0x1e0] ss:$16 sps:$4 sm:$0xff]   ;;  %1269 = vmatprep.mubr.bf16.mxu0 %v916_v54 }
  0xcd   :  { %1306 = vmatprep.subr.bf16.mxu1 %v4484_v46  ;;  %6169 = vst [vmem:[#allocation57_spill] sm:$0xff] %v4505_v53  ;;  %1310 = vmatprep.mubr.bf16.mxu1 %v916_v54 }
  0xce   :  { %1268 = vmatpush1.bf16.msra.mxu0 %v4505_v53 }
  0xcf   :  { %1350 = vmatprep.subr.bf16.mxu0 %v4219_v3 }
  0xd0   :  { %1307 = vmatpush1.bf16.msra.mxu1 %v4492_v48  ;;  %v4515_v48 = vshrl.u32 %v134_v0, 7 }
  0xd1   :  { %1308 = vmatprep.subr.bf16.mxu1 %v4498_v50 }
  0xd2   :  { %v5956_v49 = vsub.s32 0, %v4515_v48  ;;  %v5959_v50 = vsub.s32 1, %v4515_v48 }
  0xd4   :  { %1309 = vmatpush1.bf16.msra.mxu1 %v4507_v52  ;;  %v137_v54 = vrot.slane %v132_v51, %v5956_v49  ;;  %v141_v52 = vrot.slane %v132_v51, %v5959_v50 }
  0xd5   :  { %1391 = vmatprep.subr.bf16.mxu1 %v4264_v55 }
 0x12a   :  { %v372_v3 = vpop.f32.mrb[0].mxu1  ;;  %v839_v47 = vpop.f32.mrb[0].mxu0 }
 0x12b   :  { %v373_v53 = vadd.f32 %v372_v3, %v137_v54  ;;  %v374_v55 = vpop.f32.mrb[1].mxu1  ;;  %v841_v42 = vpop.f32.mrb[1].mxu0 }
 0x12c   :  { %v375_v46 = vadd.f32 %v374_v55, %v141_v52  ;;  %v376_v0 = vpop.f32.mrb[2].mxu1  ;;  %v843_v39 = vpop.f32.mrb[2].mxu0 }
 0x12d   :  { %v4526_v45 = vadd.f32 %v376_v0, %v137_v54  ;;  %v887_v44 = vadd.f32 %v839_v47, %v373_v53  ;;  %v378_v43 = vpop.f32.mrb[3].mxu1  ;;  %v844_v38 = vpop.f32.mrb[3].mxu0 }
 0x12e   :  { %v4528_v41 = vadd.f32 %v378_v43, %v141_v52  ;;  %v888_v40 = vadd.f32 %v841_v42, %v375_v46 }
 0x130   :  { %6171 = vst [vmem:[#allocation59_spill] sm:$0xff] %v4528_v41 }
 0x132   :  { %v382_v49 = vpop.f32.mrb[4].mxu1 }
 0x133   :  { %v4530_v37 = vadd.f32 %v382_v49, %v137_v54  ;;  %v384_v50 = vpop.f32.mrb[5].mxu1 }
 0x134   :  { %v4532_v36 = vadd.f32 %v384_v50, %v141_v52  ;;  %v386_v3 = vpop.f32.mrb[6].mxu1 }
 0x135   :  { %6172 = vst [vmem:[#allocation60_spill] sm:$0xff] %v4530_v37  ;;  %v4534_v55 = vadd.f32 %v386_v3, %v137_v54  ;;  %v388_v35 = vpop.f32.mrb[7].mxu1 }
 0x136   :  { %6173 = vst [vmem:[#allocation61_spill] sm:$0xff] %v4532_v36  ;;  %v4536_v0 = vadd.f32 %v388_v35, %v141_v52  ;;  %v3192_v36 = vmul.f32 -1.442695, %v888_v40 }
 0x137   :  { %6174 = vst [vmem:[#allocation62_spill] sm:$0xff] %v4534_v55 }
 0x138   :  { %6175 = vst [vmem:[#allocation63_spill] sm:$0xff] %v4536_v0  ;;  %3568 = vpow2.f32 %v3192_v36 }
 0x13a   :  { %v392_v47 = vpop.f32.mrb[8].mxu1 }
 0x13b   :  { %v4538_v53 = vadd.f32 %v392_v47, %v137_v54  ;;  %v394_v43 = vpop.f32.mrb[9].mxu1 }
 0x13c   :  { %v4540_v41 = vadd.f32 %v394_v43, %v141_v52  ;;  %v396_v39 = vpop.f32.mrb[10].mxu1  ;;  %v5964_v43 = vsub.s32 2, %v4515_v48 }
 0x13d   :  { %6176 = vst [vmem:[#allocation64_spill] sm:$0xff] %v4538_v53  ;;  %v4542_v38 = vadd.f32 %v396_v39, %v137_v54  ;;  %v398_v42 = vpop.f32.mrb[11].mxu1  ;;  %v5965_v39 = vsub.s32 3, %v4515_v48 }
 0x13e   :  { %6177 = vst [vmem:[#allocation65_spill] sm:$0xff] %v4540_v41  ;;  %v4544_v46 = vadd.f32 %v398_v42, %v141_v52  ;;  %v145_v42 = vrot.slane %v132_v51, %v5964_v43 }
 0x13f   :  { %6178 = vst [vmem:[#allocation66_spill] sm:$0xff] %v4542_v38 }
 0x140   :  { %6179 = vst [vmem:[#allocation67_spill] sm:$0xff] %v4544_v46 }
 0x142   :  { %v402_v49 = vpop.f32.mrb[12].mxu1 }
 0x143   :  { %v4546_v50 = vadd.f32 %v402_v49, %v137_v54  ;;  %v404_v3 = vpop.f32.mrb[13].mxu1  ;;  %v149_v49 = vrot.slane %v132_v51, %v5965_v39  ;;  %v3191_v51 = vmul.f32 -1.442695, %v887_v44 }
 0x144   :  { %v4548_v55 = vadd.f32 %v404_v3, %v141_v52  ;;  %v406_v35 = vpop.f32.mrb[14].mxu1 }
 0x145   :  { %6180 = vst [vmem:[#allocation68_spill] sm:$0xff] %v4546_v50  ;;  %v4550_v0 = vadd.f32 %v406_v35, %v137_v54  ;;  %v408_v47 = vpop.f32.mrb[15].mxu1  ;;  %3570 = vpow2.f32 %v3191_v51 }
 0x146   :  { %6181 = vst [vmem:[#allocation69_spill] sm:$0xff] %v4548_v55  ;;  %v4552_v53 = vadd.f32 %v408_v47, %v141_v52 }
 0x147   :  { %6182 = vst [vmem:[#allocation70_spill] sm:$0xff] %v4550_v0 }
 0x148   :  { %6183 = vst [vmem:[#allocation71_spill] sm:$0xff] %v4552_v53 }
 0x14a   :  { %v445_v38 = vpop.f32.mrb[16].mxu1 }
 0x14b   :  { %v447_v46 = vpop.f32.mrb[17].mxu1 }
 0x14c   :  { %v449_v3 = vpop.f32.mrb[18].mxu1 }
 0x14d   :  { %v4560_v55 = vadd.f32 %v449_v3, %v145_v42  ;;  %v451_v54 = vpop.f32.mrb[19].mxu1 }
 0x14e   :  { %v4562_v35 = vadd.f32 %v451_v54, %v149_v49 }
 0x14f   :  { %6184 = vst [vmem:[#allocation72_spill] sm:$0xff] %v4560_v55 }
 0x150   :  { %6185 = vst [vmem:[#allocation73_spill] sm:$0xff] %v4562_v35 }
 0x152   :  { %v455_v52 = vpop.f32.mrb[20].mxu1 }
 0x153   :  { %v4564_v47 = vadd.f32 %v455_v52, %v145_v42  ;;  %v457_v53 = vpop.f32.mrb[21].mxu1 }
 0x154   :  { %v4566_v0 = vadd.f32 %v457_v53, %v149_v49  ;;  %v459_v50 = vpop.f32.mrb[22].mxu1 }
 0x155   :  { %6186 = vst [vmem:[#allocation74_spill] sm:$0xff] %v4564_v47  ;;  %v4568_v41 = vadd.f32 %v459_v50, %v145_v42  ;;  %v461_v43 = vpop.f32.mrb[23].mxu1 }
 0x156   :  { %6187 = vst [vmem:[#allocation75_spill] sm:$0xff] %v4566_v0  ;;  %v4570_v37 = vadd.f32 %v461_v43, %v149_v49  ;;  %v3569_v43 = vpop.eup %3568 }
 0x157   :  { %6188 = vst [vmem:[#allocation76_spill] sm:$0xff] %v4568_v41  ;;  %v3571_v51 = vpop.eup %3570 }
 0x158   :  { %6189 = vst [vmem:[#allocation77_spill] sm:$0xff] %v4570_v37  ;;  %v448_v37 = vadd.f32 %v447_v46, %v149_v49 }
 0x15a   :  { %v465_v3 = vpop.f32.mrb[24].mxu1 }
 0x15b   :  { %v4572_v39 = vadd.f32 %v465_v3, %v145_v42  ;;  %v467_v54 = vpop.f32.mrb[25].mxu1 }
 0x15c   :  { %v4574_v35 = vadd.f32 %v467_v54, %v149_v49  ;;  %v469_v52 = vpop.f32.mrb[26].mxu1 }
 0x15d   :  { %6190 = vst [vmem:[#allocation78_spill] sm:$0xff] %v4572_v39  ;;  %v4576_v47 = vadd.f32 %v469_v52, %v145_v42  ;;  %v471_v53 = vpop.f32.mrb[27].mxu1  ;;  %v894_v52 = vadd.f32 1.0, %v3571_v51 }
 0x15e   :  { %6191 = vst [vmem:[#allocation79_spill] sm:$0xff] %v4574_v35  ;;  %v4578_v0 = vadd.f32 %v471_v53, %v149_v49  ;;  %v900_v35 = vadd.f32 1.0, %v3569_v43 }
 0x15f   :  { %6192 = vst [vmem:[#allocation80_spill] sm:$0xff] %v4576_v47  ;;  %v446_v47 = vadd.f32 %v445_v38, %v145_v42 }
 0x160   :  { %6193 = vst [vmem:[#allocation81_spill] sm:$0xff] %v4578_v0  ;;  %3572 = vrcp.f32 %v900_v35 }
 0x161   :  { %3574 = vrcp.f32 %v894_v52  ;;  %v6198_v52 = vmov 0  }
 0x162   :  { %v475_v50 = vpop.f32.mrb[28].mxu1 }
 0x163   :  { %v4580_v41 = vadd.f32 %v475_v50, %v145_v42  ;;  %v477_v40 = vpop.f32.mrb[29].mxu1 }
 0x164   :  { %v4582_v44 = vadd.f32 %v477_v40, %v149_v49  ;;  %v479_v36 = vpop.f32.mrb[30].mxu1 }
 0x165   :  { %6194 = vst [vmem:[#allocation82_spill] sm:$0xff] %v4580_v41  ;;  %v4584_v3 = vadd.f32 %v479_v36, %v145_v42  ;;  %v481_v39 = vpop.f32.mrb[31].mxu1 }
 0x166   :  { %6195 = vst [vmem:[#allocation83_spill] sm:$0xff] %v4582_v44  ;;  %v4586_v54 = vadd.f32 %v481_v39, %v149_v49  ;;  %v88_v39 = vld [vmem:[%s5858_s2] sm:$0xff] }
 0x167   :  { %6196 = vst [vmem:[#allocation84_spill] sm:$0xff] %v4584_v3  ;;  %v6219_v3 = vld [vmem:[#allocation34_spill] sm:$0xff] }
 0x168   :  { %6197 = vst [vmem:[#allocation85_spill] sm:$0xff] %v4586_v54  ;;  %v6218_v54 = vld [vmem:[#allocation33_spill] sm:$0xff] }
 0x16a   :  { %v880_v53 = vpop.f32.mrb[32].mxu1  ;;  %v3573_v36 = vpop.eup %3572 }
 0x16b   :  { %v889_v0 = vadd.f32 %v880_v53, %v446_v47  ;;  %v882_v50 = vpop.f32.mrb[33].mxu1  ;;  %v3575_v43 = vpop.eup %3574  ;;  %v910_v38 = vmul.f32 %v3573_v36, %v88_v39  ;;  %v4594_v47 = vld [vmem:[#allocation8] ss:$16 sps:$4 sm:$0xff]   ;;  %v6207_v39 = vld [vmem:[#allocation22_spill] sm:$0xff] }
 0x16c   :  { %v890_v41 = vadd.f32 %v882_v50, %v448_v37  ;;  %v884_v55 = vpop.f32.mrb[34].mxu1  ;;  %v4604_v53 = vld [vmem:[#allocation8 + $0x20] ss:$16 sps:$4 sm:$0xff]   ;;  %v4608_v50 = vld [vmem:[#allocation8 + $0x44] ss:$16 sps:$4 sm:$0xff]  }
 0x16d   :  { %3576 = vtanh.f32 %v889_v0  ;;  %v885_v40 = vpop.f32.mrb[35].mxu1  ;;  %v6206_v36 = vld [vmem:[#allocation21_spill] sm:$0xff] }
 0x16e   :  { %v3193_v44 = vmul.f32 -1.442695, %v890_v41  ;;  %v4620_v40 = vld [vmem:[#allocation8 + $0x60] ss:$16 sps:$4 sm:$0xff]  }
 0x170   :  { %3578 = vpow2.f32 %v3193_v44  ;;  %v4598_v44 = vld [vmem:[#allocation8 + $0x24] ss:$16 sps:$4 sm:$0xff]  }
 0x177   :  { %v3577_v51 = vpop.eup %3576 }
 0x178   :  { %v911_v46 = vmul.f32 %v3577_v51, %v3575_v43  ;;  %v6208_v43 = vld [vmem:[#allocation23_spill] sm:$0xff]  ;;  %v6209_v51 = vld [vmem:[#allocation24_spill] sm:$0xff] }
 0x17a   :  { %v3579_v42 = vpop.eup %3578  ;;  %v4591_v49 = vadd.f32 %v911_v46, %v910_v38  ;;  %v6210_v38 = vld [vmem:[#allocation25_spill] sm:$0xff]  ;;  %v6211_v46 = vld [vmem:[#allocation26_spill] sm:$0xff] }
 0x17b   :  { %v907_v35 = vadd.f32 1.0, %v3579_v42  ;;  %v6212_v42 = vld [vmem:[#allocation27_spill] sm:$0xff] }
 0x17c   :  { %3580 = vtanh.f32 %v4591_v49 }
 0x17d   :  { %3582 = vrcp.f32 %v907_v35  ;;  %v6213_v35 = vld [vmem:[#allocation28_spill] sm:$0xff] }
 0x186   :  { %v3581_v37 = vpop.eup %3580 }
 0x187   :  { %v3583_v55 = vpop.eup %3582 }
 0x188   :  { %v914_v41 = vmul.f32 %v3583_v55, %v3581_v37  ;;  %v6214_v37 = vld [vmem:[#allocation29_spill] sm:$0xff]  ;;  %v6215_v55 = vld [vmem:[#allocation30_spill] sm:$0xff] }
 0x18a   :  { %v915_v0 = vpack.c.bf16 %v914_v41, %v914_v41  ;;  %v6216_v41 = vld [vmem:[#allocation31_spill] sm:$0xff] }
 0x18c   :  { %1270 = vmatmul.mubr.bf16.vlgmr.msra.gmra.mrb[4].mxu0 %v915_v0  ;;  %1311 = vmatmul.mubr.bf16.vlgmr.msra.gmra.mrb[36].mxu1 %v915_v0 }
 0x18d   :  { %1351 = vmatpush1.bf16.msra.mxu0 %v4594_v47  ;;  %1392 = vmatpush1.bf16.msra.mxu1 %v4267_v56  ;;  %v4612_v56 = vld [vmem:[#allocation8 + $0x40] ss:$16 sps:$4 sm:$0xff]  }
 0x18e   :  { %1352 = vmatprep.subr.bf16.mxu0 %v4598_v44  ;;  %1393 = vmatprep.subr.bf16.mxu1 %v4269_v57  ;;  %v4616_v57 = vld [vmem:[#allocation8 + $0x64] ss:$16 sps:$4 sm:$0xff]  }
 0x18f   :  { %1382 = vmatprep.mubr.bf16.mxu0 %v6198_v52  ;;  %1423 = vmatprep.mubr.bf16.mxu1 %v6198_v52 }
 0x191   :  { %1353 = vmatpush1.bf16.msra.mxu0 %v4604_v53  ;;  %1394 = vmatpush1.bf16.msra.mxu1 %v4272_v58  ;;  %v4624_v58 = vld [vmem:[#allocation8 + $0x84] ss:$16 sps:$4 sm:$0xff]  }
 0x192   :  { %1354 = vmatprep.subr.bf16.mxu0 %v4608_v50  ;;  %1395 = vmatprep.subr.bf16.mxu1 %v4274_v59 }
 0x195   :  { %1355 = vmatpush1.bf16.msra.mxu0 %v4612_v56  ;;  %1396 = vmatpush1.bf16.msra.mxu1 %v4279_v60 }
 0x196   :  { %1356 = vmatprep.subr.bf16.mxu0 %v4616_v57  ;;  %1397 = vmatprep.subr.bf16.mxu1 %v4281_v61 }
 0x199   :  { %1357 = vmatpush1.bf16.msra.mxu0 %v4620_v40  ;;  %1398 = vmatpush1.bf16.msra.mxu1 %v4286_v62 }
 0x19a   :  { %1358 = vmatprep.subr.bf16.mxu0 %v4624_v58  ;;  %1399 = vmatprep.subr.bf16.mxu1 %v4290_v63 }
 0x19d   :  { %1359 = vmatpush1.bf16.msra.mxu0 %v4222_v21  ;;  %1400 = vmatpush1.bf16.msra.mxu1 %v4293_v1  ;;  %v6199_v21 = vld [vmem:[#allocation14_spill] sm:$0xff] }
 0x19e   :  { %1360 = vmatprep.subr.bf16.mxu0 %v4224_v22  ;;  %1401 = vmatprep.subr.bf16.mxu1 %v4296_v2  ;;  %v6200_v22 = vld [vmem:[#allocation15_spill] sm:$0xff] }
 0x1a1   :  { %1361 = vmatpush1.bf16.msra.mxu0 %v4227_v25  ;;  %1402 = vmatpush1.bf16.msra.mxu1 %v4299_v4  ;;  %v6201_v25 = vld [vmem:[#allocation16_spill] sm:$0xff] }
 0x1a2   :  { %1362 = vmatprep.subr.bf16.mxu0 %v4230_v26  ;;  %1403 = vmatprep.subr.bf16.mxu1 %v4303_v5  ;;  %v6202_v26 = vld [vmem:[#allocation17_spill] sm:$0xff] }
 0x1a5   :  { %1363 = vmatpush1.bf16.msra.mxu0 %v4233_v29  ;;  %1404 = vmatpush1.bf16.msra.mxu1 %v4306_v6  ;;  %v6203_v29 = vld [vmem:[#allocation18_spill] sm:$0xff] }
 0x1a6   :  { %1364 = vmatprep.subr.bf16.mxu0 %v4236_v30  ;;  %1405 = vmatprep.subr.bf16.mxu1 %v4309_v7  ;;  %v6204_v30 = vld [vmem:[#allocation19_spill] sm:$0xff] }
 0x1a9   :  { %1365 = vmatpush1.bf16.msra.mxu0 %v4238_v32  ;;  %1406 = vmatpush1.bf16.msra.mxu1 %v4312_v8  ;;  %v6205_v32 = vld [vmem:[#allocation20_spill] sm:$0xff] }
 0x1aa   :  { %1461 = vmatprep.subr.bf16.mxu0 %v4318_v9  ;;  %1502 = vmatprep.subr.bf16.mxu1 %v4320_v10 }
 0x1ac   :  { %1383 = vmatmul.mubr.bf16.vlgmr.msra.gmra.mrb[8].mxu0 %v915_v0  ;;  %1424 = vmatmul.mubr.bf16.vlgmr.msra.gmra.mrb[40].mxu1 %v915_v0  ;;  %v6217_v0 = vld [vmem:[#allocation32_spill] sm:$0xff] }
 0x1ad   :  { %1462 = vmatpush1.bf16.msra.mxu0 %v4322_v11  ;;  %1503 = vmatpush1.bf16.msra.mxu1 %v4324_v12 }
 0x1ae   :  { %1463 = vmatprep.subr.bf16.mxu0 %v4330_v13  ;;  %1504 = vmatprep.subr.bf16.mxu1 %v4332_v14 }
 0x1b1   :  { %1464 = vmatpush1.bf16.msra.mxu0 %v4334_v15  ;;  %1505 = vmatpush1.bf16.msra.mxu1 %v4336_v16 }
 0x1b2   :  { %1465 = vmatprep.subr.bf16.mxu0 %v4342_v17  ;;  %1506 = vmatprep.subr.bf16.mxu1 %v4344_v18 }
 0x1b5   :  { %1466 = vmatpush1.bf16.msra.mxu0 %v4346_v19  ;;  %1507 = vmatpush1.bf16.msra.mxu1 %v4348_v20 }
 0x1b6   :  { %1467 = vmatprep.subr.bf16.mxu0 %v4354_v23  ;;  %1508 = vmatprep.subr.bf16.mxu1 %v4356_v24 }
 0x1b9   :  { %1468 = vmatpush1.bf16.msra.mxu0 %v4358_v27  ;;  %1509 = vmatpush1.bf16.msra.mxu1 %v4360_v28 }
 0x1ba   :  { %1469 = vmatprep.subr.bf16.mxu0 %v4366_v31  ;;  %1510 = vmatprep.subr.bf16.mxu1 %v4368_v33 }
 0x1bd   :  { %1470 = vmatpush1.bf16.msra.mxu0 %v4370_v34  ;;  %1511 = vmatpush1.bf16.msra.mxu1 %v6199_v21 }
 0x1be   :  { %1471 = vmatprep.subr.bf16.mxu0 %v6200_v22  ;;  %1512 = vmatprep.subr.bf16.mxu1 %v6201_v25 }
 0x1c1   :  { %1472 = vmatpush1.bf16.msra.mxu0 %v6202_v26  ;;  %1513 = vmatpush1.bf16.msra.mxu1 %v6203_v29 }
 0x1c2   :  { %1473 = vmatprep.subr.bf16.mxu0 %v6204_v30  ;;  %1514 = vmatprep.subr.bf16.mxu1 %v6205_v32 }
 0x1c5   :  { %1474 = vmatpush1.bf16.msra.mxu0 %v6206_v36  ;;  %1515 = vmatpush1.bf16.msra.mxu1 %v6207_v39 }
 0x1c6   :  { %1475 = vmatprep.subr.bf16.mxu0 %v6208_v43  ;;  %1516 = vmatprep.subr.bf16.mxu1 %v6209_v51  ;;  %v6220_v51 = vld [vmem:[#allocation35_spill] sm:$0xff] }
 0x1c9   :  { %1476 = vmatpush1.bf16.msra.mxu0 %v6210_v38  ;;  %1517 = vmatpush1.bf16.msra.mxu1 %v6211_v46  ;;  %v6221_v38 = vld [vmem:[#allocation36_spill] sm:$0xff]  ;;  %v6222_v46 = vld [vmem:[#allocation37_spill] sm:$0xff] }
 0x1ca   :  { %1477 = vmatprep.subr.bf16.mxu0 %v6212_v42  ;;  %1518 = vmatprep.subr.bf16.mxu1 %v6213_v35  ;;  %v6223_v42 = vld [vmem:[#allocation38_spill] sm:$0xff]  ;;  %v6224_v35 = vld [vmem:[#allocation39_spill] sm:$0xff] }
 0x1cd   :  { %1478 = vmatpush1.bf16.msra.mxu0 %v6214_v37  ;;  %1519 = vmatpush1.bf16.msra.mxu1 %v6215_v55  ;;  %v6225_v37 = vld [vmem:[#allocation40_spill] sm:$0xff]  ;;  %v6226_v55 = vld [vmem:[#allocation41_spill] sm:$0xff] }
 0x1ce   :  { %1479 = vmatprep.subr.bf16.mxu0 %v6216_v41  ;;  %1520 = vmatprep.subr.bf16.mxu1 %v6217_v0  ;;  %v6227_v41 = vld [vmem:[#allocation42_spill] sm:$0xff]  ;;  %v6228_v0 = vld [vmem:[#allocation43_spill] sm:$0xff] }
 0x1d1   :  { %1480 = vmatpush1.bf16.msra.mxu0 %v6218_v54  ;;  %1521 = vmatpush1.bf16.msra.mxu1 %v6219_v3  ;;  %v6229_v54 = vld [vmem:[#allocation44_spill] sm:$0xff]  ;;  %v6230_v3 = vld [vmem:[#allocation45_spill] sm:$0xff] }
 0x1d2   :  { %1481 = vmatprep.subr.bf16.mxu0 %v6220_v51  ;;  %1522 = vmatprep.subr.bf16.mxu1 %v6221_v38  ;;  %v6231_v51 = vld [vmem:[#allocation46_spill] sm:$0xff]  ;;  %v6232_v38 = vld [vmem:[#allocation47_spill] sm:$0xff] }
 0x1d5   :  { %1482 = vmatpush1.bf16.msra.mxu0 %v6222_v46  ;;  %1523 = vmatpush1.bf16.msra.mxu1 %v6223_v42  ;;  %v6233_v46 = vld [vmem:[#allocation48_spill] sm:$0xff]  ;;  %v6234_v42 = vld [vmem:[#allocation49_spill] sm:$0xff] }
 0x1d6   :  { %1483 = vmatprep.subr.bf16.mxu0 %v6224_v35  ;;  %1524 = vmatprep.subr.bf16.mxu1 %v6225_v37  ;;  %v6235_v35 = vld [vmem:[#allocation50_spill] sm:$0xff]  ;;  %v6236_v37 = vld [vmem:[#allocation51_spill] sm:$0xff] }
 0x1d9   :  { %1484 = vmatpush1.bf16.msra.mxu0 %v6226_v55  ;;  %1525 = vmatpush1.bf16.msra.mxu1 %v6227_v41  ;;  %v6237_v55 = vld [vmem:[#allocation52_spill] sm:$0xff]  ;;  %v6238_v41 = vld [vmem:[#allocation53_spill] sm:$0xff] }
 0x1da   :  { %1485 = vmatprep.subr.bf16.mxu0 %v6228_v0  ;;  %1526 = vmatprep.subr.bf16.mxu1 %v6229_v54  ;;  %v6239_v0 = vld [vmem:[#allocation54_spill] sm:$0xff]  ;;  %v6240_v54 = vld [vmem:[#allocation55_spill] sm:$0xff] }
 0x1dd   :  { %1486 = vmatpush1.bf16.msra.mxu0 %v6230_v3  ;;  %1527 = vmatpush1.bf16.msra.mxu1 %v6231_v51  ;;  %v6241_v3 = vld [vmem:[#allocation56_spill] sm:$0xff]  ;;  %v6242_v51 = vld [vmem:[#allocation57_spill] sm:$0xff] }
 0x1de   :  { %1487 = vmatprep.subr.bf16.mxu0 %v6232_v38  ;;  %1528 = vmatprep.subr.bf16.mxu1 %v6233_v46  ;;  %v6243_v38 = vld [vmem:[#allocation58_spill] sm:$0xff]  ;;  %v4706_v46 = vld [vmem:[#allocation8 + $0x4] ss:$16 sps:$4 sm:$0xff]  }
 0x1df   :  { %6244 = vst [vmem:[#allocation86_spill] sm:$0xff] %v4706_v46 }
 0x1e1   :  { %1488 = vmatpush1.bf16.msra.mxu0 %v6234_v42  ;;  %1529 = vmatpush1.bf16.msra.mxu1 %v6235_v35  ;;  %v6245_v35 = vld [vmem:[#allocation13_spill] sm:$0xff] }
 0x1e2   :  { %1489 = vmatprep.subr.bf16.mxu0 %v6236_v37  ;;  %1530 = vmatprep.subr.bf16.mxu1 %v6237_v55 }
 0x1e5   :  { %1490 = vmatpush1.bf16.msra.mxu0 %v6238_v41  ;;  %1531 = vmatpush1.bf16.msra.mxu1 %v6239_v0  ;;  %v612_v41 = vld [vmem:[%s5863_s7] sm:$0xf]  ;;  %v6246_v0 = vsub.s32 0, %v4515_v48 }
 0x1e6   :  { %1491 = vmatprep.subr.bf16.mxu0 %v6240_v54  ;;  %1532 = vmatprep.subr.bf16.mxu1 %v6241_v3  ;;  %v6248_v3 = vsub.s32 1, %v4515_v48 }
 0x1e7   :  { %v4715_v55 = vrot.slane %v612_v41, %v6246_v0  ;;  %v6250_v0 = vsub.s32 3, %v4515_v48 }
 0x1e8   :  { %v4719_v54 = vrot.slane %v612_v41, %v6248_v3 }
 0x1e9   :  { %1492 = vmatpush1.bf16.msra.mxu0 %v6242_v51  ;;  %1533 = vmatpush1.bf16.msra.mxu1 %v6243_v38  ;;  %6247 = vst [vmem:[#allocation13_spill] sm:$0xff] %v4715_v55  ;;  %v4725_v26 = vrot.slane %v612_v41, %v6250_v0 }
 0x1ea   :  { %1575 = vmatprep.subr.bf16.mxu0 %v4706_v46  ;;  %1616 = vmatprep.subr.bf16.mxu1 %v6245_v35  ;;  %6249 = vst [vmem:[#allocation87_spill] sm:$0xff] %v4719_v54 }
 0x1eb   :  { %6251 = vst [vmem:[#allocation88_spill] sm:$0xff] %v4725_v26 }
 0x25f   :  { %v1271_v51 = vpop.f32.mrb[4].mxu0  ;;  %v1312_v38 = vpop.f32.mrb[36].mxu1 }
 0x260   :  { %v1272_v37 = vadd.f32 %v1271_v51, %v4715_v55  ;;  %v1273_v42 = vpop.f32.mrb[5].mxu0  ;;  %v1314_v46 = vpop.f32.mrb[37].mxu1  ;;  %v6252_v51 = vsub.s32 2, %v4515_v48 }
 0x261   :  { %v1274_v35 = vadd.f32 %v1273_v42, %v4719_v54  ;;  %v1275_v43 = vpop.f32.mrb[6].mxu0  ;;  %v1316_v39 = vpop.f32.mrb[38].mxu1  ;;  %v1315_v3 = vadd.f32 %v1314_v46, %v4725_v26  ;;  %v6256_v26 = vld [vmem:[#allocation73_spill] sm:$0xff] }
 0x262   :  { %v3258_v36 = vmul.f32 -1.442695, %v1272_v37  ;;  %v1276_v32 = vpop.f32.mrb[7].mxu0  ;;  %v1317_v30 = vpop.f32.mrb[39].mxu1  ;;  %v4730_v55 = vrot.slane %v612_v41, %v6252_v51 }
 0x263   :  { %v3259_v29 = vmul.f32 -1.442695, %v1274_v35  ;;  %v3260_v25 = vmul.f32 -1.442695, %v1315_v3 }
 0x264   :  { %3584 = vpow2.f32 %v3258_v36  ;;  %6253 = vst [vmem:[#allocation89_spill] sm:$0xff] %v4730_v55  ;;  %v1313_v43 = vadd.f32 %v1312_v38, %v4730_v55 }
 0x265   :  { %3586 = vpow2.f32 %v3259_v29  ;;  %v89_v29 = vld [vmem:[%s5858_s2 + $0x8] sm:$0xff] }
 0x266   :  { %3588 = vpow2.f32 %v3260_v25 }
 0x267   :  { %3590 = vtanh.f32 %v1313_v43  ;;  %v6254_v43 = vld [vmem:[#allocation72_spill] sm:$0xff] }
 0x26e   :  { %v3585_v39 = vpop.eup %3584 }
 0x26f   :  { %v3587_v42 = vpop.eup %3586  ;;  %v1322_v32 = vadd.f32 1.0, %v3585_v39 }
 0x270   :  { %v1328_v30 = vadd.f32 1.0, %v3587_v42  ;;  %v3589_v37 = vpop.eup %3588 }
 0x271   :  { %3592 = vrcp.f32 %v1322_v32  ;;  %v3591_v36 = vpop.eup %3590  ;;  %v1335_v35 = vadd.f32 1.0, %v3589_v37 }
 0x272   :  { %3594 = vrcp.f32 %v1328_v30  ;;  %v6255_v30 = vld [vmem:[#allocation59_spill] sm:$0xff] }
 0x273   :  { %3596 = vrcp.f32 %v1335_v35 }
 0x27b   :  { %v3593_v48 = vpop.eup %3592 }
 0x27c   :  { %v3595_v46 = vpop.eup %3594  ;;  %v1339_v41 = vmul.f32 %v3593_v48, %v3591_v36 }
 0x27d   :  { %v1338_v0 = vmul.f32 %v3595_v46, %v89_v29  ;;  %v3597_v46 = vpop.eup %3596 }
 0x27f   :  { %v1384_v38 = vpop.f32.mrb[8].mxu0  ;;  %v1425_v3 = vpop.f32.mrb[40].mxu1  ;;  %v4736_v51 = vadd.f32 %v1339_v41, %v1338_v0 }
 0x280   :  { %v1432_v25 = vadd.f32 %v1384_v38, %v4526_v45  ;;  %v1434_v39 = vadd.f32 %v1425_v3, %v6254_v43  ;;  %v1386_v42 = vpop.f32.mrb[9].mxu0  ;;  %v1427_v32 = vpop.f32.mrb[41].mxu1 }
 0x281   :  { %v1433_v55 = vadd.f32 %v1386_v42, %v6255_v30  ;;  %v1435_v54 = vadd.f32 %v1427_v32, %v6256_v26  ;;  %v1388_v22 = vpop.f32.mrb[10].mxu0  ;;  %v1429_v21 = vpop.f32.mrb[42].mxu1  ;;  %3598 = vtanh.f32 %v4736_v51 }
 0x282   :  { %v3261_v37 = vmul.f32 -1.442695, %v1432_v25  ;;  %v1389_v36 = vpop.f32.mrb[11].mxu0  ;;  %v1430_v29 = vpop.f32.mrb[43].mxu1 }
 0x283   :  { %v3262_v48 = vmul.f32 -1.442695, %v1433_v55  ;;  %v3263_v41 = vmul.f32 -1.442695, %v1435_v54 }
 0x284   :  { %3600 = vpow2.f32 %v3261_v37 }
 0x285   :  { %3602 = vpow2.f32 %v3262_v48  ;;  %v4748_v48 = vld [vmem:[#allocation8 + $0x8] ss:$16 sps:$4 sm:$0xff]  }
 0x286   :  { %3604 = vpow2.f32 %v3263_v41  ;;  %v6282_v41 = vld [vmem:[#allocation39_spill] sm:$0xff] }
 0x287   :  { %3606 = vtanh.f32 %v1434_v39 }
 0x28b   :  { %v3599_v45 = vpop.eup %3598 }
 0x28c   :  { %v1342_v35 = vmul.f32 %v3599_v45, %v3597_v46  ;;  %v4758_v46 = vld [vmem:[#allocation8 + $0x28] ss:$16 sps:$4 sm:$0xff]   ;;  %v4771_v45 = vld [vmem:[#allocation8 + $0x80] ss:$16 sps:$4 sm:$0xff]  }
 0x28e   :  { %v3601_v0 = vpop.eup %3600  ;;  %v1343_v38 = vpack.c.bf16 %v1342_v35, %v1342_v35  ;;  %v6283_v35 = vld [vmem:[#allocation40_spill] sm:$0xff] }
 0x28f   :  { %v3603_v3 = vpop.eup %3602  ;;  %v1439_v43 = vadd.f32 1.0, %v3601_v0  ;;  %v6284_v0 = vld [vmem:[#allocation41_spill] sm:$0xff] }
 0x290   :  { %v1445_v22 = vadd.f32 1.0, %v3603_v3  ;;  %1344 = vst [vmem:[#allocation5] sm:$0xf] %v1343_v38  ;;  %1493 = vmatprep.mubr.bf16.mxu0 %v1343_v38  ;;  %1534 = vmatprep.mubr.bf16.mxu1 %v1343_v38  ;;  %v3605_v21 = vpop.eup %3604  ;;  %v6285_v38 = vld [vmem:[#allocation42_spill] sm:$0xff]  ;;  %v6286_v3 = vld [vmem:[#allocation43_spill] sm:$0xff] }
 0x291   :  { %3608 = vrcp.f32 %v1439_v43  ;;  %v3607_v26 = vpop.eup %3606  ;;  %v1452_v32 = vadd.f32 1.0, %v3605_v21  ;;  %v6287_v43 = vld [vmem:[#allocation44_spill] sm:$0xff]  ;;  %v6289_v21 = vld [vmem:[#allocation46_spill] sm:$0xff] }
 0x292   :  { %3610 = vrcp.f32 %v1445_v22  ;;  %v6288_v22 = vld [vmem:[#allocation45_spill] sm:$0xff] }
 0x293   :  { %3612 = vrcp.f32 %v1452_v32  ;;  %v6294_v32 = vld [vmem:[#allocation51_spill] sm:$0xff] }
 0x29b   :  { %v3609_v55 = vpop.eup %3608 }
 0x29c   :  { %v3611_v25 = vpop.eup %3610  ;;  %v1456_v42 = vmul.f32 %v3609_v55, %v3607_v26  ;;  %v6290_v26 = vld [vmem:[#allocation47_spill] sm:$0xff]  ;;  %v6291_v55 = vld [vmem:[#allocation48_spill] sm:$0xff] }
 0x29d   :  { %v1455_v54 = vmul.f32 %v3611_v25, %v4591_v49  ;;  %v3613_v39 = vpop.eup %3612  ;;  %v4752_v49 = vld [vmem:[#allocation8 + $0x2c] ss:$16 sps:$4 sm:$0xff]   ;;  %v6292_v25 = vld [vmem:[#allocation49_spill] sm:$0xff] }
 0x29f   :  { %v4744_v30 = vadd.f32 %v1456_v42, %v1455_v54  ;;  %v6293_v42 = vld [vmem:[#allocation50_spill] sm:$0xff]  ;;  %v6295_v54 = vld [vmem:[#allocation52_spill] sm:$0xff] }
 0x2a1   :  { %3614 = vtanh.f32 %v4744_v30 }
 0x2ab   :  { %v3615_v37 = vpop.eup %3614 }
 0x2ac   :  { %v1459_v36 = vmul.f32 %v3615_v37, %v3613_v39  ;;  %v6296_v39 = vld [vmem:[#allocation53_spill] sm:$0xff]  ;;  %v6297_v37 = vld [vmem:[#allocation54_spill] sm:$0xff] }
 0x2ae   :  { %v1460_v29 = vpack.c.bf16 %v1459_v36, %v1459_v36  ;;  %v6298_v36 = vld [vmem:[#allocation55_spill] sm:$0xff] }
 0x2b0   :  { %1494 = vmatmul.mubr.bf16.vlgmr.msra.gmra.mrb[12].mxu0 %v1460_v29  ;;  %1535 = vmatmul.mubr.bf16.vlgmr.msra.gmra.mrb[44].mxu1 %v1460_v29 }
 0x2b1   :  { %1576 = vmatpush1.bf16.msra.mxu0 %v4594_v47  ;;  %1617 = vmatpush1.bf16.msra.mxu1 %v4748_v48 }
 0x2b2   :  { %1577 = vmatprep.subr.bf16.mxu0 %v4598_v44  ;;  %1618 = vmatprep.subr.bf16.mxu1 %v4752_v49 }
 0x2b3   :  { %1607 = vmatprep.mubr.bf16.mxu0 %v6198_v52  ;;  %1648 = vmatprep.mubr.bf16.mxu1 %v6198_v52 }
 0x2b5   :  { %1578 = vmatpush1.bf16.msra.mxu0 %v4604_v53  ;;  %1619 = vmatpush1.bf16.msra.mxu1 %v4758_v46 }
 0x2b6   :  { %1579 = vmatprep.subr.bf16.mxu0 %v4608_v50  ;;  %1620 = vmatprep.subr.bf16.mxu1 %v4274_v59  ;;  %v4775_v59 = vld [vmem:[#allocation8 + $0xa4] ss:$16 sps:$4 sm:$0xff]  }
 0x2b9   :  { %1580 = vmatpush1.bf16.msra.mxu0 %v4612_v56  ;;  %1621 = vmatpush1.bf16.msra.mxu1 %v4279_v60  ;;  %v4779_v60 = vld [vmem:[#allocation8 + $0xa0] ss:$16 sps:$4 sm:$0xff]  }
 0x2ba   :  { %1581 = vmatprep.subr.bf16.mxu0 %v4616_v57  ;;  %1622 = vmatprep.subr.bf16.mxu1 %v4281_v61  ;;  %v4783_v61 = vld [vmem:[#allocation8 + $0xc4] ss:$16 sps:$4 sm:$0xff]  }
 0x2bd   :  { %1582 = vmatpush1.bf16.msra.mxu0 %v4620_v40  ;;  %1623 = vmatpush1.bf16.msra.mxu1 %v4286_v62  ;;  %v4787_v62 = vld [vmem:[#allocation8 + $0xc0] ss:$16 sps:$4 sm:$0xff]  }
 0x2be   :  { %1583 = vmatprep.subr.bf16.mxu0 %v4624_v58  ;;  %1624 = vmatprep.subr.bf16.mxu1 %v4290_v63  ;;  %v4791_v63 = vld [vmem:[#allocation8 + $0xe4] ss:$16 sps:$4 sm:$0xff]  }
 0x2c1   :  { %1584 = vmatpush1.bf16.msra.mxu0 %v4771_v45  ;;  %1625 = vmatpush1.bf16.msra.mxu1 %v4293_v1  ;;  %v4795_v1 = vld [vmem:[#allocation8 + $0xe0] ss:$16 sps:$4 sm:$0xff]  }
 0x2c2   :  { %1585 = vmatprep.subr.bf16.mxu0 %v4775_v59  ;;  %1626 = vmatprep.subr.bf16.mxu1 %v4296_v2  ;;  %v6257_v2 = vld [vmem:[#allocation14_spill] sm:$0xff] }
 0x2c5   :  { %1586 = vmatpush1.bf16.msra.mxu0 %v4779_v60  ;;  %1627 = vmatpush1.bf16.msra.mxu1 %v4299_v4  ;;  %v6258_v4 = vld [vmem:[#allocation15_spill] sm:$0xff] }
 0x2c6   :  { %1587 = vmatprep.subr.bf16.mxu0 %v4783_v61  ;;  %1628 = vmatprep.subr.bf16.mxu1 %v4303_v5  ;;  %v6259_v5 = vld [vmem:[#allocation16_spill] sm:$0xff] }
 0x2c9   :  { %1588 = vmatpush1.bf16.msra.mxu0 %v4787_v62  ;;  %1629 = vmatpush1.bf16.msra.mxu1 %v4306_v6  ;;  %v6260_v6 = vld [vmem:[#allocation17_spill] sm:$0xff] }
 0x2ca   :  { %1589 = vmatprep.subr.bf16.mxu0 %v4791_v63  ;;  %1630 = vmatprep.subr.bf16.mxu1 %v4309_v7  ;;  %v6261_v7 = vld [vmem:[#allocation18_spill] sm:$0xff] }
 0x2cd   :  { %1590 = vmatpush1.bf16.msra.mxu0 %v4795_v1  ;;  %1631 = vmatpush1.bf16.msra.mxu1 %v4312_v8  ;;  %v6262_v8 = vld [vmem:[#allocation19_spill] sm:$0xff] }
 0x2ce   :  { %1686 = vmatprep.subr.bf16.mxu0 %v4318_v9  ;;  %1727 = vmatprep.subr.bf16.mxu1 %v4320_v10  ;;  %v6263_v9 = vld [vmem:[#allocation20_spill] sm:$0xff]  ;;  %v6264_v10 = vld [vmem:[#allocation21_spill] sm:$0xff] }
 0x2d0   :  { %1608 = vmatmul.mubr.bf16.vlgmr.msra.gmra.mrb[16].mxu0 %v1460_v29  ;;  %1649 = vmatmul.mubr.bf16.vlgmr.msra.gmra.mrb[48].mxu1 %v1460_v29  ;;  %v6299_v29 = vld [vmem:[#allocation56_spill] sm:$0xff] }
 0x2d1   :  { %1687 = vmatpush1.bf16.msra.mxu0 %v4322_v11  ;;  %1728 = vmatpush1.bf16.msra.mxu1 %v4324_v12  ;;  %v6265_v11 = vld [vmem:[#allocation22_spill] sm:$0xff]  ;;  %v6266_v12 = vld [vmem:[#allocation23_spill] sm:$0xff] }
 0x2d2   :  { %1688 = vmatprep.subr.bf16.mxu0 %v4330_v13  ;;  %1729 = vmatprep.subr.bf16.mxu1 %v4332_v14  ;;  %v6267_v13 = vld [vmem:[#allocation24_spill] sm:$0xff]  ;;  %v6268_v14 = vld [vmem:[#allocation25_spill] sm:$0xff] }
 0x2d5   :  { %1689 = vmatpush1.bf16.msra.mxu0 %v4334_v15  ;;  %1730 = vmatpush1.bf16.msra.mxu1 %v4336_v16  ;;  %v6269_v15 = vld [vmem:[#allocation26_spill] sm:$0xff]  ;;  %v6270_v16 = vld [vmem:[#allocation27_spill] sm:$0xff] }
 0x2d6   :  { %1690 = vmatprep.subr.bf16.mxu0 %v4342_v17  ;;  %1731 = vmatprep.subr.bf16.mxu1 %v4344_v18  ;;  %v6271_v17 = vld [vmem:[#allocation28_spill] sm:$0xff]  ;;  %v6272_v18 = vld [vmem:[#allocation29_spill] sm:$0xff] }
 0x2d9   :  { %1691 = vmatpush1.bf16.msra.mxu0 %v4346_v19  ;;  %1732 = vmatpush1.bf16.msra.mxu1 %v4348_v20  ;;  %v6273_v19 = vld [vmem:[#allocation30_spill] sm:$0xff]  ;;  %v6274_v20 = vld [vmem:[#allocation31_spill] sm:$0xff] }
 0x2da   :  { %1692 = vmatprep.subr.bf16.mxu0 %v4354_v23  ;;  %1733 = vmatprep.subr.bf16.mxu1 %v4356_v24  ;;  %v6275_v23 = vld [vmem:[#allocation32_spill] sm:$0xff]  ;;  %v6276_v24 = vld [vmem:[#allocation33_spill] sm:$0xff] }
 0x2dd   :  { %1693 = vmatpush1.bf16.msra.mxu0 %v4358_v27  ;;  %1734 = vmatpush1.bf16.msra.mxu1 %v4360_v28  ;;  %v6277_v27 = vld [vmem:[#allocation34_spill] sm:$0xff]  ;;  %v6278_v28 = vld [vmem:[#allocation35_spill] sm:$0xff] }
 0x2de   :  { %1694 = vmatprep.subr.bf16.mxu0 %v4366_v31  ;;  %1735 = vmatprep.subr.bf16.mxu1 %v4368_v33  ;;  %v6279_v31 = vld [vmem:[#allocation36_spill] sm:$0xff]  ;;  %v6280_v33 = vld [vmem:[#allocation37_spill] sm:$0xff] }
 0x2e1   :  { %1695 = vmatpush1.bf16.msra.mxu0 %v4370_v34  ;;  %1736 = vmatpush1.bf16.msra.mxu1 %v6257_v2  ;;  %v6281_v34 = vld [vmem:[#allocation38_spill] sm:$0xff]  ;;  %v6300_v2 = vld [vmem:[#allocation57_spill] sm:$0xff] }
 0x2e2   :  { %1696 = vmatprep.subr.bf16.mxu0 %v6258_v4  ;;  %1737 = vmatprep.subr.bf16.mxu1 %v6259_v5  ;;  %v6301_v4 = vld [vmem:[#allocation58_spill] sm:$0xff] }
 0x2e3   :  { %v6302_v5 = vld [vmem:[#allocation86_spill] sm:$0xff] }
 0x2e5   :  { %1697 = vmatpush1.bf16.msra.mxu0 %v6260_v6  ;;  %1738 = vmatpush1.bf16.msra.mxu1 %v6261_v7  ;;  %v4864_v6 = vld [vmem:[#allocation8 + $0xc] ss:$16 sps:$4 sm:$0xff]  }
 0x2e6   :  { %1698 = vmatprep.subr.bf16.mxu0 %v6262_v8  ;;  %1739 = vmatprep.subr.bf16.mxu1 %v6263_v9  ;;  %6303 = vst [vmem:[#allocation72_spill] sm:$0xff] %v4864_v6  ;;  %v6304_v9 = vld [vmem:[#allocation13_spill] sm:$0xff] }
 0x2e9   :  { %1699 = vmatpush1.bf16.msra.mxu0 %v6264_v10  ;;  %1740 = vmatpush1.bf16.msra.mxu1 %v6265_v11 }
 0x2ea   :  { %1700 = vmatprep.subr.bf16.mxu0 %v6266_v12  ;;  %1741 = vmatprep.subr.bf16.mxu1 %v6267_v13  ;;  %v6305_v13 = vld [vmem:[#allocation87_spill] sm:$0xff] }
 0x2ed   :  { %1701 = vmatpush1.bf16.msra.mxu0 %v6268_v14  ;;  %1742 = vmatpush1.bf16.msra.mxu1 %v6269_v15 }
 0x2ee   :  { %1702 = vmatprep.subr.bf16.mxu0 %v6270_v16  ;;  %1743 = vmatprep.subr.bf16.mxu1 %v6271_v17 }
 0x2f1   :  { %1703 = vmatpush1.bf16.msra.mxu0 %v6272_v18  ;;  %1744 = vmatpush1.bf16.msra.mxu1 %v6273_v19 }
 0x2f2   :  { %1704 = vmatprep.subr.bf16.mxu0 %v6274_v20  ;;  %1745 = vmatprep.subr.bf16.mxu1 %v6275_v23  ;;  %v6306_v23 = vld [vmem:[#allocation88_spill] sm:$0xff] }
 0x2f5   :  { %1705 = vmatpush1.bf16.msra.mxu0 %v6276_v24  ;;  %1746 = vmatpush1.bf16.msra.mxu1 %v6277_v27 }
 0x2f6   :  { %1706 = vmatprep.subr.bf16.mxu0 %v6278_v28  ;;  %1747 = vmatprep.subr.bf16.mxu1 %v6279_v31  ;;  %v6307_v28 = vld [vmem:[#allocation89_spill] sm:$0xff] }
 0x2f9   :  { %1707 = vmatpush1.bf16.msra.mxu0 %v6280_v33  ;;  %1748 = vmatpush1.bf16.msra.mxu1 %v6281_v34 }
 0x2fa   :  { %1708 = vmatprep.subr.bf16.mxu0 %v6282_v41  ;;  %1749 = vmatprep.subr.bf16.mxu1 %v6283_v35 }
 0x2fd   :  { %1709 = vmatpush1.bf16.msra.mxu0 %v6284_v0  ;;  %1750 = vmatpush1.bf16.msra.mxu1 %v6285_v38 }
 0x2fe   :  { %1710 = vmatprep.subr.bf16.mxu0 %v6286_v3  ;;  %1751 = vmatprep.subr.bf16.mxu1 %v6287_v43 }
 0x301   :  { %1711 = vmatpush1.bf16.msra.mxu0 %v6288_v22  ;;  %1752 = vmatpush1.bf16.msra.mxu1 %v6289_v21 }
 0x302   :  { %1712 = vmatprep.subr.bf16.mxu0 %v6290_v26  ;;  %1753 = vmatprep.subr.bf16.mxu1 %v6291_v55 }
 0x305   :  { %1713 = vmatpush1.bf16.msra.mxu0 %v6292_v25  ;;  %1754 = vmatpush1.bf16.msra.mxu1 %v6293_v42 }
 0x306   :  { %1714 = vmatprep.subr.bf16.mxu0 %v6294_v32  ;;  %1755 = vmatprep.subr.bf16.mxu1 %v6295_v54  ;;  %v6308_v32 = vld [vmem:[#allocation60_spill] sm:$0xff] }
 0x309   :  { %1715 = vmatpush1.bf16.msra.mxu0 %v6296_v39  ;;  %1756 = vmatpush1.bf16.msra.mxu1 %v6297_v37  ;;  %v6309_v39 = vld [vmem:[#allocation74_spill] sm:$0xff] }
 0x30a   :  { %1716 = vmatprep.subr.bf16.mxu0 %v6298_v36  ;;  %1757 = vmatprep.subr.bf16.mxu1 %v6299_v29 }
 0x30d   :  { %1717 = vmatpush1.bf16.msra.mxu0 %v6300_v2  ;;  %1758 = vmatpush1.bf16.msra.mxu1 %v6301_v4  ;;  %v6310_v2 = vld [vmem:[#allocation61_spill] sm:$0xff] }
 0x30e   :  { %1800 = vmatprep.subr.bf16.mxu0 %v6302_v5  ;;  %1841 = vmatprep.subr.bf16.mxu1 %v4864_v6 }
 0x383   :  { %v1495_v7 = vpop.f32.mrb[12].mxu0  ;;  %v1536_v8 = vpop.f32.mrb[44].mxu1 }
 0x384   :  { %v1496_v10 = vadd.f32 %v1495_v7, %v6304_v9  ;;  %v1497_v11 = vpop.f32.mrb[13].mxu0  ;;  %v1538_v12 = vpop.f32.mrb[45].mxu1  ;;  %v1537_v31 = vadd.f32 %v1536_v8, %v6307_v28  ;;  %v6311_v7 = vld [vmem:[#allocation75_spill] sm:$0xff] }
 0x385   :  { %v1498_v14 = vadd.f32 %v1497_v11, %v6305_v13  ;;  %v1499_v15 = vpop.f32.mrb[14].mxu0  ;;  %v1540_v16 = vpop.f32.mrb[46].mxu1  ;;  %v1539_v24 = vadd.f32 %v1538_v12, %v6306_v23 }
 0x386   :  { %v3264_v17 = vmul.f32 -1.442695, %v1496_v10  ;;  %v1500_v18 = vpop.f32.mrb[15].mxu0  ;;  %v1541_v19 = vpop.f32.mrb[47].mxu1 }
 0x387   :  { %v3265_v20 = vmul.f32 -1.442695, %v1498_v14  ;;  %v3266_v27 = vmul.f32 -1.442695, %v1539_v24 }
 0x388   :  { %3616 = vpow2.f32 %v3264_v17 }
 0x389   :  { %3618 = vpow2.f32 %v3265_v20 }
 0x38a   :  { %3620 = vpow2.f32 %v3266_v27 }
 0x38b   :  { %3622 = vtanh.f32 %v1537_v31 }
 0x392   :  { %v3617_v33 = vpop.eup %3616 }
 0x393   :  { %v3619_v34 = vpop.eup %3618  ;;  %v1546_v41 = vadd.f32 1.0, %v3617_v33 }
 0x394   :  { %v1552_v35 = vadd.f32 1.0, %v3619_v34  ;;  %v3621_v0 = vpop.eup %3620 }
 0x395   :  { %3624 = vrcp.f32 %v1546_v41  ;;  %v3623_v38 = vpop.eup %3622  ;;  %v1559_v21 = vadd.f32 1.0, %v3621_v0 }
 0x396   :  { %3626 = vrcp.f32 %v1552_v35 }
 0x397   :  { %3628 = vrcp.f32 %v1559_v21 }
 0x39f   :  { %v3625_v3 = vpop.eup %3624 }
 0x3a0   :  { %v3627_v43 = vpop.eup %3626  ;;  %v1563_v22 = vmul.f32 %v3625_v3, %v3623_v38 }
 0x3a1   :  { %v1562_v26 = vmul.f32 %v3627_v43, %v4736_v51  ;;  %v3629_v16 = vpop.eup %3628 }
 0x3a3   :  { %v1609_v55 = vpop.f32.mrb[16].mxu0  ;;  %v1650_v25 = vpop.f32.mrb[48].mxu1  ;;  %v4872_v42 = vadd.f32 %v1563_v22, %v1562_v26 }
 0x3a4   :  { %v1657_v54 = vadd.f32 %v1609_v55, %v6308_v32  ;;  %v1659_v37 = vadd.f32 %v1650_v25, %v6309_v39  ;;  %v1611_v36 = vpop.f32.mrb[17].mxu0  ;;  %v1652_v29 = vpop.f32.mrb[49].mxu1  ;;  %v4928_v32 = vld [vmem:[#allocation8 + $0xc8] ss:$16 sps:$4 sm:$0xff]  }
 0x3a5   :  { %v1658_v4 = vadd.f32 %v1611_v36, %v6310_v2  ;;  %v1660_v8 = vadd.f32 %v1652_v29, %v6311_v7  ;;  %v1613_v10 = vpop.f32.mrb[18].mxu0  ;;  %v1654_v11 = vpop.f32.mrb[50].mxu1  ;;  %3630 = vtanh.f32 %v4872_v42  ;;  %v4936_v39 = vld [vmem:[#allocation8 + $0xe8] ss:$16 sps:$4 sm:$0xff]   ;;  %v4942_v36 = vld [vmem:[#allocation10 + $0xc] ss:$16 sps:$4 sm:$0xff]  }
 0x3a6   :  { %v3267_v51 = vmul.f32 -1.442695, %v1657_v54  ;;  %v1614_v12 = vpop.f32.mrb[19].mxu0  ;;  %v1655_v14 = vpop.f32.mrb[51].mxu1  ;;  %v4932_v54 = vld [vmem:[#allocation8 + $0xec] ss:$16 sps:$4 sm:$0xff]  }
 0x3a7   :  { %v3268_v15 = vmul.f32 -1.442695, %v1658_v4  ;;  %v3269_v18 = vmul.f32 -1.442695, %v1660_v8  ;;  %v4945_v29 = vld [vmem:[#allocation10] ss:$16 sps:$4 sm:$0xff]  }
 0x3a8   :  { %3632 = vpow2.f32 %v3267_v51  ;;  %v4948_v2 = vld [vmem:[#allocation10 + $0x8] ss:$16 sps:$4 sm:$0xff]   ;;  %v4951_v4 = vld [vmem:[#allocation10 + $0x24] ss:$16 sps:$4 sm:$0xff]   ;;  %v4954_v7 = vld [vmem:[#allocation10 + $0x2c] ss:$16 sps:$4 sm:$0xff]  }
 0x3a9   :  { %3634 = vpow2.f32 %v3268_v15  ;;  %v4957_v8 = vld [vmem:[#allocation10 + $0x20] ss:$16 sps:$4 sm:$0xff]   ;;  %v4960_v10 = vld [vmem:[#allocation10 + $0x28] ss:$16 sps:$4 sm:$0xff]   ;;  %v4963_v11 = vld [vmem:[#allocation10 + $0x44] ss:$16 sps:$4 sm:$0xff]  }
 0x3aa   :  { %3636 = vpow2.f32 %v3269_v18  ;;  %v4966_v51 = vld [vmem:[#allocation10 + $0x4c] ss:$16 sps:$4 sm:$0xff]   ;;  %v4969_v12 = vld [vmem:[#allocation10 + $0x40] ss:$16 sps:$4 sm:$0xff]   ;;  %v4972_v14 = vld [vmem:[#allocation10 + $0x48] ss:$16 sps:$4 sm:$0xff]  }
 0x3ab   :  { %3638 = vtanh.f32 %v1659_v37  ;;  %v4939_v37 = vld [vmem:[#allocation10 + $0x4] ss:$16 sps:$4 sm:$0xff]   ;;  %v4984_v18 = vld [vmem:[#allocation10 + $0x68] ss:$16 sps:$4 sm:$0xff]  }
 0x3ac   :  { %v4975_v15 = vld [vmem:[#allocation10 + $0x64] ss:$16 sps:$4 sm:$0xff]  }
 0x3af   :  { %v3631_v17 = vpop.eup %3630 }
 0x3b0   :  { %v1566_v19 = vmul.f32 %v3631_v17, %v3629_v16  ;;  %v4978_v16 = vld [vmem:[#allocation10 + $0x6c] ss:$16 sps:$4 sm:$0xff]   ;;  %v4981_v17 = vld [vmem:[#allocation10 + $0x60] ss:$16 sps:$4 sm:$0xff]  }
 0x3b2   :  { %v3633_v20 = vpop.eup %3632  ;;  %v1567_v24 = vpack.c.bf16 %v1566_v19, %v1566_v19  ;;  %v4987_v19 = vld [vmem:[#allocation10 + $0x84] ss:$16 sps:$4 sm:$0xff]  }
 0x3b3   :  { %v3635_v27 = vpop.eup %3634  ;;  %v1664_v31 = vadd.f32 1.0, %v3633_v20  ;;  %v4990_v20 = vld [vmem:[#allocation10 + $0x8c] ss:$16 sps:$4 sm:$0xff]  }
 0x3b4   :  { %v1670_v33 = vadd.f32 1.0, %v3635_v27  ;;  %1569 = vst [vmem:[#allocation5 + $0x4] sm:$0xf] %v1567_v24  ;;  %1718 = vmatprep.mubr.bf16.mxu0 %v1567_v24  ;;  %1759 = vmatprep.mubr.bf16.mxu1 %v1567_v24  ;;  %v3637_v34 = vpop.eup %3636  ;;  %v4993_v24 = vld [vmem:[#allocation10 + $0x80] ss:$16 sps:$4 sm:$0xff]  }
 0x3b5   :  { %3640 = vrcp.f32 %v1664_v31  ;;  %v3639_v41 = vpop.eup %3638  ;;  %v1677_v3 = vadd.f32 1.0, %v3637_v34  ;;  %6312 = vst [vmem:[#allocation59_spill] sm:$0xff] %v4993_v24  ;;  %v4996_v27 = vld [vmem:[#allocation10 + $0x88] ss:$16 sps:$4 sm:$0xff]   ;;  %v4999_v31 = vld [vmem:[#allocation10 + $0xa4] ss:$16 sps:$4 sm:$0xff]  }
 0x3b6   :  { %3642 = vrcp.f32 %v1670_v33  ;;  %6313 = vst [vmem:[#allocation73_spill] sm:$0xff] %v4996_v27  ;;  %6314 = vst [vmem:[#allocation14_spill] sm:$0xff] %v4999_v31  ;;  %v5002_v33 = vld [vmem:[#allocation10 + $0xac] ss:$16 sps:$4 sm:$0xff]   ;;  %v5005_v34 = vld [vmem:[#allocation10 + $0xa0] ss:$16 sps:$4 sm:$0xff]  }
 0x3b7   :  { %3644 = vrcp.f32 %v1677_v3  ;;  %6315 = vst [vmem:[#allocation15_spill] sm:$0xff] %v5002_v33  ;;  %6316 = vst [vmem:[#allocation16_spill] sm:$0xff] %v5005_v34  ;;  %v5020_v3 = vld [vmem:[#allocation10 + $0xc8] ss:$16 sps:$4 sm:$0xff]  }
 0x3b8   :  { %6321 = vst [vmem:[#allocation21_spill] sm:$0xff] %v5020_v3 }
 0x3bf   :  { %v3641_v35 = vpop.eup %3640 }
 0x3c0   :  { %v3643_v0 = vpop.eup %3642  ;;  %v1681_v38 = vmul.f32 %v3641_v35, %v3639_v41  ;;  %v5008_v41 = vld [vmem:[#allocation10 + $0xa8] ss:$16 sps:$4 sm:$0xff]   ;;  %v5011_v35 = vld [vmem:[#allocation10 + $0xc4] ss:$16 sps:$4 sm:$0xff]  }
 0x3c1   :  { %v1680_v43 = vmul.f32 %v3643_v0, %v4744_v30  ;;  %v3645_v21 = vpop.eup %3644  ;;  %v4892_v30 = vld [vmem:[#allocation8 + $0x4c] ss:$16 sps:$4 sm:$0xff]   ;;  %6317 = vst [vmem:[#allocation17_spill] sm:$0xff] %v5008_v41  ;;  %6318 = vst [vmem:[#allocation18_spill] sm:$0xff] %v5011_v35 }
 0x3c2   :  { %v5014_v0 = vld [vmem:[#allocation10 + $0xcc] ss:$16 sps:$4 sm:$0xff]  }
 0x3c3   :  { %v4880_v22 = vadd.f32 %v1681_v38, %v1680_v43  ;;  %6319 = vst [vmem:[#allocation19_spill] sm:$0xff] %v5014_v0  ;;  %v5017_v38 = vld [vmem:[#allocation10 + $0xc0] ss:$16 sps:$4 sm:$0xff]   ;;  %v5023_v43 = vld [vmem:[#allocation10 + $0xe4] ss:$16 sps:$4 sm:$0xff]  }
 0x3c4   :  { %6320 = vst [vmem:[#allocation20_spill] sm:$0xff] %v5017_v38  ;;  %6322 = vst [vmem:[#allocation22_spill] sm:$0xff] %v5023_v43 }
 0x3c5   :  { %3646 = vtanh.f32 %v4880_v22 }
 0x3cf   :  { %v3647_v26 = vpop.eup %3646 }
 0x3d0   :  { %v1684_v55 = vmul.f32 %v3647_v26, %v3645_v21  ;;  %v5026_v21 = vld [vmem:[#allocation10 + $0xec] ss:$16 sps:$4 sm:$0xff]   ;;  %v5029_v26 = vld [vmem:[#allocation10 + $0xe0] ss:$16 sps:$4 sm:$0xff]  }
 0x3d1   :  { %6323 = vst [vmem:[#allocation23_spill] sm:$0xff] %v5026_v21  ;;  %6324 = vst [vmem:[#allocation24_spill] sm:$0xff] %v5029_v26 }
 0x3d2   :  { %v1685_v25 = vpack.c.bf16 %v1684_v55, %v1684_v55  ;;  %v5032_v55 = vld [vmem:[#allocation10 + $0xe8] ss:$16 sps:$4 sm:$0xff]  }
 0x3d3   :  { %6325 = vst [vmem:[#allocation25_spill] sm:$0xff] %v5032_v55 }
 0x3d4   :  { %1719 = vmatmul.mubr.bf16.vlgmr.msra.gmra.mrb[20].mxu0 %v1685_v25  ;;  %1760 = vmatmul.mubr.bf16.vlgmr.msra.gmra.mrb[52].mxu1 %v1685_v25 }
 0x3d5   :  { %1801 = vmatpush1.bf16.msra.mxu0 %v4594_v47  ;;  %1842 = vmatpush1.bf16.msra.mxu1 %v4748_v48  ;;  %v4896_v47 = vld [vmem:[#allocation8 + $0x48] ss:$16 sps:$4 sm:$0xff]  }
 0x3d6   :  { %1802 = vmatprep.subr.bf16.mxu0 %v4598_v44  ;;  %1843 = vmatprep.subr.bf16.mxu1 %v4752_v49  ;;  %v4900_v44 = vld [vmem:[#allocation8 + $0x6c] ss:$16 sps:$4 sm:$0xff]  }
 0x3d7   :  { %1832 = vmatprep.mubr.bf16.mxu0 %v6198_v52  ;;  %1873 = vmatprep.mubr.bf16.mxu1 %v6198_v52 }
 0x3d9   :  { %1803 = vmatpush1.bf16.msra.mxu0 %v4604_v53  ;;  %1844 = vmatpush1.bf16.msra.mxu1 %v4758_v46  ;;  %v4904_v53 = vld [vmem:[#allocation8 + $0x68] ss:$16 sps:$4 sm:$0xff]  }
 0x3da   :  { %1804 = vmatprep.subr.bf16.mxu0 %v4608_v50  ;;  %1845 = vmatprep.subr.bf16.mxu1 %v4892_v30  ;;  %v4908_v50 = vld [vmem:[#allocation8 + $0x8c] ss:$16 sps:$4 sm:$0xff]  }
 0x3dd   :  { %1805 = vmatpush1.bf16.msra.mxu0 %v4612_v56  ;;  %1846 = vmatpush1.bf16.msra.mxu1 %v4896_v47  ;;  %v4912_v56 = vld [vmem:[#allocation8 + $0x88] ss:$16 sps:$4 sm:$0xff]  }
 0x3de   :  { %1806 = vmatprep.subr.bf16.mxu0 %v4616_v57  ;;  %1847 = vmatprep.subr.bf16.mxu1 %v4900_v44  ;;  %v4916_v57 = vld [vmem:[#allocation8 + $0xac] ss:$16 sps:$4 sm:$0xff]  }
 0x3e1   :  { %1807 = vmatpush1.bf16.msra.mxu0 %v4620_v40  ;;  %1848 = vmatpush1.bf16.msra.mxu1 %v4904_v53  ;;  %v4920_v40 = vld [vmem:[#allocation8 + $0xa8] ss:$16 sps:$4 sm:$0xff]  }
 0x3e2   :  { %1808 = vmatprep.subr.bf16.mxu0 %v4624_v58  ;;  %1849 = vmatprep.subr.bf16.mxu1 %v4908_v50  ;;  %v4924_v58 = vld [vmem:[#allocation8 + $0xcc] ss:$16 sps:$4 sm:$0xff]  }
 0x3e5   :  { %1809 = vmatpush1.bf16.msra.mxu0 %v4771_v45  ;;  %1850 = vmatpush1.bf16.msra.mxu1 %v4912_v56 }
 0x3e6   :  { %1810 = vmatprep.subr.bf16.mxu0 %v4775_v59  ;;  %1851 = vmatprep.subr.bf16.mxu1 %v4916_v57 }
 0x3e9   :  { %1811 = vmatpush1.bf16.msra.mxu0 %v4779_v60  ;;  %1852 = vmatpush1.bf16.msra.mxu1 %v4920_v40 }
 0x3ea   :  { %1812 = vmatprep.subr.bf16.mxu0 %v4783_v61  ;;  %1853 = vmatprep.subr.bf16.mxu1 %v4924_v58 }
 0x3ed   :  { %1813 = vmatpush1.bf16.msra.mxu0 %v4787_v62  ;;  %1854 = vmatpush1.bf16.msra.mxu1 %v4928_v32 }
 0x3ee   :  { %1814 = vmatprep.subr.bf16.mxu0 %v4791_v63  ;;  %1855 = vmatprep.subr.bf16.mxu1 %v4932_v54 }
 0x3f1   :  { %1815 = vmatpush1.bf16.msra.mxu0 %v4795_v1  ;;  %1856 = vmatpush1.bf16.msra.mxu1 %v4936_v39 }
 0x3f2   :  { %1911 = vmatprep.subr.bf16.mxu0 %v4939_v37  ;;  %1952 = vmatprep.subr.bf16.mxu1 %v4942_v36 }
 0x3f4   :  { %1833 = vmatmul.mubr.bf16.vlgmr.msra.gmra.mrb[24].mxu0 %v1685_v25  ;;  %1874 = vmatmul.mubr.bf16.vlgmr.msra.gmra.mrb[56].mxu1 %v1685_v25  ;;  %v5035_v25 = vld [vmem:[#allocation10 + $0x104] ss:$16 sps:$4 sm:$0xff]  }
 0x3f5   :  { %1912 = vmatpush1.bf16.msra.mxu0 %v4945_v29  ;;  %1953 = vmatpush1.bf16.msra.mxu1 %v4948_v2  ;;  %6326 = vst [vmem:[#allocation26_spill] sm:$0xff] %v5035_v25 }
 0x3f6   :  { %1913 = vmatprep.subr.bf16.mxu0 %v4951_v4  ;;  %1954 = vmatprep.subr.bf16.mxu1 %v4954_v7 }
 0x3f9   :  { %1914 = vmatpush1.bf16.msra.mxu0 %v4957_v8  ;;  %1955 = vmatpush1.bf16.msra.mxu1 %v4960_v10 }
 0x3fa   :  { %1915 = vmatprep.subr.bf16.mxu0 %v4963_v11  ;;  %1956 = vmatprep.subr.bf16.mxu1 %v4966_v51 }
 0x3fd   :  { %1916 = vmatpush1.bf16.msra.mxu0 %v4969_v12  ;;  %1957 = vmatpush1.bf16.msra.mxu1 %v4972_v14 }
 0x3fe   :  { %1917 = vmatprep.subr.bf16.mxu0 %v4975_v15  ;;  %1958 = vmatprep.subr.bf16.mxu1 %v4978_v16 }
 0x401   :  { %1918 = vmatpush1.bf16.msra.mxu0 %v4981_v17  ;;  %1959 = vmatpush1.bf16.msra.mxu1 %v4984_v18 }
 0x402   :  { %1919 = vmatprep.subr.bf16.mxu0 %v4987_v19  ;;  %1960 = vmatprep.subr.bf16.mxu1 %v4990_v20 }
 0x405   :  { %1920 = vmatpush1.bf16.msra.mxu0 %v4993_v24  ;;  %1961 = vmatpush1.bf16.msra.mxu1 %v4996_v27 }
 0x406   :  { %1921 = vmatprep.subr.bf16.mxu0 %v4999_v31  ;;  %1962 = vmatprep.subr.bf16.mxu1 %v5002_v33 }
 0x409   :  { %1922 = vmatpush1.bf16.msra.mxu0 %v5005_v34  ;;  %1963 = vmatpush1.bf16.msra.mxu1 %v5008_v41 }
 0x40a   :  { %1923 = vmatprep.subr.bf16.mxu0 %v5011_v35  ;;  %1964 = vmatprep.subr.bf16.mxu1 %v5014_v0 }
 0x40d   :  { %1924 = vmatpush1.bf16.msra.mxu0 %v5017_v38  ;;  %1965 = vmatpush1.bf16.msra.mxu1 %v5020_v3  ;;  %v5038_v3 = vld [vmem:[#allocation10 + $0x10c] ss:$16 sps:$4 sm:$0xff]  }
 0x40e   :  { %1925 = vmatprep.subr.bf16.mxu0 %v5023_v43  ;;  %1966 = vmatprep.subr.bf16.mxu1 %v5026_v21  ;;  %6327 = vst [vmem:[#allocation27_spill] sm:$0xff] %v5038_v3  ;;  %v5041_v43 = vld [vmem:[#allocation10 + $0x100] ss:$16 sps:$4 sm:$0xff]   ;;  %v5044_v21 = vld [vmem:[#allocation10 + $0x108] ss:$16 sps:$4 sm:$0xff]  }
 0x40f   :  { %6328 = vst [vmem:[#allocation28_spill] sm:$0xff] %v5041_v43  ;;  %6329 = vst [vmem:[#allocation29_spill] sm:$0xff] %v5044_v21 }
 0x411   :  { %1926 = vmatpush1.bf16.msra.mxu0 %v5029_v26  ;;  %1967 = vmatpush1.bf16.msra.mxu1 %v5032_v55  ;;  %v5047_v26 = vld [vmem:[#allocation10 + $0x124] ss:$16 sps:$4 sm:$0xff]   ;;  %v5050_v55 = vld [vmem:[#allocation10 + $0x12c] ss:$16 sps:$4 sm:$0xff]  }
 0x412   :  { %1927 = vmatprep.subr.bf16.mxu0 %v5035_v25  ;;  %1968 = vmatprep.subr.bf16.mxu1 %v5038_v3  ;;  %6330 = vst [vmem:[#allocation30_spill] sm:$0xff] %v5047_v26  ;;  %6331 = vst [vmem:[#allocation31_spill] sm:$0xff] %v5050_v55  ;;  %v5053_v25 = vld [vmem:[#allocation10 + $0x120] ss:$16 sps:$4 sm:$0xff]   ;;  %v5056_v3 = vld [vmem:[#allocation10 + $0x128] ss:$16 sps:$4 sm:$0xff]  }
 0x413   :  { %6332 = vst [vmem:[#allocation32_spill] sm:$0xff] %v5053_v25  ;;  %6333 = vst [vmem:[#allocation33_spill] sm:$0xff] %v5056_v3 }
 0x415   :  { %1928 = vmatpush1.bf16.msra.mxu0 %v5041_v43  ;;  %1969 = vmatpush1.bf16.msra.mxu1 %v5044_v21  ;;  %v5059_v43 = vld [vmem:[#allocation10 + $0x144] ss:$16 sps:$4 sm:$0xff]   ;;  %v5062_v21 = vld [vmem:[#allocation10 + $0x14c] ss:$16 sps:$4 sm:$0xff]  }
 0x416   :  { %1929 = vmatprep.subr.bf16.mxu0 %v5047_v26  ;;  %1970 = vmatprep.subr.bf16.mxu1 %v5050_v55  ;;  %6334 = vst [vmem:[#allocation34_spill] sm:$0xff] %v5059_v43  ;;  %6335 = vst [vmem:[#allocation35_spill] sm:$0xff] %v5062_v21  ;;  %v5065_v26 = vld [vmem:[#allocation10 + $0x140] ss:$16 sps:$4 sm:$0xff]   ;;  %v5068_v55 = vld [vmem:[#allocation10 + $0x148] ss:$16 sps:$4 sm:$0xff]  }
 0x417   :  { %6336 = vst [vmem:[#allocation36_spill] sm:$0xff] %v5065_v26  ;;  %6337 = vst [vmem:[#allocation37_spill] sm:$0xff] %v5068_v55 }
 0x419   :  { %1930 = vmatpush1.bf16.msra.mxu0 %v5053_v25  ;;  %1971 = vmatpush1.bf16.msra.mxu1 %v5056_v3  ;;  %v5071_v25 = vld [vmem:[#allocation10 + $0x164] ss:$16 sps:$4 sm:$0xff]   ;;  %v5074_v3 = vld [vmem:[#allocation10 + $0x16c] ss:$16 sps:$4 sm:$0xff]  }
 0x41a   :  { %1931 = vmatprep.subr.bf16.mxu0 %v5059_v43  ;;  %1972 = vmatprep.subr.bf16.mxu1 %v5062_v21  ;;  %6338 = vst [vmem:[#allocation38_spill] sm:$0xff] %v5071_v25  ;;  %6339 = vst [vmem:[#allocation39_spill] sm:$0xff] %v5074_v3  ;;  %v5077_v43 = vld [vmem:[#allocation10 + $0x160] ss:$16 sps:$4 sm:$0xff]   ;;  %v5080_v21 = vld [vmem:[#allocation10 + $0x168] ss:$16 sps:$4 sm:$0xff]  }
 0x41b   :  { %6340 = vst [vmem:[#allocation40_spill] sm:$0xff] %v5077_v43  ;;  %6341 = vst [vmem:[#allocation41_spill] sm:$0xff] %v5080_v21 }
 0x41d   :  { %1932 = vmatpush1.bf16.msra.mxu0 %v5065_v26  ;;  %1973 = vmatpush1.bf16.msra.mxu1 %v5068_v55  ;;  %v5083_v26 = vld [vmem:[#allocation10 + $0x184] ss:$16 sps:$4 sm:$0xff]   ;;  %v5086_v55 = vld [vmem:[#allocation10 + $0x18c] ss:$16 sps:$4 sm:$0xff]  }
 0x41e   :  { %1933 = vmatprep.subr.bf16.mxu0 %v5071_v25  ;;  %1974 = vmatprep.subr.bf16.mxu1 %v5074_v3  ;;  %6342 = vst [vmem:[#allocation42_spill] sm:$0xff] %v5083_v26  ;;  %6343 = vst [vmem:[#allocation43_spill] sm:$0xff] %v5086_v55  ;;  %v5089_v25 = vld [vmem:[#allocation10 + $0x180] ss:$16 sps:$4 sm:$0xff]   ;;  %v5092_v3 = vld [vmem:[#allocation10 + $0x188] ss:$16 sps:$4 sm:$0xff]  }
 0x41f   :  { %6344 = vst [vmem:[#allocation44_spill] sm:$0xff] %v5089_v25  ;;  %6345 = vst [vmem:[#allocation45_spill] sm:$0xff] %v5092_v3 }
 0x421   :  { %1934 = vmatpush1.bf16.msra.mxu0 %v5077_v43  ;;  %1975 = vmatpush1.bf16.msra.mxu1 %v5080_v21  ;;  %v5095_v43 = vld [vmem:[#allocation10 + $0x1a4] ss:$16 sps:$4 sm:$0xff]   ;;  %v5098_v21 = vld [vmem:[#allocation10 + $0x1ac] ss:$16 sps:$4 sm:$0xff]  }
 0x422   :  { %1935 = vmatprep.subr.bf16.mxu0 %v5083_v26  ;;  %1976 = vmatprep.subr.bf16.mxu1 %v5086_v55  ;;  %6346 = vst [vmem:[#allocation46_spill] sm:$0xff] %v5095_v43  ;;  %6347 = vst [vmem:[#allocation47_spill] sm:$0xff] %v5098_v21  ;;  %v5101_v26 = vld [vmem:[#allocation10 + $0x1a0] ss:$16 sps:$4 sm:$0xff]   ;;  %v5104_v55 = vld [vmem:[#allocation10 + $0x1a8] ss:$16 sps:$4 sm:$0xff]  }
 0x423   :  { %6348 = vst [vmem:[#allocation48_spill] sm:$0xff] %v5101_v26  ;;  %6349 = vst [vmem:[#allocation49_spill] sm:$0xff] %v5104_v55 }
 0x425   :  { %1936 = vmatpush1.bf16.msra.mxu0 %v5089_v25  ;;  %1977 = vmatpush1.bf16.msra.mxu1 %v5092_v3  ;;  %v5107_v25 = vld [vmem:[#allocation10 + $0x1c4] ss:$16 sps:$4 sm:$0xff]   ;;  %v5110_v3 = vld [vmem:[#allocation10 + $0x1cc] ss:$16 sps:$4 sm:$0xff]  }
 0x426   :  { %1937 = vmatprep.subr.bf16.mxu0 %v5095_v43  ;;  %1978 = vmatprep.subr.bf16.mxu1 %v5098_v21  ;;  %6350 = vst [vmem:[#allocation50_spill] sm:$0xff] %v5107_v25  ;;  %6351 = vst [vmem:[#allocation51_spill] sm:$0xff] %v5110_v3  ;;  %v5113_v43 = vld [vmem:[#allocation10 + $0x1c0] ss:$16 sps:$4 sm:$0xff]   ;;  %v5116_v21 = vld [vmem:[#allocation10 + $0x1c8] ss:$16 sps:$4 sm:$0xff]  }
 0x427   :  { %6352 = vst [vmem:[#allocation52_spill] sm:$0xff] %v5113_v43  ;;  %6353 = vst [vmem:[#allocation53_spill] sm:$0xff] %v5116_v21 }
 0x429   :  { %1938 = vmatpush1.bf16.msra.mxu0 %v5101_v26  ;;  %1979 = vmatpush1.bf16.msra.mxu1 %v5104_v55  ;;  %v5119_v26 = vld [vmem:[#allocation10 + $0x1e4] ss:$16 sps:$4 sm:$0xff]   ;;  %v5122_v55 = vld [vmem:[#allocation10 + $0x1ec] ss:$16 sps:$4 sm:$0xff]  }
 0x42a   :  { %1939 = vmatprep.subr.bf16.mxu0 %v5107_v25  ;;  %1980 = vmatprep.subr.bf16.mxu1 %v5110_v3  ;;  %6354 = vst [vmem:[#allocation54_spill] sm:$0xff] %v5119_v26  ;;  %6355 = vst [vmem:[#allocation55_spill] sm:$0xff] %v5122_v55  ;;  %v5125_v25 = vld [vmem:[#allocation10 + $0x1e0] ss:$16 sps:$4 sm:$0xff]   ;;  %v5128_v3 = vld [vmem:[#allocation10 + $0x1e8] ss:$16 sps:$4 sm:$0xff]  }
 0x42b   :  { %6356 = vst [vmem:[#allocation56_spill] sm:$0xff] %v5125_v25  ;;  %6357 = vst [vmem:[#allocation57_spill] sm:$0xff] %v5128_v3 }
 0x42d   :  { %1940 = vmatpush1.bf16.msra.mxu0 %v5113_v43  ;;  %1981 = vmatpush1.bf16.msra.mxu1 %v5116_v21 }
 0x42e   :  { %1941 = vmatprep.subr.bf16.mxu0 %v5119_v26  ;;  %1982 = vmatprep.subr.bf16.mxu1 %v5122_v55 }
 0x431   :  { %1942 = vmatpush1.bf16.msra.mxu0 %v5125_v25  ;;  %1983 = vmatpush1.bf16.msra.mxu1 %v5128_v3 }
 0x432   :  { %2025 = vmatprep.subr.bf16.mxu0 %v6302_v5  ;;  %2066 = vmatprep.subr.bf16.mxu1 %v4864_v6 }
 0x4a7   :  { %v1720_v21 = vpop.f32.mrb[20].mxu0  ;;  %v1761_v43 = vpop.f32.mrb[52].mxu1 }
 0x4a8   :  { %v1721_v26 = vadd.f32 %v1720_v21, %v6304_v9  ;;  %v1722_v38 = vpop.f32.mrb[21].mxu0  ;;  %v1763_v0 = vpop.f32.mrb[53].mxu1  ;;  %v1762_v6 = vadd.f32 %v1761_v43, %v6307_v28  ;;  %v6358_v43 = vld [vmem:[#allocation62_spill] sm:$0xff]  ;;  %v6361_v28 = vld [vmem:[#allocation77_spill] sm:$0xff] }
 0x4a9   :  { %v1723_v55 = vadd.f32 %v1722_v38, %v6305_v13  ;;  %v1724_v35 = vpop.f32.mrb[22].mxu0  ;;  %v1765_v41 = vpop.f32.mrb[54].mxu1  ;;  %v1764_v5 = vadd.f32 %v1763_v0, %v6306_v23 }
 0x4aa   :  { %v3270_v34 = vmul.f32 -1.442695, %v1721_v26  ;;  %v1725_v25 = vpop.f32.mrb[23].mxu0  ;;  %v1766_v33 = vpop.f32.mrb[55].mxu1 }
 0x4ab   :  { %v3271_v31 = vmul.f32 -1.442695, %v1723_v55  ;;  %v3272_v3 = vmul.f32 -1.442695, %v1764_v5 }
 0x4ac   :  { %3648 = vpow2.f32 %v3270_v34 }
 0x4ad   :  { %3650 = vpow2.f32 %v3271_v31 }
 0x4ae   :  { %3652 = vpow2.f32 %v3272_v3  ;;  %v6359_v3 = vld [vmem:[#allocation76_spill] sm:$0xff] }
 0x4af   :  { %3654 = vtanh.f32 %v1762_v6 }
 0x4b6   :  { %v3649_v27 = vpop.eup %3648 }
 0x4b7   :  { %v3651_v24 = vpop.eup %3650  ;;  %v1771_v21 = vadd.f32 1.0, %v3649_v27 }
 0x4b8   :  { %v1777_v9 = vadd.f32 1.0, %v3651_v24  ;;  %v3653_v41 = vpop.eup %3652 }
 0x4b9   :  { %3656 = vrcp.f32 %v1771_v21  ;;  %v3655_v35 = vpop.eup %3654  ;;  %v1784_v34 = vadd.f32 1.0, %v3653_v41 }
 0x4ba   :  { %3658 = vrcp.f32 %v1777_v9  ;;  %v6360_v9 = vld [vmem:[#allocation63_spill] sm:$0xff] }
 0x4bb   :  { %3660 = vrcp.f32 %v1784_v34 }
 0x4c3   :  { %v3657_v38 = vpop.eup %3656 }
 0x4c4   :  { %v3659_v33 = vpop.eup %3658  ;;  %v1788_v26 = vmul.f32 %v3657_v38, %v3655_v35 }
 0x4c5   :  { %v1787_v31 = vmul.f32 %v3659_v33, %v4872_v42 }
 0x4c7   :  { %v1834_v0 = vpop.f32.mrb[24].mxu0  ;;  %v1875_v55 = vpop.f32.mrb[56].mxu1  ;;  %v5138_v25 = vadd.f32 %v1788_v26, %v1787_v31 }
 0x4c8   :  { %v1882_v27 = vadd.f32 %v1834_v0, %v6358_v43  ;;  %v1884_v6 = vadd.f32 %v1875_v55, %v6359_v3  ;;  %v1836_v24 = vpop.f32.mrb[25].mxu0  ;;  %v1877_v5 = vpop.f32.mrb[57].mxu1 }
 0x4c9   :  { %v1883_v21 = vadd.f32 %v1836_v24, %v6360_v9  ;;  %v1885_v23 = vadd.f32 %v1877_v5, %v6361_v28  ;;  %v1838_v13 = vpop.f32.mrb[26].mxu0  ;;  %v1879_v35 = vpop.f32.mrb[58].mxu1  ;;  %3662 = vtanh.f32 %v5138_v25 }
 0x4ca   :  { %v3273_v42 = vmul.f32 -1.442695, %v1882_v27  ;;  %v1839_v41 = vpop.f32.mrb[27].mxu0  ;;  %v1880_v38 = vpop.f32.mrb[59].mxu1 }
 0x4cb   :  { %v3274_v33 = vmul.f32 -1.442695, %v1883_v21  ;;  %v3661_v26 = vpop.eup %3660  ;;  %v3275_v31 = vmul.f32 -1.442695, %v1885_v23 }
 0x4cc   :  { %3664 = vpow2.f32 %v3273_v42 }
 0x4cd   :  { %3666 = vpow2.f32 %v3274_v33 }
 0x4ce   :  { %3668 = vpow2.f32 %v3275_v31  ;;  %v5163_v31 = vld [vmem:[#allocation8 + $0x44] ss:$16 sps:$4 sm:$0xff]  }
 0x4cf   :  { %3670 = vtanh.f32 %v1884_v6 }
 0x4d3   :  { %v3663_v34 = vpop.eup %3662 }
 0x4d4   :  { %v1791_v0 = vmul.f32 %v3663_v34, %v3661_v26  ;;  %v5149_v26 = vld [vmem:[#allocation8] ss:$16 sps:$4 sm:$0xff]   ;;  %v5153_v34 = vld [vmem:[#allocation8 + $0x24] ss:$16 sps:$4 sm:$0xff]  }
 0x4d6   :  { %v3665_v55 = vpop.eup %3664  ;;  %v1792_v43 = vpack.c.bf16 %v1791_v0, %v1791_v0  ;;  %v5175_v0 = vld [vmem:[#allocation8 + $0x60] ss:$16 sps:$4 sm:$0xff]  }
 0x4d7   :  { %v3667_v3 = vpop.eup %3666  ;;  %v1889_v24 = vadd.f32 1.0, %v3665_v55  ;;  %v6369_v55 = vld [vmem:[#allocation19_spill] sm:$0xff] }
 0x4d8   :  { %v1895_v13 = vadd.f32 1.0, %v3667_v3  ;;  %1794 = vst [vmem:[#allocation5 + $0x8] sm:$0xf] %v1792_v43  ;;  %1943 = vmatprep.mubr.bf16.mxu0 %v1792_v43  ;;  %1984 = vmatprep.mubr.bf16.mxu1 %v1792_v43  ;;  %v3669_v28 = vpop.eup %3668  ;;  %v6370_v43 = vld [vmem:[#allocation20_spill] sm:$0xff]  ;;  %v6371_v3 = vld [vmem:[#allocation21_spill] sm:$0xff] }
 0x4d9   :  { %3672 = vrcp.f32 %v1889_v24  ;;  %v3671_v27 = vpop.eup %3670  ;;  %v1902_v35 = vadd.f32 1.0, %v3669_v28  ;;  %v6372_v24 = vld [vmem:[#allocation22_spill] sm:$0xff]  ;;  %v6374_v28 = vld [vmem:[#allocation24_spill] sm:$0xff] }
 0x4da   :  { %3674 = vrcp.f32 %v1895_v13  ;;  %v6373_v13 = vld [vmem:[#allocation23_spill] sm:$0xff] }
 0x4db   :  { %3676 = vrcp.f32 %v1902_v35  ;;  %v6379_v35 = vld [vmem:[#allocation29_spill] sm:$0xff] }
 0x4e3   :  { %v3673_v5 = vpop.eup %3672 }
 0x4e4   :  { %v3675_v9 = vpop.eup %3674  ;;  %v1906_v21 = vmul.f32 %v3673_v5, %v3671_v27  ;;  %v6375_v27 = vld [vmem:[#allocation25_spill] sm:$0xff]  ;;  %v6376_v5 = vld [vmem:[#allocation26_spill] sm:$0xff] }
 0x4e5   :  { %v1905_v23 = vmul.f32 %v3675_v9, %v4880_v22  ;;  %v3677_v6 = vpop.eup %3676  ;;  %v5159_v22 = vld [vmem:[#allocation8 + $0x20] ss:$16 sps:$4 sm:$0xff]  }
 0x4e6   :  { %v6377_v9 = vld [vmem:[#allocation27_spill] sm:$0xff] }
 0x4e7   :  { %v5146_v42 = vadd.f32 %v1906_v21, %v1905_v23  ;;  %v6378_v21 = vld [vmem:[#allocation28_spill] sm:$0xff]  ;;  %v6380_v23 = vld [vmem:[#allocation30_spill] sm:$0xff] }
 0x4e9   :  { %3678 = vtanh.f32 %v5146_v42 }
 0x4f3   :  { %v3679_v41 = vpop.eup %3678 }
 0x4f4   :  { %v1909_v38 = vmul.f32 %v3679_v41, %v3677_v6  ;;  %v6381_v6 = vld [vmem:[#allocation31_spill] sm:$0xff]  ;;  %v6382_v41 = vld [vmem:[#allocation32_spill] sm:$0xff] }
 0x4f6   :  { %v1910_v33 = vpack.c.bf16 %v1909_v38, %v1909_v38  ;;  %v6383_v38 = vld [vmem:[#allocation33_spill] sm:$0xff] }
 0x4f8   :  { %1944 = vmatmul.mubr.bf16.vlgmr.msra.gmra.mrb[28].mxu0 %v1910_v33  ;;  %1985 = vmatmul.mubr.bf16.vlgmr.msra.gmra.mrb[60].mxu1 %v1910_v33 }
 0x4f9   :  { %2026 = vmatpush1.bf16.msra.mxu0 %v5149_v26  ;;  %2067 = vmatpush1.bf16.msra.mxu1 %v4748_v48  ;;  %v5167_v48 = vld [vmem:[#allocation8 + $0x40] ss:$16 sps:$4 sm:$0xff]  }
 0x4fa   :  { %2027 = vmatprep.subr.bf16.mxu0 %v5153_v34  ;;  %2068 = vmatprep.subr.bf16.mxu1 %v4752_v49  ;;  %v5171_v49 = vld [vmem:[#allocation8 + $0x64] ss:$16 sps:$4 sm:$0xff]  }
 0x4fb   :  { %2057 = vmatprep.mubr.bf16.mxu0 %v6198_v52  ;;  %2098 = vmatprep.mubr.bf16.mxu1 %v6198_v52 }
 0x4fd   :  { %2028 = vmatpush1.bf16.msra.mxu0 %v5159_v22  ;;  %2069 = vmatpush1.bf16.msra.mxu1 %v4758_v46  ;;  %v5179_v46 = vld [vmem:[#allocation8 + $0x84] ss:$16 sps:$4 sm:$0xff]  }
 0x4fe   :  { %2029 = vmatprep.subr.bf16.mxu0 %v5163_v31  ;;  %2070 = vmatprep.subr.bf16.mxu1 %v4892_v30 }
 0x501   :  { %2030 = vmatpush1.bf16.msra.mxu0 %v5167_v48  ;;  %2071 = vmatpush1.bf16.msra.mxu1 %v4896_v47 }
 0x502   :  { %2031 = vmatprep.subr.bf16.mxu0 %v5171_v49  ;;  %2072 = vmatprep.subr.bf16.mxu1 %v4900_v44 }
 0x505   :  { %2032 = vmatpush1.bf16.msra.mxu0 %v5175_v0  ;;  %2073 = vmatpush1.bf16.msra.mxu1 %v4904_v53 }
 0x506   :  { %2033 = vmatprep.subr.bf16.mxu0 %v5179_v46  ;;  %2074 = vmatprep.subr.bf16.mxu1 %v4908_v50 }
 0x509   :  { %2034 = vmatpush1.bf16.msra.mxu0 %v4771_v45  ;;  %2075 = vmatpush1.bf16.msra.mxu1 %v4912_v56  ;;  %v6362_v45 = vld [vmem:[#allocation59_spill] sm:$0xff] }
 0x50a   :  { %2035 = vmatprep.subr.bf16.mxu0 %v4775_v59  ;;  %2076 = vmatprep.subr.bf16.mxu1 %v4916_v57  ;;  %v6363_v59 = vld [vmem:[#allocation73_spill] sm:$0xff] }
 0x50d   :  { %2036 = vmatpush1.bf16.msra.mxu0 %v4779_v60  ;;  %2077 = vmatpush1.bf16.msra.mxu1 %v4920_v40  ;;  %v6364_v60 = vld [vmem:[#allocation14_spill] sm:$0xff] }
 0x50e   :  { %2037 = vmatprep.subr.bf16.mxu0 %v4783_v61  ;;  %2078 = vmatprep.subr.bf16.mxu1 %v4924_v58  ;;  %v6365_v61 = vld [vmem:[#allocation15_spill] sm:$0xff] }
 0x511   :  { %2038 = vmatpush1.bf16.msra.mxu0 %v4787_v62  ;;  %2079 = vmatpush1.bf16.msra.mxu1 %v4928_v32  ;;  %v6366_v62 = vld [vmem:[#allocation16_spill] sm:$0xff] }
 0x512   :  { %2039 = vmatprep.subr.bf16.mxu0 %v4791_v63  ;;  %2080 = vmatprep.subr.bf16.mxu1 %v4932_v54  ;;  %v6367_v63 = vld [vmem:[#allocation17_spill] sm:$0xff] }
 0x515   :  { %2040 = vmatpush1.bf16.msra.mxu0 %v4795_v1  ;;  %2081 = vmatpush1.bf16.msra.mxu1 %v4936_v39  ;;  %v6368_v1 = vld [vmem:[#allocation18_spill] sm:$0xff] }
 0x516   :  { %2136 = vmatprep.subr.bf16.mxu0 %v4939_v37  ;;  %2177 = vmatprep.subr.bf16.mxu1 %v4942_v36 }
 0x518   :  { %2058 = vmatmul.mubr.bf16.vlgmr.msra.gmra.mrb[32].mxu0 %v1910_v33  ;;  %2099 = vmatmul.mubr.bf16.vlgmr.msra.gmra.mrb[64].mxu1 %v1910_v33  ;;  %v6384_v33 = vld [vmem:[#allocation34_spill] sm:$0xff] }
 0x519   :  { %2137 = vmatpush1.bf16.msra.mxu0 %v4945_v29  ;;  %2178 = vmatpush1.bf16.msra.mxu1 %v4948_v2 }
 0x51a   :  { %2138 = vmatprep.subr.bf16.mxu0 %v4951_v4  ;;  %2179 = vmatprep.subr.bf16.mxu1 %v4954_v7 }
 0x51d   :  { %2139 = vmatpush1.bf16.msra.mxu0 %v4957_v8  ;;  %2180 = vmatpush1.bf16.msra.mxu1 %v4960_v10 }
 0x51e   :  { %2140 = vmatprep.subr.bf16.mxu0 %v4963_v11  ;;  %2181 = vmatprep.subr.bf16.mxu1 %v4966_v51 }
 0x521   :  { %2141 = vmatpush1.bf16.msra.mxu0 %v4969_v12  ;;  %2182 = vmatpush1.bf16.msra.mxu1 %v4972_v14 }
 0x522   :  { %2142 = vmatprep.subr.bf16.mxu0 %v4975_v15  ;;  %2183 = vmatprep.subr.bf16.mxu1 %v4978_v16 }
 0x525   :  { %2143 = vmatpush1.bf16.msra.mxu0 %v4981_v17  ;;  %2184 = vmatpush1.bf16.msra.mxu1 %v4984_v18 }
 0x526   :  { %2144 = vmatprep.subr.bf16.mxu0 %v4987_v19  ;;  %2185 = vmatprep.subr.bf16.mxu1 %v4990_v20 }
 0x529   :  { %2145 = vmatpush1.bf16.msra.mxu0 %v6362_v45  ;;  %2186 = vmatpush1.bf16.msra.mxu1 %v6363_v59 }
 0x52a   :  { %2146 = vmatprep.subr.bf16.mxu0 %v6364_v60  ;;  %2187 = vmatprep.subr.bf16.mxu1 %v6365_v61 }
 0x52d   :  { %2147 = vmatpush1.bf16.msra.mxu0 %v6366_v62  ;;  %2188 = vmatpush1.bf16.msra.mxu1 %v6367_v63 }
 0x52e   :  { %2148 = vmatprep.subr.bf16.mxu0 %v6368_v1  ;;  %2189 = vmatprep.subr.bf16.mxu1 %v6369_v55  ;;  %v6412_v1 = vld [vmem:[#allocation88_spill] sm:$0xff] }
 0x531   :  { %2149 = vmatpush1.bf16.msra.mxu0 %v6370_v43  ;;  %2190 = vmatpush1.bf16.msra.mxu1 %v6371_v3 }
 0x532   :  { %2150 = vmatprep.subr.bf16.mxu0 %v6372_v24  ;;  %2191 = vmatprep.subr.bf16.mxu1 %v6373_v13  ;;  %v6411_v24 = vld [vmem:[#allocation87_spill] sm:$0xff] }
 0x535   :  { %2151 = vmatpush1.bf16.msra.mxu0 %v6374_v28  ;;  %2192 = vmatpush1.bf16.msra.mxu1 %v6375_v27  ;;  %v6385_v28 = vld [vmem:[#allocation35_spill] sm:$0xff]  ;;  %v6386_v27 = vld [vmem:[#allocation36_spill] sm:$0xff] }
 0x536   :  { %2152 = vmatprep.subr.bf16.mxu0 %v6376_v5  ;;  %2193 = vmatprep.subr.bf16.mxu1 %v6377_v9  ;;  %v6387_v5 = vld [vmem:[#allocation37_spill] sm:$0xff]  ;;  %v6388_v9 = vld [vmem:[#allocation38_spill] sm:$0xff] }
 0x539   :  { %2153 = vmatpush1.bf16.msra.mxu0 %v6378_v21  ;;  %2194 = vmatpush1.bf16.msra.mxu1 %v6379_v35  ;;  %v6389_v21 = vld [vmem:[#allocation39_spill] sm:$0xff]  ;;  %v6390_v35 = vld [vmem:[#allocation40_spill] sm:$0xff] }
 0x53a   :  { %2154 = vmatprep.subr.bf16.mxu0 %v6380_v23  ;;  %2195 = vmatprep.subr.bf16.mxu1 %v6381_v6  ;;  %v6391_v23 = vld [vmem:[#allocation41_spill] sm:$0xff]  ;;  %v6392_v6 = vld [vmem:[#allocation42_spill] sm:$0xff] }
 0x53d   :  { %2155 = vmatpush1.bf16.msra.mxu0 %v6382_v41  ;;  %2196 = vmatpush1.bf16.msra.mxu1 %v6383_v38  ;;  %v6393_v41 = vld [vmem:[#allocation43_spill] sm:$0xff]  ;;  %v6394_v38 = vld [vmem:[#allocation44_spill] sm:$0xff] }
 0x53e   :  { %2156 = vmatprep.subr.bf16.mxu0 %v6384_v33  ;;  %2197 = vmatprep.subr.bf16.mxu1 %v6385_v28  ;;  %v6395_v33 = vld [vmem:[#allocation45_spill] sm:$0xff]  ;;  %v6396_v28 = vld [vmem:[#allocation46_spill] sm:$0xff] }
 0x541   :  { %2157 = vmatpush1.bf16.msra.mxu0 %v6386_v27  ;;  %2198 = vmatpush1.bf16.msra.mxu1 %v6387_v5  ;;  %v6397_v27 = vld [vmem:[#allocation47_spill] sm:$0xff]  ;;  %v6398_v5 = vld [vmem:[#allocation48_spill] sm:$0xff] }
 0x542   :  { %2158 = vmatprep.subr.bf16.mxu0 %v6388_v9  ;;  %2199 = vmatprep.subr.bf16.mxu1 %v6389_v21  ;;  %v6399_v9 = vld [vmem:[#allocation49_spill] sm:$0xff]  ;;  %v6400_v21 = vld [vmem:[#allocation50_spill] sm:$0xff] }
 0x545   :  { %2159 = vmatpush1.bf16.msra.mxu0 %v6390_v35  ;;  %2200 = vmatpush1.bf16.msra.mxu1 %v6391_v23  ;;  %v6401_v35 = vld [vmem:[#allocation51_spill] sm:$0xff]  ;;  %v6402_v23 = vld [vmem:[#allocation52_spill] sm:$0xff] }
 0x546   :  { %2160 = vmatprep.subr.bf16.mxu0 %v6392_v6  ;;  %2201 = vmatprep.subr.bf16.mxu1 %v6393_v41  ;;  %v6403_v6 = vld [vmem:[#allocation53_spill] sm:$0xff]  ;;  %v6404_v41 = vld [vmem:[#allocation54_spill] sm:$0xff] }
 0x549   :  { %2161 = vmatpush1.bf16.msra.mxu0 %v6394_v38  ;;  %2202 = vmatpush1.bf16.msra.mxu1 %v6395_v33  ;;  %v6405_v38 = vld [vmem:[#allocation55_spill] sm:$0xff]  ;;  %v6406_v33 = vld [vmem:[#allocation56_spill] sm:$0xff] }
 0x54a   :  { %2162 = vmatprep.subr.bf16.mxu0 %v6396_v28  ;;  %2203 = vmatprep.subr.bf16.mxu1 %v6397_v27  ;;  %v6407_v28 = vld [vmem:[#allocation57_spill] sm:$0xff] }
 0x54b   :  { %v5261_v27 = vld [vmem:[#allocation8 + $0x4] ss:$16 sps:$4 sm:$0xff]  }
 0x54c   :  { %6408 = vst [vmem:[#allocation58_spill] sm:$0xff] %v5261_v27 }
 0x54d   :  { %2163 = vmatpush1.bf16.msra.mxu0 %v6398_v5  ;;  %2204 = vmatpush1.bf16.msra.mxu1 %v6399_v9  ;;  %v6409_v9 = vld [vmem:[#allocation72_spill] sm:$0xff]  ;;  %v6410_v5 = vld [vmem:[#allocation13_spill] sm:$0xff] }
 0x54e   :  { %2164 = vmatprep.subr.bf16.mxu0 %v6400_v21  ;;  %2205 = vmatprep.subr.bf16.mxu1 %v6401_v35 }
 0x551   :  { %2165 = vmatpush1.bf16.msra.mxu0 %v6402_v23  ;;  %2206 = vmatpush1.bf16.msra.mxu1 %v6403_v6 }
 0x552   :  { %2166 = vmatprep.subr.bf16.mxu0 %v6404_v41  ;;  %2207 = vmatprep.subr.bf16.mxu1 %v6405_v38 }
 0x555   :  { %2167 = vmatpush1.bf16.msra.mxu0 %v6406_v33  ;;  %2208 = vmatpush1.bf16.msra.mxu1 %v6407_v28 }
 0x556   :  { %2250 = vmatprep.subr.bf16.mxu0 %v5261_v27  ;;  %2291 = vmatprep.subr.bf16.mxu1 %v6409_v9  ;;  %v6413_v9 = vld [vmem:[#allocation89_spill] sm:$0xff] }
 0x5cb   :  { %v1945_v21 = vpop.f32.mrb[28].mxu0  ;;  %v1986_v35 = vpop.f32.mrb[60].mxu1 }
 0x5cc   :  { %v1946_v23 = vadd.f32 %v1945_v21, %v6410_v5  ;;  %v1947_v13 = vpop.f32.mrb[29].mxu0  ;;  %v1988_v6 = vpop.f32.mrb[61].mxu1  ;;  %v1987_v62 = vadd.f32 %v1986_v35, %v6413_v9  ;;  %v6414_v35 = vld [vmem:[#allocation64_spill] sm:$0xff]  ;;  %v6417_v9 = vld [vmem:[#allocation79_spill] sm:$0xff] }
 0x5cd   :  { %v1948_v41 = vadd.f32 %v1947_v13, %v6411_v24  ;;  %v1949_v3 = vpop.f32.mrb[30].mxu0  ;;  %v1990_v38 = vpop.f32.mrb[62].mxu1  ;;  %v1989_v27 = vadd.f32 %v1988_v6, %v6412_v1 }
 0x5ce   :  { %v3276_v43 = vmul.f32 -1.442695, %v1946_v23  ;;  %v1950_v33 = vpop.f32.mrb[31].mxu0  ;;  %v1991_v55 = vpop.f32.mrb[63].mxu1 }
 0x5cf   :  { %v3277_v28 = vmul.f32 -1.442695, %v1948_v41  ;;  %v3278_v63 = vmul.f32 -1.442695, %v1989_v27 }
 0x5d0   :  { %3680 = vpow2.f32 %v3276_v43 }
 0x5d1   :  { %3682 = vpow2.f32 %v3277_v28 }
 0x5d2   :  { %3684 = vpow2.f32 %v3278_v63  ;;  %v6415_v63 = vld [vmem:[#allocation78_spill] sm:$0xff] }
 0x5d3   :  { %3686 = vtanh.f32 %v1987_v62 }
 0x5da   :  { %v3681_v61 = vpop.eup %3680 }
 0x5db   :  { %v3683_v60 = vpop.eup %3682  ;;  %v1996_v21 = vadd.f32 1.0, %v3681_v61 }
 0x5dc   :  { %v2002_v5 = vadd.f32 1.0, %v3683_v60  ;;  %v3685_v3 = vpop.eup %3684 }
 0x5dd   :  { %3688 = vrcp.f32 %v1996_v21  ;;  %v3687_v13 = vpop.eup %3686  ;;  %v2009_v43 = vadd.f32 1.0, %v3685_v3 }
 0x5de   :  { %3690 = vrcp.f32 %v2002_v5  ;;  %v6416_v5 = vld [vmem:[#allocation65_spill] sm:$0xff] }
 0x5df   :  { %3692 = vrcp.f32 %v2009_v43 }
 0x5e7   :  { %v3689_v23 = vpop.eup %3688 }
 0x5e8   :  { %v3691_v55 = vpop.eup %3690  ;;  %v2013_v41 = vmul.f32 %v3689_v23, %v3687_v13 }
 0x5e9   :  { %v2012_v28 = vmul.f32 %v3691_v55, %v5138_v25 }
 0x5eb   :  { %v2059_v6 = vpop.f32.mrb[32].mxu0  ;;  %v2100_v27 = vpop.f32.mrb[64].mxu1  ;;  %v5270_v38 = vadd.f32 %v2013_v41, %v2012_v28 }
 0x5ec   :  { %v2107_v61 = vadd.f32 %v2059_v6, %v6414_v35  ;;  %v2109_v62 = vadd.f32 %v2100_v27, %v6415_v63  ;;  %v2061_v60 = vpop.f32.mrb[33].mxu0  ;;  %v2102_v33 = vpop.f32.mrb[65].mxu1 }
 0x5ed   :  { %v2108_v21 = vadd.f32 %v2061_v60, %v6416_v5  ;;  %v2110_v1 = vadd.f32 %v2102_v33, %v6417_v9  ;;  %v2063_v24 = vpop.f32.mrb[34].mxu0  ;;  %v2104_v13 = vpop.f32.mrb[66].mxu1  ;;  %3694 = vtanh.f32 %v5270_v38 }
 0x5ee   :  { %v3279_v25 = vmul.f32 -1.442695, %v2107_v61  ;;  %v2064_v3 = vpop.f32.mrb[35].mxu0  ;;  %v2105_v23 = vpop.f32.mrb[67].mxu1 }
 0x5ef   :  { %v3280_v55 = vmul.f32 -1.442695, %v2108_v21  ;;  %v3693_v41 = vpop.eup %3692  ;;  %v3281_v28 = vmul.f32 -1.442695, %v2110_v1 }
 0x5f0   :  { %3696 = vpow2.f32 %v3279_v25 }
 0x5f1   :  { %3698 = vpow2.f32 %v3280_v55 }
 0x5f2   :  { %3700 = vpow2.f32 %v3281_v28  ;;  %v5305_v28 = vld [vmem:[#allocation8 + $0x80] ss:$16 sps:$4 sm:$0xff]  }
 0x5f3   :  { %3702 = vtanh.f32 %v2109_v62 }
 0x5f7   :  { %v3695_v43 = vpop.eup %3694 }
 0x5f8   :  { %v2016_v6 = vmul.f32 %v3695_v43, %v3693_v41  ;;  %v5282_v41 = vld [vmem:[#allocation8 + $0x8] ss:$16 sps:$4 sm:$0xff]  }
 0x5f9   :  { %v5292_v43 = vld [vmem:[#allocation8 + $0x28] ss:$16 sps:$4 sm:$0xff]  }
 0x5fa   :  { %v3697_v27 = vpop.eup %3696  ;;  %v2017_v35 = vpack.c.bf16 %v2016_v6, %v2016_v6  ;;  %v6444_v6 = vld [vmem:[#allocation40_spill] sm:$0xff] }
 0x5fb   :  { %v3699_v63 = vpop.eup %3698  ;;  %v2114_v60 = vadd.f32 1.0, %v3697_v27  ;;  %v6445_v27 = vld [vmem:[#allocation41_spill] sm:$0xff] }
 0x5fc   :  { %v2120_v24 = vadd.f32 1.0, %v3699_v63  ;;  %2019 = vst [vmem:[#allocation5 + $0xc] sm:$0xf] %v2017_v35  ;;  %2168 = vmatprep.mubr.bf16.mxu0 %v2017_v35  ;;  %2209 = vmatprep.mubr.bf16.mxu1 %v2017_v35  ;;  %v3701_v9 = vpop.eup %3700  ;;  %v6446_v35 = vld [vmem:[#allocation42_spill] sm:$0xff]  ;;  %v6447_v63 = vld [vmem:[#allocation43_spill] sm:$0xff] }
 0x5fd   :  { %3704 = vrcp.f32 %v2114_v60  ;;  %v3703_v61 = vpop.eup %3702  ;;  %v2127_v13 = vadd.f32 1.0, %v3701_v9  ;;  %v6448_v60 = vld [vmem:[#allocation44_spill] sm:$0xff]  ;;  %v6450_v9 = vld [vmem:[#allocation46_spill] sm:$0xff] }
 0x5fe   :  { %3706 = vrcp.f32 %v2120_v24  ;;  %v6449_v24 = vld [vmem:[#allocation45_spill] sm:$0xff] }
 0x5ff   :  { %3708 = vrcp.f32 %v2127_v13  ;;  %v6455_v13 = vld [vmem:[#allocation51_spill] sm:$0xff] }
 0x607   :  { %v3705_v33 = vpop.eup %3704 }
 0x608   :  { %v3707_v5 = vpop.eup %3706  ;;  %v2131_v21 = vmul.f32 %v3705_v33, %v3703_v61  ;;  %v6451_v61 = vld [vmem:[#allocation47_spill] sm:$0xff]  ;;  %v6452_v33 = vld [vmem:[#allocation48_spill] sm:$0xff] }
 0x609   :  { %v2130_v1 = vmul.f32 %v3707_v5, %v5146_v42  ;;  %v3709_v62 = vpop.eup %3708  ;;  %v5286_v42 = vld [vmem:[#allocation8 + $0x2c] ss:$16 sps:$4 sm:$0xff]   ;;  %v6453_v5 = vld [vmem:[#allocation49_spill] sm:$0xff] }
 0x60b   :  { %v5278_v25 = vadd.f32 %v2131_v21, %v2130_v1  ;;  %v6454_v21 = vld [vmem:[#allocation50_spill] sm:$0xff]  ;;  %v6456_v1 = vld [vmem:[#allocation52_spill] sm:$0xff] }
 0x60d   :  { %3710 = vtanh.f32 %v5278_v25 }
 0x617   :  { %v3711_v3 = vpop.eup %3710 }
 0x618   :  { %v2134_v23 = vmul.f32 %v3711_v3, %v3709_v62  ;;  %v6457_v62 = vld [vmem:[#allocation53_spill] sm:$0xff]  ;;  %v6458_v3 = vld [vmem:[#allocation54_spill] sm:$0xff] }
 0x61a   :  { %v2135_v55 = vpack.c.bf16 %v2134_v23, %v2134_v23  ;;  %v6459_v23 = vld [vmem:[#allocation55_spill] sm:$0xff] }
 0x61c   :  { %2169 = vmatmul.mubr.bf16.vlgmr.msra.gmra.mrb[36].mxu0 %v2135_v55  ;;  %2210 = vmatmul.mubr.bf16.vlgmr.msra.gmra.mrb[68].mxu1 %v2135_v55 }
 0x61d   :  { %2251 = vmatpush1.bf16.msra.mxu0 %v5149_v26  ;;  %2292 = vmatpush1.bf16.msra.mxu1 %v5282_v41 }
 0x61e   :  { %2252 = vmatprep.subr.bf16.mxu0 %v5153_v34  ;;  %2293 = vmatprep.subr.bf16.mxu1 %v5286_v42 }
 0x61f   :  { %2282 = vmatprep.mubr.bf16.mxu0 %v6198_v52  ;;  %2323 = vmatprep.mubr.bf16.mxu1 %v6198_v52 }
 0x621   :  { %2253 = vmatpush1.bf16.msra.mxu0 %v5159_v22  ;;  %2294 = vmatpush1.bf16.msra.mxu1 %v5292_v43 }
 0x622   :  { %2254 = vmatprep.subr.bf16.mxu0 %v5163_v31  ;;  %2295 = vmatprep.subr.bf16.mxu1 %v4892_v30  ;;  %v5309_v30 = vld [vmem:[#allocation8 + $0xa4] ss:$16 sps:$4 sm:$0xff]  }
 0x625   :  { %2255 = vmatpush1.bf16.msra.mxu0 %v5167_v48  ;;  %2296 = vmatpush1.bf16.msra.mxu1 %v4896_v47  ;;  %v5313_v47 = vld [vmem:[#allocation8 + $0xa0] ss:$16 sps:$4 sm:$0xff]  }
 0x626   :  { %2256 = vmatprep.subr.bf16.mxu0 %v5171_v49  ;;  %2297 = vmatprep.subr.bf16.mxu1 %v4900_v44  ;;  %v5317_v44 = vld [vmem:[#allocation8 + $0xc4] ss:$16 sps:$4 sm:$0xff]  }
 0x629   :  { %2257 = vmatpush1.bf16.msra.mxu0 %v5175_v0  ;;  %2298 = vmatpush1.bf16.msra.mxu1 %v4904_v53  ;;  %v5321_v53 = vld [vmem:[#allocation8 + $0xc0] ss:$16 sps:$4 sm:$0xff]  }
 0x62a   :  { %2258 = vmatprep.subr.bf16.mxu0 %v5179_v46  ;;  %2299 = vmatprep.subr.bf16.mxu1 %v4908_v50  ;;  %v5325_v50 = vld [vmem:[#allocation8 + $0xe4] ss:$16 sps:$4 sm:$0xff]  }
 0x62d   :  { %2259 = vmatpush1.bf16.msra.mxu0 %v5305_v28  ;;  %2300 = vmatpush1.bf16.msra.mxu1 %v4912_v56  ;;  %v5329_v56 = vld [vmem:[#allocation8 + $0xe0] ss:$16 sps:$4 sm:$0xff]  }
 0x62e   :  { %2260 = vmatprep.subr.bf16.mxu0 %v5309_v30  ;;  %2301 = vmatprep.subr.bf16.mxu1 %v4916_v57  ;;  %v6418_v57 = vld [vmem:[#allocation14_spill] sm:$0xff] }
 0x631   :  { %2261 = vmatpush1.bf16.msra.mxu0 %v5313_v47  ;;  %2302 = vmatpush1.bf16.msra.mxu1 %v4920_v40  ;;  %v6419_v40 = vld [vmem:[#allocation15_spill] sm:$0xff] }
 0x632   :  { %2262 = vmatprep.subr.bf16.mxu0 %v5317_v44  ;;  %2303 = vmatprep.subr.bf16.mxu1 %v4924_v58  ;;  %v6420_v58 = vld [vmem:[#allocation16_spill] sm:$0xff] }
 0x635   :  { %2263 = vmatpush1.bf16.msra.mxu0 %v5321_v53  ;;  %2304 = vmatpush1.bf16.msra.mxu1 %v4928_v32  ;;  %v6421_v32 = vld [vmem:[#allocation17_spill] sm:$0xff] }
 0x636   :  { %2264 = vmatprep.subr.bf16.mxu0 %v5325_v50  ;;  %2305 = vmatprep.subr.bf16.mxu1 %v4932_v54  ;;  %v6422_v54 = vld [vmem:[#allocation18_spill] sm:$0xff] }
 0x639   :  { %2265 = vmatpush1.bf16.msra.mxu0 %v5329_v56  ;;  %2306 = vmatpush1.bf16.msra.mxu1 %v4936_v39  ;;  %v6423_v39 = vld [vmem:[#allocation19_spill] sm:$0xff] }
 0x63a   :  { %2361 = vmatprep.subr.bf16.mxu0 %v4939_v37  ;;  %2402 = vmatprep.subr.bf16.mxu1 %v4942_v36  ;;  %v6424_v37 = vld [vmem:[#allocation20_spill] sm:$0xff]  ;;  %v6425_v36 = vld [vmem:[#allocation21_spill] sm:$0xff] }
 0x63c   :  { %2283 = vmatmul.mubr.bf16.vlgmr.msra.gmra.mrb[40].mxu0 %v2135_v55  ;;  %2324 = vmatmul.mubr.bf16.vlgmr.msra.gmra.mrb[72].mxu1 %v2135_v55  ;;  %v6460_v55 = vld [vmem:[#allocation56_spill] sm:$0xff] }
 0x63d   :  { %2362 = vmatpush1.bf16.msra.mxu0 %v4945_v29  ;;  %2403 = vmatpush1.bf16.msra.mxu1 %v4948_v2  ;;  %v6426_v29 = vld [vmem:[#allocation22_spill] sm:$0xff]  ;;  %v6427_v2 = vld [vmem:[#allocation23_spill] sm:$0xff] }
 0x63e   :  { %2363 = vmatprep.subr.bf16.mxu0 %v4951_v4  ;;  %2404 = vmatprep.subr.bf16.mxu1 %v4954_v7  ;;  %v6428_v4 = vld [vmem:[#allocation24_spill] sm:$0xff]  ;;  %v6429_v7 = vld [vmem:[#allocation25_spill] sm:$0xff] }
 0x641   :  { %2364 = vmatpush1.bf16.msra.mxu0 %v4957_v8  ;;  %2405 = vmatpush1.bf16.msra.mxu1 %v4960_v10  ;;  %v6430_v8 = vld [vmem:[#allocation26_spill] sm:$0xff]  ;;  %v6431_v10 = vld [vmem:[#allocation27_spill] sm:$0xff] }
 0x642   :  { %2365 = vmatprep.subr.bf16.mxu0 %v4963_v11  ;;  %2406 = vmatprep.subr.bf16.mxu1 %v4966_v51  ;;  %v6432_v11 = vld [vmem:[#allocation28_spill] sm:$0xff]  ;;  %v6433_v51 = vld [vmem:[#allocation29_spill] sm:$0xff] }
 0x645   :  { %2366 = vmatpush1.bf16.msra.mxu0 %v4969_v12  ;;  %2407 = vmatpush1.bf16.msra.mxu1 %v4972_v14  ;;  %v6434_v12 = vld [vmem:[#allocation30_spill] sm:$0xff]  ;;  %v6435_v14 = vld [vmem:[#allocation31_spill] sm:$0xff] }
 0x646   :  { %2367 = vmatprep.subr.bf16.mxu0 %v4975_v15  ;;  %2408 = vmatprep.subr.bf16.mxu1 %v4978_v16  ;;  %v6436_v15 = vld [vmem:[#allocation32_spill] sm:$0xff]  ;;  %v6437_v16 = vld [vmem:[#allocation33_spill] sm:$0xff] }
 0x649   :  { %2368 = vmatpush1.bf16.msra.mxu0 %v4981_v17  ;;  %2409 = vmatpush1.bf16.msra.mxu1 %v4984_v18  ;;  %v6438_v17 = vld [vmem:[#allocation34_spill] sm:$0xff]  ;;  %v6439_v18 = vld [vmem:[#allocation35_spill] sm:$0xff] }
 0x64a   :  { %2369 = vmatprep.subr.bf16.mxu0 %v4987_v19  ;;  %2410 = vmatprep.subr.bf16.mxu1 %v4990_v20  ;;  %v6440_v19 = vld [vmem:[#allocation36_spill] sm:$0xff]  ;;  %v6441_v20 = vld [vmem:[#allocation37_spill] sm:$0xff] }
 0x64d   :  { %2370 = vmatpush1.bf16.msra.mxu0 %v6362_v45  ;;  %2411 = vmatpush1.bf16.msra.mxu1 %v6363_v59  ;;  %v6442_v45 = vld [vmem:[#allocation38_spill] sm:$0xff]  ;;  %v6443_v59 = vld [vmem:[#allocation39_spill] sm:$0xff] }
 0x64e   :  { %2371 = vmatprep.subr.bf16.mxu0 %v6418_v57  ;;  %2412 = vmatprep.subr.bf16.mxu1 %v6419_v40  ;;  %v6461_v57 = vld [vmem:[#allocation57_spill] sm:$0xff]  ;;  %v6462_v40 = vld [vmem:[#allocation58_spill] sm:$0xff] }
 0x651   :  { %2372 = vmatpush1.bf16.msra.mxu0 %v6420_v58  ;;  %2413 = vmatpush1.bf16.msra.mxu1 %v6421_v32  ;;  %v5398_v58 = vld [vmem:[#allocation8 + $0xc] ss:$16 sps:$4 sm:$0xff]  }
 0x652   :  { %2373 = vmatprep.subr.bf16.mxu0 %v6422_v54  ;;  %2414 = vmatprep.subr.bf16.mxu1 %v6423_v39  ;;  %v6463_v39 = vld [vmem:[#allocation13_spill] sm:$0xff] }
 0x655   :  { %2374 = vmatpush1.bf16.msra.mxu0 %v6424_v37  ;;  %2415 = vmatpush1.bf16.msra.mxu1 %v6425_v36 }
 0x656   :  { %2375 = vmatprep.subr.bf16.mxu0 %v6426_v29  ;;  %2416 = vmatprep.subr.bf16.mxu1 %v6427_v2  ;;  %v6464_v2 = vld [vmem:[#allocation87_spill] sm:$0xff] }
 0x659   :  { %2376 = vmatpush1.bf16.msra.mxu0 %v6428_v4  ;;  %2417 = vmatpush1.bf16.msra.mxu1 %v6429_v7 }
 0x65a   :  { %2377 = vmatprep.subr.bf16.mxu0 %v6430_v8  ;;  %2418 = vmatprep.subr.bf16.mxu1 %v6431_v10 }
 0x65d   :  { %2378 = vmatpush1.bf16.msra.mxu0 %v6432_v11  ;;  %2419 = vmatpush1.bf16.msra.mxu1 %v6433_v51 }
 0x65e   :  { %2379 = vmatprep.subr.bf16.mxu0 %v6434_v12  ;;  %2420 = vmatprep.subr.bf16.mxu1 %v6435_v14  ;;  %v6465_v14 = vld [vmem:[#allocation88_spill] sm:$0xff] }
 0x661   :  { %2380 = vmatpush1.bf16.msra.mxu0 %v6436_v15  ;;  %2421 = vmatpush1.bf16.msra.mxu1 %v6437_v16 }
 0x662   :  { %2381 = vmatprep.subr.bf16.mxu0 %v6438_v17  ;;  %2422 = vmatprep.subr.bf16.mxu1 %v6439_v18  ;;  %v6466_v17 = vld [vmem:[#allocation89_spill] sm:$0xff] }
 0x665   :  { %2382 = vmatpush1.bf16.msra.mxu0 %v6440_v19  ;;  %2423 = vmatpush1.bf16.msra.mxu1 %v6441_v20 }
 0x666   :  { %2383 = vmatprep.subr.bf16.mxu0 %v6442_v45  ;;  %2424 = vmatprep.subr.bf16.mxu1 %v6443_v59 }
 0x669   :  { %2384 = vmatpush1.bf16.msra.mxu0 %v6444_v6  ;;  %2425 = vmatpush1.bf16.msra.mxu1 %v6445_v27 }
 0x66a   :  { %2385 = vmatprep.subr.bf16.mxu0 %v6446_v35  ;;  %2426 = vmatprep.subr.bf16.mxu1 %v6447_v63 }
 0x66d   :  { %2386 = vmatpush1.bf16.msra.mxu0 %v6448_v60  ;;  %2427 = vmatpush1.bf16.msra.mxu1 %v6449_v24 }
 0x66e   :  { %2387 = vmatprep.subr.bf16.mxu0 %v6450_v9  ;;  %2428 = vmatprep.subr.bf16.mxu1 %v6451_v61 }
 0x671   :  { %2388 = vmatpush1.bf16.msra.mxu0 %v6452_v33  ;;  %2429 = vmatpush1.bf16.msra.mxu1 %v6453_v5 }
 0x672   :  { %2389 = vmatprep.subr.bf16.mxu0 %v6454_v21  ;;  %2430 = vmatprep.subr.bf16.mxu1 %v6455_v13  ;;  %v6467_v21 = vld [vmem:[#allocation66_spill] sm:$0xff] }
 0x675   :  { %2390 = vmatpush1.bf16.msra.mxu0 %v6456_v1  ;;  %2431 = vmatpush1.bf16.msra.mxu1 %v6457_v62  ;;  %v6468_v1 = vld [vmem:[#allocation80_spill] sm:$0xff] }
 0x676   :  { %2391 = vmatprep.subr.bf16.mxu0 %v6458_v3  ;;  %2432 = vmatprep.subr.bf16.mxu1 %v6459_v23 }
 0x679   :  { %2392 = vmatpush1.bf16.msra.mxu0 %v6460_v55  ;;  %2433 = vmatpush1.bf16.msra.mxu1 %v6461_v57  ;;  %v6469_v55 = vld [vmem:[#allocation67_spill] sm:$0xff] }
 0x67a   :  { %2475 = vmatprep.subr.bf16.mxu0 %v6462_v40  ;;  %2516 = vmatprep.subr.bf16.mxu1 %v5398_v58 }
 0x6ef   :  { %v2170_v32 = vpop.f32.mrb[36].mxu0  ;;  %v2211_v54 = vpop.f32.mrb[68].mxu1 }
 0x6f0   :  { %v2171_v37 = vadd.f32 %v2170_v32, %v6463_v39  ;;  %v2172_v36 = vpop.f32.mrb[37].mxu0  ;;  %v2213_v29 = vpop.f32.mrb[69].mxu1  ;;  %v2212_v18 = vadd.f32 %v2211_v54, %v6466_v17  ;;  %v6470_v32 = vld [vmem:[#allocation81_spill] sm:$0xff] }
 0x6f1   :  { %v2173_v4 = vadd.f32 %v2172_v36, %v6464_v2  ;;  %v2174_v7 = vpop.f32.mrb[38].mxu0  ;;  %v2215_v8 = vpop.f32.mrb[70].mxu1  ;;  %v2214_v15 = vadd.f32 %v2213_v29, %v6465_v14 }
 0x6f2   :  { %v3282_v10 = vmul.f32 -1.442695, %v2171_v37  ;;  %v2175_v11 = vpop.f32.mrb[39].mxu0  ;;  %v2216_v51 = vpop.f32.mrb[71].mxu1 }
 0x6f3   :  { %v3283_v12 = vmul.f32 -1.442695, %v2173_v4  ;;  %v3284_v16 = vmul.f32 -1.442695, %v2214_v15 }
 0x6f4   :  { %3712 = vpow2.f32 %v3282_v10 }
 0x6f5   :  { %3714 = vpow2.f32 %v3283_v12 }
 0x6f6   :  { %3716 = vpow2.f32 %v3284_v16 }
 0x6f7   :  { %3718 = vtanh.f32 %v2212_v18 }
 0x6fe   :  { %v3713_v19 = vpop.eup %3712 }
 0x6ff   :  { %v3715_v20 = vpop.eup %3714  ;;  %v2221_v45 = vadd.f32 1.0, %v3713_v19 }
 0x700   :  { %v2227_v59 = vadd.f32 1.0, %v3715_v20  ;;  %v3717_v6 = vpop.eup %3716 }
 0x701   :  { %3720 = vrcp.f32 %v2221_v45  ;;  %v3719_v27 = vpop.eup %3718  ;;  %v2234_v24 = vadd.f32 1.0, %v3717_v6 }
 0x702   :  { %3722 = vrcp.f32 %v2227_v59 }
 0x703   :  { %3724 = vrcp.f32 %v2234_v24 }
 0x70b   :  { %v3721_v35 = vpop.eup %3720 }
 0x70c   :  { %v3723_v63 = vpop.eup %3722  ;;  %v2238_v60 = vmul.f32 %v3721_v35, %v3719_v27 }
 0x70d   :  { %v2237_v9 = vmul.f32 %v3723_v63, %v5270_v38  ;;  %v3725_v8 = vpop.eup %3724 }
 0x70f   :  { %v2284_v61 = vpop.f32.mrb[40].mxu0  ;;  %v2325_v33 = vpop.f32.mrb[72].mxu1  ;;  %v5406_v5 = vadd.f32 %v2238_v60, %v2237_v9 }
 0x710   :  { %v2332_v13 = vadd.f32 %v2284_v61, %v6467_v21  ;;  %v2334_v62 = vadd.f32 %v2325_v33, %v6468_v1  ;;  %v2286_v3 = vpop.f32.mrb[41].mxu0  ;;  %v2327_v23 = vpop.f32.mrb[73].mxu1  ;;  %v5462_v21 = vld [vmem:[#allocation8 + $0xc8] ss:$16 sps:$4 sm:$0xff]  }
 0x711   :  { %v2333_v57 = vadd.f32 %v2286_v3, %v6469_v55  ;;  %v2335_v54 = vadd.f32 %v2327_v23, %v6470_v32  ;;  %v2288_v37 = vpop.f32.mrb[42].mxu0  ;;  %v2329_v36 = vpop.f32.mrb[74].mxu1  ;;  %3726 = vtanh.f32 %v5406_v5  ;;  %v5470_v1 = vld [vmem:[#allocation8 + $0xe8] ss:$16 sps:$4 sm:$0xff]   ;;  %v5476_v3 = vld [vmem:[#allocation10 + $0xc] ss:$16 sps:$4 sm:$0xff]  }
 0x712   :  { %v3285_v38 = vmul.f32 -1.442695, %v2332_v13  ;;  %v2289_v29 = vpop.f32.mrb[43].mxu0  ;;  %v2330_v4 = vpop.f32.mrb[75].mxu1  ;;  %v5466_v13 = vld [vmem:[#allocation8 + $0xec] ss:$16 sps:$4 sm:$0xff]  }
 0x713   :  { %v3286_v7 = vmul.f32 -1.442695, %v2333_v57  ;;  %v3287_v11 = vmul.f32 -1.442695, %v2335_v54  ;;  %v5479_v23 = vld [vmem:[#allocation10] ss:$16 sps:$4 sm:$0xff]  }
 0x714   :  { %3728 = vpow2.f32 %v3285_v38  ;;  %v5482_v55 = vld [vmem:[#allocation10 + $0x8] ss:$16 sps:$4 sm:$0xff]   ;;  %v5485_v57 = vld [vmem:[#allocation10 + $0x24] ss:$16 sps:$4 sm:$0xff]   ;;  %v5488_v32 = vld [vmem:[#allocation10 + $0x2c] ss:$16 sps:$4 sm:$0xff]  }
 0x715   :  { %3730 = vpow2.f32 %v3286_v7  ;;  %v5491_v54 = vld [vmem:[#allocation10 + $0x20] ss:$16 sps:$4 sm:$0xff]   ;;  %v5494_v37 = vld [vmem:[#allocation10 + $0x28] ss:$16 sps:$4 sm:$0xff]   ;;  %v5497_v36 = vld [vmem:[#allocation10 + $0x44] ss:$16 sps:$4 sm:$0xff]  }
 0x716   :  { %3732 = vpow2.f32 %v3287_v11  ;;  %v5500_v38 = vld [vmem:[#allocation10 + $0x4c] ss:$16 sps:$4 sm:$0xff]   ;;  %v5503_v29 = vld [vmem:[#allocation10 + $0x40] ss:$16 sps:$4 sm:$0xff]   ;;  %v5506_v4 = vld [vmem:[#allocation10 + $0x48] ss:$16 sps:$4 sm:$0xff]  }
 0x717   :  { %3734 = vtanh.f32 %v2334_v62  ;;  %v5473_v62 = vld [vmem:[#allocation10 + $0x4] ss:$16 sps:$4 sm:$0xff]   ;;  %v5518_v11 = vld [vmem:[#allocation10 + $0x68] ss:$16 sps:$4 sm:$0xff]  }
 0x718   :  { %v5509_v7 = vld [vmem:[#allocation10 + $0x64] ss:$16 sps:$4 sm:$0xff]  }
 0x71b   :  { %v3727_v10 = vpop.eup %3726 }
 0x71c   :  { %v2241_v51 = vmul.f32 %v3727_v10, %v3725_v8  ;;  %v5512_v8 = vld [vmem:[#allocation10 + $0x6c] ss:$16 sps:$4 sm:$0xff]   ;;  %v5515_v10 = vld [vmem:[#allocation10 + $0x60] ss:$16 sps:$4 sm:$0xff]  }
 0x71e   :  { %v3729_v12 = vpop.eup %3728  ;;  %v2242_v15 = vpack.c.bf16 %v2241_v51, %v2241_v51  ;;  %v5521_v51 = vld [vmem:[#allocation10 + $0x84] ss:$16 sps:$4 sm:$0xff]  }
 0x71f   :  { %v3731_v16 = vpop.eup %3730  ;;  %v2339_v18 = vadd.f32 1.0, %v3729_v12  ;;  %v5524_v12 = vld [vmem:[#allocation10 + $0x8c] ss:$16 sps:$4 sm:$0xff]  }
 0x720   :  { %v2345_v19 = vadd.f32 1.0, %v3731_v16  ;;  %2244 = vst [vmem:[#allocation5 + $0x10] sm:$0xf] %v2242_v15  ;;  %2393 = vmatprep.mubr.bf16.mxu0 %v2242_v15  ;;  %2434 = vmatprep.mubr.bf16.mxu1 %v2242_v15  ;;  %v3733_v20 = vpop.eup %3732  ;;  %v5527_v15 = vld [vmem:[#allocation10 + $0x80] ss:$16 sps:$4 sm:$0xff]  }
 0x721   :  { %3736 = vrcp.f32 %v2339_v18  ;;  %v3735_v45 = vpop.eup %3734  ;;  %v2352_v35 = vadd.f32 1.0, %v3733_v20  ;;  %6471 = vst [vmem:[#allocation86_spill] sm:$0xff] %v5527_v15  ;;  %v5530_v16 = vld [vmem:[#allocation10 + $0x88] ss:$16 sps:$4 sm:$0xff]   ;;  %v5533_v18 = vld [vmem:[#allocation10 + $0xa4] ss:$16 sps:$4 sm:$0xff]  }
 0x722   :  { %3738 = vrcp.f32 %v2345_v19  ;;  %6472 = vst [vmem:[#allocation60_spill] sm:$0xff] %v5530_v16  ;;  %6473 = vst [vmem:[#allocation74_spill] sm:$0xff] %v5533_v18  ;;  %v5536_v19 = vld [vmem:[#allocation10 + $0xac] ss:$16 sps:$4 sm:$0xff]   ;;  %v5539_v20 = vld [vmem:[#allocation10 + $0xa0] ss:$16 sps:$4 sm:$0xff]  }
 0x723   :  { %3740 = vrcp.f32 %v2352_v35  ;;  %6474 = vst [vmem:[#allocation61_spill] sm:$0xff] %v5536_v19  ;;  %6475 = vst [vmem:[#allocation75_spill] sm:$0xff] %v5539_v20  ;;  %v5554_v35 = vld [vmem:[#allocation10 + $0xc8] ss:$16 sps:$4 sm:$0xff]  }
 0x724   :  { %6480 = vst [vmem:[#allocation59_spill] sm:$0xff] %v5554_v35 }
 0x72b   :  { %v3737_v59 = vpop.eup %3736 }
 0x72c   :  { %v3739_v6 = vpop.eup %3738  ;;  %v2356_v27 = vmul.f32 %v3737_v59, %v3735_v45  ;;  %v5542_v45 = vld [vmem:[#allocation10 + $0xa8] ss:$16 sps:$4 sm:$0xff]   ;;  %v5545_v59 = vld [vmem:[#allocation10 + $0xc4] ss:$16 sps:$4 sm:$0xff]  }
 0x72d   :  { %v2355_v63 = vmul.f32 %v3739_v6, %v5278_v25  ;;  %v3741_v24 = vpop.eup %3740  ;;  %v5426_v25 = vld [vmem:[#allocation8 + $0x4c] ss:$16 sps:$4 sm:$0xff]   ;;  %6476 = vst [vmem:[#allocation62_spill] sm:$0xff] %v5542_v45  ;;  %6477 = vst [vmem:[#allocation76_spill] sm:$0xff] %v5545_v59 }
 0x72e   :  { %v5548_v6 = vld [vmem:[#allocation10 + $0xcc] ss:$16 sps:$4 sm:$0xff]  }
 0x72f   :  { %v5414_v60 = vadd.f32 %v2356_v27, %v2355_v63  ;;  %6478 = vst [vmem:[#allocation63_spill] sm:$0xff] %v5548_v6  ;;  %v5551_v27 = vld [vmem:[#allocation10 + $0xc0] ss:$16 sps:$4 sm:$0xff]   ;;  %v5557_v63 = vld [vmem:[#allocation10 + $0xe4] ss:$16 sps:$4 sm:$0xff]  }
 0x730   :  { %6479 = vst [vmem:[#allocation77_spill] sm:$0xff] %v5551_v27  ;;  %6481 = vst [vmem:[#allocation73_spill] sm:$0xff] %v5557_v63 }
 0x731   :  { %3742 = vtanh.f32 %v5414_v60 }
 0x73b   :  { %v3743_v9 = vpop.eup %3742 }
 0x73c   :  { %v2359_v61 = vmul.f32 %v3743_v9, %v3741_v24  ;;  %v5560_v24 = vld [vmem:[#allocation10 + $0xec] ss:$16 sps:$4 sm:$0xff]   ;;  %v5563_v9 = vld [vmem:[#allocation10 + $0xe0] ss:$16 sps:$4 sm:$0xff]  }
 0x73d   :  { %6482 = vst [vmem:[#allocation72_spill] sm:$0xff] %v5560_v24  ;;  %6483 = vst [vmem:[#allocation64_spill] sm:$0xff] %v5563_v9 }
 0x73e   :  { %v2360_v33 = vpack.c.bf16 %v2359_v61, %v2359_v61  ;;  %v5566_v61 = vld [vmem:[#allocation10 + $0xe8] ss:$16 sps:$4 sm:$0xff]  }
 0x73f   :  { %6484 = vst [vmem:[#allocation78_spill] sm:$0xff] %v5566_v61 }
 0x740   :  { %2394 = vmatmul.mubr.bf16.vlgmr.msra.gmra.mrb[44].mxu0 %v2360_v33  ;;  %2435 = vmatmul.mubr.bf16.vlgmr.msra.gmra.mrb[76].mxu1 %v2360_v33 }
 0x741   :  { %2476 = vmatpush1.bf16.msra.mxu0 %v5149_v26  ;;  %2517 = vmatpush1.bf16.msra.mxu1 %v5282_v41  ;;  %v5430_v26 = vld [vmem:[#allocation8 + $0x48] ss:$16 sps:$4 sm:$0xff]  }
 0x742   :  { %2477 = vmatprep.subr.bf16.mxu0 %v5153_v34  ;;  %2518 = vmatprep.subr.bf16.mxu1 %v5286_v42  ;;  %v5434_v34 = vld [vmem:[#allocation8 + $0x6c] ss:$16 sps:$4 sm:$0xff]  }
 0x743   :  { %2507 = vmatprep.mubr.bf16.mxu0 %v6198_v52  ;;  %2548 = vmatprep.mubr.bf16.mxu1 %v6198_v52 }
 0x745   :  { %2478 = vmatpush1.bf16.msra.mxu0 %v5159_v22  ;;  %2519 = vmatpush1.bf16.msra.mxu1 %v5292_v43  ;;  %v5438_v22 = vld [vmem:[#allocation8 + $0x68] ss:$16 sps:$4 sm:$0xff]  }
 0x746   :  { %2479 = vmatprep.subr.bf16.mxu0 %v5163_v31  ;;  %2520 = vmatprep.subr.bf16.mxu1 %v5426_v25  ;;  %v5442_v31 = vld [vmem:[#allocation8 + $0x8c] ss:$16 sps:$4 sm:$0xff]  }
 0x749   :  { %2480 = vmatpush1.bf16.msra.mxu0 %v5167_v48  ;;  %2521 = vmatpush1.bf16.msra.mxu1 %v5430_v26  ;;  %v5446_v48 = vld [vmem:[#allocation8 + $0x88] ss:$16 sps:$4 sm:$0xff]  }
 0x74a   :  { %2481 = vmatprep.subr.bf16.mxu0 %v5171_v49  ;;  %2522 = vmatprep.subr.bf16.mxu1 %v5434_v34  ;;  %v5450_v49 = vld [vmem:[#allocation8 + $0xac] ss:$16 sps:$4 sm:$0xff]  }
 0x74d   :  { %2482 = vmatpush1.bf16.msra.mxu0 %v5175_v0  ;;  %2523 = vmatpush1.bf16.msra.mxu1 %v5438_v22  ;;  %v5454_v0 = vld [vmem:[#allocation8 + $0xa8] ss:$16 sps:$4 sm:$0xff]  }
 0x74e   :  { %2483 = vmatprep.subr.bf16.mxu0 %v5179_v46  ;;  %2524 = vmatprep.subr.bf16.mxu1 %v5442_v31  ;;  %v5458_v46 = vld [vmem:[#allocation8 + $0xcc] ss:$16 sps:$4 sm:$0xff]  }
 0x751   :  { %2484 = vmatpush1.bf16.msra.mxu0 %v5305_v28  ;;  %2525 = vmatpush1.bf16.msra.mxu1 %v5446_v48 }
 0x752   :  { %2485 = vmatprep.subr.bf16.mxu0 %v5309_v30  ;;  %2526 = vmatprep.subr.bf16.mxu1 %v5450_v49 }
 0x755   :  { %2486 = vmatpush1.bf16.msra.mxu0 %v5313_v47  ;;  %2527 = vmatpush1.bf16.msra.mxu1 %v5454_v0 }
 0x756   :  { %2487 = vmatprep.subr.bf16.mxu0 %v5317_v44  ;;  %2528 = vmatprep.subr.bf16.mxu1 %v5458_v46 }
 0x759   :  { %2488 = vmatpush1.bf16.msra.mxu0 %v5321_v53  ;;  %2529 = vmatpush1.bf16.msra.mxu1 %v5462_v21 }
 0x75a   :  { %2489 = vmatprep.subr.bf16.mxu0 %v5325_v50  ;;  %2530 = vmatprep.subr.bf16.mxu1 %v5466_v13 }
 0x75d   :  { %2490 = vmatpush1.bf16.msra.mxu0 %v5329_v56  ;;  %2531 = vmatpush1.bf16.msra.mxu1 %v5470_v1 }
 0x75e   :  { %2586 = vmatprep.subr.bf16.mxu0 %v5473_v62  ;;  %2627 = vmatprep.subr.bf16.mxu1 %v5476_v3 }
 0x760   :  { %2508 = vmatmul.mubr.bf16.vlgmr.msra.gmra.mrb[48].mxu0 %v2360_v33  ;;  %2549 = vmatmul.mubr.bf16.vlgmr.msra.gmra.mrb[80].mxu1 %v2360_v33  ;;  %v5569_v33 = vld [vmem:[#allocation10 + $0x104] ss:$16 sps:$4 sm:$0xff]  }
 0x761   :  { %2587 = vmatpush1.bf16.msra.mxu0 %v5479_v23  ;;  %2628 = vmatpush1.bf16.msra.mxu1 %v5482_v55  ;;  %6485 = vst [vmem:[#allocation65_spill] sm:$0xff] %v5569_v33 }
 0x762   :  { %2588 = vmatprep.subr.bf16.mxu0 %v5485_v57  ;;  %2629 = vmatprep.subr.bf16.mxu1 %v5488_v32 }
 0x765   :  { %2589 = vmatpush1.bf16.msra.mxu0 %v5491_v54  ;;  %2630 = vmatpush1.bf16.msra.mxu1 %v5494_v37 }
 0x766   :  { %2590 = vmatprep.subr.bf16.mxu0 %v5497_v36  ;;  %2631 = vmatprep.subr.bf16.mxu1 %v5500_v38 }
 0x769   :  { %2591 = vmatpush1.bf16.msra.mxu0 %v5503_v29  ;;  %2632 = vmatpush1.bf16.msra.mxu1 %v5506_v4 }
 0x76a   :  { %2592 = vmatprep.subr.bf16.mxu0 %v5509_v7  ;;  %2633 = vmatprep.subr.bf16.mxu1 %v5512_v8 }
 0x76d   :  { %2593 = vmatpush1.bf16.msra.mxu0 %v5515_v10  ;;  %2634 = vmatpush1.bf16.msra.mxu1 %v5518_v11 }
 0x76e   :  { %2594 = vmatprep.subr.bf16.mxu0 %v5521_v51  ;;  %2635 = vmatprep.subr.bf16.mxu1 %v5524_v12 }
 0x771   :  { %2595 = vmatpush1.bf16.msra.mxu0 %v5527_v15  ;;  %2636 = vmatpush1.bf16.msra.mxu1 %v5530_v16 }
 0x772   :  { %2596 = vmatprep.subr.bf16.mxu0 %v5533_v18  ;;  %2637 = vmatprep.subr.bf16.mxu1 %v5536_v19 }
 0x775   :  { %2597 = vmatpush1.bf16.msra.mxu0 %v5539_v20  ;;  %2638 = vmatpush1.bf16.msra.mxu1 %v5542_v45 }
 0x776   :  { %2598 = vmatprep.subr.bf16.mxu0 %v5545_v59  ;;  %2639 = vmatprep.subr.bf16.mxu1 %v5548_v6 }
 0x779   :  { %2599 = vmatpush1.bf16.msra.mxu0 %v5551_v27  ;;  %2640 = vmatpush1.bf16.msra.mxu1 %v5554_v35  ;;  %v5572_v35 = vld [vmem:[#allocation10 + $0x10c] ss:$16 sps:$4 sm:$0xff]  }
 0x77a   :  { %2600 = vmatprep.subr.bf16.mxu0 %v5557_v63  ;;  %2641 = vmatprep.subr.bf16.mxu1 %v5560_v24  ;;  %6486 = vst [vmem:[#allocation79_spill] sm:$0xff] %v5572_v35  ;;  %v5575_v63 = vld [vmem:[#allocation10 + $0x100] ss:$16 sps:$4 sm:$0xff]   ;;  %v5578_v24 = vld [vmem:[#allocation10 + $0x108] ss:$16 sps:$4 sm:$0xff]  }
 0x77b   :  { %6487 = vst [vmem:[#allocation14_spill] sm:$0xff] %v5575_v63  ;;  %6488 = vst [vmem:[#allocation15_spill] sm:$0xff] %v5578_v24 }
 0x77d   :  { %2601 = vmatpush1.bf16.msra.mxu0 %v5563_v9  ;;  %2642 = vmatpush1.bf16.msra.mxu1 %v5566_v61  ;;  %v5581_v9 = vld [vmem:[#allocation10 + $0x124] ss:$16 sps:$4 sm:$0xff]   ;;  %v5584_v61 = vld [vmem:[#allocation10 + $0x12c] ss:$16 sps:$4 sm:$0xff]  }
 0x77e   :  { %2602 = vmatprep.subr.bf16.mxu0 %v5569_v33  ;;  %2643 = vmatprep.subr.bf16.mxu1 %v5572_v35  ;;  %6489 = vst [vmem:[#allocation16_spill] sm:$0xff] %v5581_v9  ;;  %6490 = vst [vmem:[#allocation17_spill] sm:$0xff] %v5584_v61  ;;  %v5587_v33 = vld [vmem:[#allocation10 + $0x120] ss:$16 sps:$4 sm:$0xff]   ;;  %v5590_v35 = vld [vmem:[#allocation10 + $0x128] ss:$16 sps:$4 sm:$0xff]  }
 0x77f   :  { %6491 = vst [vmem:[#allocation18_spill] sm:$0xff] %v5587_v33  ;;  %6492 = vst [vmem:[#allocation19_spill] sm:$0xff] %v5590_v35 }
 0x781   :  { %2603 = vmatpush1.bf16.msra.mxu0 %v5575_v63  ;;  %2644 = vmatpush1.bf16.msra.mxu1 %v5578_v24  ;;  %v5593_v63 = vld [vmem:[#allocation10 + $0x144] ss:$16 sps:$4 sm:$0xff]   ;;  %v5596_v24 = vld [vmem:[#allocation10 + $0x14c] ss:$16 sps:$4 sm:$0xff]  }
 0x782   :  { %2604 = vmatprep.subr.bf16.mxu0 %v5581_v9  ;;  %2645 = vmatprep.subr.bf16.mxu1 %v5584_v61  ;;  %6493 = vst [vmem:[#allocation20_spill] sm:$0xff] %v5593_v63  ;;  %6494 = vst [vmem:[#allocation21_spill] sm:$0xff] %v5596_v24  ;;  %v5599_v9 = vld [vmem:[#allocation10 + $0x140] ss:$16 sps:$4 sm:$0xff]   ;;  %v5602_v61 = vld [vmem:[#allocation10 + $0x148] ss:$16 sps:$4 sm:$0xff]  }
 0x783   :  { %6495 = vst [vmem:[#allocation22_spill] sm:$0xff] %v5599_v9  ;;  %6496 = vst [vmem:[#allocation23_spill] sm:$0xff] %v5602_v61 }
 0x785   :  { %2605 = vmatpush1.bf16.msra.mxu0 %v5587_v33  ;;  %2646 = vmatpush1.bf16.msra.mxu1 %v5590_v35  ;;  %v5605_v33 = vld [vmem:[#allocation10 + $0x164] ss:$16 sps:$4 sm:$0xff]   ;;  %v5608_v35 = vld [vmem:[#allocation10 + $0x16c] ss:$16 sps:$4 sm:$0xff]  }
 0x786   :  { %2606 = vmatprep.subr.bf16.mxu0 %v5593_v63  ;;  %2647 = vmatprep.subr.bf16.mxu1 %v5596_v24  ;;  %6497 = vst [vmem:[#allocation24_spill] sm:$0xff] %v5605_v33  ;;  %6498 = vst [vmem:[#allocation25_spill] sm:$0xff] %v5608_v35  ;;  %v5611_v63 = vld [vmem:[#allocation10 + $0x160] ss:$16 sps:$4 sm:$0xff]   ;;  %v5614_v24 = vld [vmem:[#allocation10 + $0x168] ss:$16 sps:$4 sm:$0xff]  }
 0x787   :  { %6499 = vst [vmem:[#allocation26_spill] sm:$0xff] %v5611_v63  ;;  %6500 = vst [vmem:[#allocation27_spill] sm:$0xff] %v5614_v24 }
 0x789   :  { %2607 = vmatpush1.bf16.msra.mxu0 %v5599_v9  ;;  %2648 = vmatpush1.bf16.msra.mxu1 %v5602_v61  ;;  %v5617_v9 = vld [vmem:[#allocation10 + $0x184] ss:$16 sps:$4 sm:$0xff]   ;;  %v5620_v61 = vld [vmem:[#allocation10 + $0x18c] ss:$16 sps:$4 sm:$0xff]  }
 0x78a   :  { %2608 = vmatprep.subr.bf16.mxu0 %v5605_v33  ;;  %2649 = vmatprep.subr.bf16.mxu1 %v5608_v35  ;;  %6501 = vst [vmem:[#allocation28_spill] sm:$0xff] %v5617_v9  ;;  %6502 = vst [vmem:[#allocation29_spill] sm:$0xff] %v5620_v61  ;;  %v5623_v33 = vld [vmem:[#allocation10 + $0x180] ss:$16 sps:$4 sm:$0xff]   ;;  %v5626_v35 = vld [vmem:[#allocation10 + $0x188] ss:$16 sps:$4 sm:$0xff]  }
 0x78b   :  { %6503 = vst [vmem:[#allocation30_spill] sm:$0xff] %v5623_v33  ;;  %6504 = vst [vmem:[#allocation31_spill] sm:$0xff] %v5626_v35 }
 0x78d   :  { %2609 = vmatpush1.bf16.msra.mxu0 %v5611_v63  ;;  %2650 = vmatpush1.bf16.msra.mxu1 %v5614_v24  ;;  %v5629_v63 = vld [vmem:[#allocation10 + $0x1a4] ss:$16 sps:$4 sm:$0xff]   ;;  %v5632_v24 = vld [vmem:[#allocation10 + $0x1ac] ss:$16 sps:$4 sm:$0xff]  }
 0x78e   :  { %2610 = vmatprep.subr.bf16.mxu0 %v5617_v9  ;;  %2651 = vmatprep.subr.bf16.mxu1 %v5620_v61  ;;  %6505 = vst [vmem:[#allocation32_spill] sm:$0xff] %v5629_v63  ;;  %6506 = vst [vmem:[#allocation33_spill] sm:$0xff] %v5632_v24  ;;  %v5635_v9 = vld [vmem:[#allocation10 + $0x1a0] ss:$16 sps:$4 sm:$0xff]   ;;  %v5638_v61 = vld [vmem:[#allocation10 + $0x1a8] ss:$16 sps:$4 sm:$0xff]  }
 0x78f   :  { %6507 = vst [vmem:[#allocation34_spill] sm:$0xff] %v5635_v9  ;;  %6508 = vst [vmem:[#allocation35_spill] sm:$0xff] %v5638_v61 }
 0x791   :  { %2611 = vmatpush1.bf16.msra.mxu0 %v5623_v33  ;;  %2652 = vmatpush1.bf16.msra.mxu1 %v5626_v35  ;;  %v5641_v33 = vld [vmem:[#allocation10 + $0x1c4] ss:$16 sps:$4 sm:$0xff]   ;;  %v5644_v35 = vld [vmem:[#allocation10 + $0x1cc] ss:$16 sps:$4 sm:$0xff]  }
 0x792   :  { %2612 = vmatprep.subr.bf16.mxu0 %v5629_v63  ;;  %2653 = vmatprep.subr.bf16.mxu1 %v5632_v24  ;;  %6509 = vst [vmem:[#allocation36_spill] sm:$0xff] %v5641_v33  ;;  %6510 = vst [vmem:[#allocation37_spill] sm:$0xff] %v5644_v35  ;;  %v5647_v63 = vld [vmem:[#allocation10 + $0x1c0] ss:$16 sps:$4 sm:$0xff]   ;;  %v5650_v24 = vld [vmem:[#allocation10 + $0x1c8] ss:$16 sps:$4 sm:$0xff]  }
 0x793   :  { %6511 = vst [vmem:[#allocation38_spill] sm:$0xff] %v5647_v63  ;;  %6512 = vst [vmem:[#allocation39_spill] sm:$0xff] %v5650_v24 }
 0x795   :  { %2613 = vmatpush1.bf16.msra.mxu0 %v5635_v9  ;;  %2654 = vmatpush1.bf16.msra.mxu1 %v5638_v61  ;;  %v5653_v9 = vld [vmem:[#allocation10 + $0x1e4] ss:$16 sps:$4 sm:$0xff]   ;;  %v5656_v61 = vld [vmem:[#allocation10 + $0x1ec] ss:$16 sps:$4 sm:$0xff]  }
 0x796   :  { %2614 = vmatprep.subr.bf16.mxu0 %v5641_v33  ;;  %2655 = vmatprep.subr.bf16.mxu1 %v5644_v35  ;;  %6513 = vst [vmem:[#allocation40_spill] sm:$0xff] %v5653_v9  ;;  %6514 = vst [vmem:[#allocation41_spill] sm:$0xff] %v5656_v61  ;;  %v5659_v33 = vld [vmem:[#allocation10 + $0x1e0] ss:$16 sps:$4 sm:$0xff]   ;;  %v5662_v35 = vld [vmem:[#allocation10 + $0x1e8] ss:$16 sps:$4 sm:$0xff]  }
 0x797   :  { %6515 = vst [vmem:[#allocation42_spill] sm:$0xff] %v5659_v33  ;;  %6516 = vst [vmem:[#allocation43_spill] sm:$0xff] %v5662_v35 }
 0x799   :  { %2615 = vmatpush1.bf16.msra.mxu0 %v5647_v63  ;;  %2656 = vmatpush1.bf16.msra.mxu1 %v5650_v24 }
 0x79a   :  { %2616 = vmatprep.subr.bf16.mxu0 %v5653_v9  ;;  %2657 = vmatprep.subr.bf16.mxu1 %v5656_v61 }
 0x79d   :  { %2617 = vmatpush1.bf16.msra.mxu0 %v5659_v33  ;;  %2658 = vmatpush1.bf16.msra.mxu1 %v5662_v35 }
 0x79e   :  { %2700 = vmatprep.subr.bf16.mxu0 %v6462_v40  ;;  %2741 = vmatprep.subr.bf16.mxu1 %v5398_v58 }
 0x813   :  { %v2395_v24 = vpop.f32.mrb[44].mxu0  ;;  %v2436_v63 = vpop.f32.mrb[76].mxu1 }
 0x814   :  { %v2396_v9 = vadd.f32 %v2395_v24, %v6463_v39  ;;  %v2397_v27 = vpop.f32.mrb[45].mxu0  ;;  %v2438_v6 = vpop.f32.mrb[77].mxu1  ;;  %v2437_v58 = vadd.f32 %v2436_v63, %v6466_v17  ;;  %v6517_v63 = vld [vmem:[#allocation68_spill] sm:$0xff]  ;;  %v6520_v17 = vld [vmem:[#allocation83_spill] sm:$0xff] }
 0x815   :  { %v2398_v61 = vadd.f32 %v2397_v27, %v6464_v2  ;;  %v2399_v59 = vpop.f32.mrb[46].mxu0  ;;  %v2440_v45 = vpop.f32.mrb[78].mxu1  ;;  %v2439_v40 = vadd.f32 %v2438_v6, %v6465_v14 }
 0x816   :  { %v3288_v20 = vmul.f32 -1.442695, %v2396_v9  ;;  %v2400_v33 = vpop.f32.mrb[47].mxu0  ;;  %v2441_v19 = vpop.f32.mrb[79].mxu1 }
 0x817   :  { %v3289_v18 = vmul.f32 -1.442695, %v2398_v61  ;;  %v3290_v35 = vmul.f32 -1.442695, %v2439_v40 }
 0x818   :  { %3744 = vpow2.f32 %v3288_v20 }
 0x819   :  { %3746 = vpow2.f32 %v3289_v18 }
 0x81a   :  { %3748 = vpow2.f32 %v3290_v35  ;;  %v6518_v35 = vld [vmem:[#allocation82_spill] sm:$0xff] }
 0x81b   :  { %3750 = vtanh.f32 %v2437_v58 }
 0x822   :  { %v3745_v16 = vpop.eup %3744 }
 0x823   :  { %v3747_v15 = vpop.eup %3746  ;;  %v2446_v24 = vadd.f32 1.0, %v3745_v16 }
 0x824   :  { %v2452_v39 = vadd.f32 1.0, %v3747_v15  ;;  %v3749_v45 = vpop.eup %3748 }
 0x825   :  { %3752 = vrcp.f32 %v2446_v24  ;;  %v3751_v59 = vpop.eup %3750  ;;  %v2459_v20 = vadd.f32 1.0, %v3749_v45 }
 0x826   :  { %3754 = vrcp.f32 %v2452_v39  ;;  %v6519_v39 = vld [vmem:[#allocation69_spill] sm:$0xff] }
 0x827   :  { %3756 = vrcp.f32 %v2459_v20 }
 0x82f   :  { %v3753_v27 = vpop.eup %3752 }
 0x830   :  { %v3755_v19 = vpop.eup %3754  ;;  %v2463_v9 = vmul.f32 %v3753_v27, %v3751_v59 }
 0x831   :  { %v2462_v18 = vmul.f32 %v3755_v19, %v5406_v5 }
 0x833   :  { %v2509_v6 = vpop.f32.mrb[48].mxu0  ;;  %v2550_v61 = vpop.f32.mrb[80].mxu1  ;;  %v5672_v33 = vadd.f32 %v2463_v9, %v2462_v18 }
 0x834   :  { %v2557_v16 = vadd.f32 %v2509_v6, %v6517_v63  ;;  %v2559_v40 = vadd.f32 %v2550_v61, %v6518_v35  ;;  %v2511_v15 = vpop.f32.mrb[49].mxu0  ;;  %v2552_v58 = vpop.f32.mrb[81].mxu1 }
 0x835   :  { %v2558_v24 = vadd.f32 %v2511_v15, %v6519_v39  ;;  %v2560_v14 = vadd.f32 %v2552_v58, %v6520_v17  ;;  %v2513_v2 = vpop.f32.mrb[50].mxu0  ;;  %v2554_v59 = vpop.f32.mrb[82].mxu1  ;;  %3758 = vtanh.f32 %v5672_v33 }
 0x836   :  { %v3291_v5 = vmul.f32 -1.442695, %v2557_v16  ;;  %v2514_v45 = vpop.f32.mrb[51].mxu0  ;;  %v2555_v27 = vpop.f32.mrb[83].mxu1 }
 0x837   :  { %v3292_v19 = vmul.f32 -1.442695, %v2558_v24  ;;  %v3757_v9 = vpop.eup %3756  ;;  %v3293_v18 = vmul.f32 -1.442695, %v2560_v14 }
 0x838   :  { %3760 = vpow2.f32 %v3291_v5 }
 0x839   :  { %3762 = vpow2.f32 %v3292_v19 }
 0x83a   :  { %3764 = vpow2.f32 %v3293_v18  ;;  %v4019_v18 = vld [vmem:[#allocation8 + $0x44] ss:$16 sps:$4 sm:$0xff]  }
 0x83b   :  { %3766 = vtanh.f32 %v2559_v40 }
 0x83f   :  { %v3759_v20 = vpop.eup %3758 }
 0x840   :  { %v2466_v6 = vmul.f32 %v3759_v20, %v3757_v9  ;;  %v4016_v9 = vld [vmem:[#allocation8] ss:$16 sps:$4 sm:$0xff]   ;;  %v4017_v20 = vld [vmem:[#allocation8 + $0x24] ss:$16 sps:$4 sm:$0xff]  }
 0x842   :  { %v3761_v61 = vpop.eup %3760  ;;  %v2467_v63 = vpack.c.bf16 %v2466_v6, %v2466_v6  ;;  %v4020_v6 = vld [vmem:[#allocation8 + $0x40] ss:$16 sps:$4 sm:$0xff]  }
 0x843   :  { %v3763_v35 = vpop.eup %3762  ;;  %v2564_v15 = vadd.f32 1.0, %v3761_v61  ;;  %v6559_v61 = vld [vmem:[#allocation36_spill] sm:$0xff] }
 0x844   :  { %v2570_v2 = vadd.f32 1.0, %v3763_v35  ;;  %2469 = vst [vmem:[#allocation5 + $0x14] sm:$0xf] %v2467_v63  ;;  %2618 = vmatprep.mubr.bf16.mxu0 %v2467_v63  ;;  %2659 = vmatprep.mubr.bf16.mxu1 %v2467_v63  ;;  %v3765_v17 = vpop.eup %3764  ;;  %v6560_v63 = vld [vmem:[#allocation37_spill] sm:$0xff]  ;;  %v6561_v35 = vld [vmem:[#allocation38_spill] sm:$0xff] }
 0x845   :  { %3768 = vrcp.f32 %v2564_v15  ;;  %v3767_v16 = vpop.eup %3766  ;;  %v2577_v59 = vadd.f32 1.0, %v3765_v17  ;;  %v6562_v15 = vld [vmem:[#allocation39_spill] sm:$0xff]  ;;  %v6564_v17 = vld [vmem:[#allocation41_spill] sm:$0xff] }
 0x846   :  { %3770 = vrcp.f32 %v2570_v2  ;;  %v6563_v2 = vld [vmem:[#allocation40_spill] sm:$0xff] }
 0x847   :  { %3772 = vrcp.f32 %v2577_v59 }
 0x84f   :  { %v3769_v58 = vpop.eup %3768 }
 0x850   :  { %v3771_v39 = vpop.eup %3770  ;;  %v2581_v24 = vmul.f32 %v3769_v58, %v3767_v16  ;;  %v6565_v16 = vld [vmem:[#allocation42_spill] sm:$0xff]  ;;  %v6566_v58 = vld [vmem:[#allocation43_spill] sm:$0xff] }
 0x851   :  { %v2580_v14 = vmul.f32 %v3771_v39, %v5414_v60  ;;  %v3773_v40 = vpop.eup %3772  ;;  %v4018_v60 = vld [vmem:[#allocation8 + $0x20] ss:$16 sps:$4 sm:$0xff]  }
 0x852   :  { %v5774_v39 = vld [vmem:[%s5864_s8] sm:$0xff]  }
 0x853   :  { %v5680_v5 = vadd.f32 %v2581_v24, %v2580_v14  ;;  %v6567_v14 = vld [vmem:[#allocation13_spill] sm:$0xff] }
 0x855   :  { %3774 = vtanh.f32 %v5680_v5 }
 0x85f   :  { %v3775_v45 = vpop.eup %3774 }
 0x860   :  { %v2584_v27 = vmul.f32 %v3775_v45, %v3773_v40 }
 0x862   :  { %v2585_v19 = vpack.c.bf16 %v2584_v27, %v2584_v27 }
 0x864   :  { %2619 = vmatmul.mubr.bf16.vlgmr.msra.gmra.mrb[52].mxu0 %v2585_v19  ;;  %2660 = vmatmul.mubr.bf16.vlgmr.msra.gmra.mrb[84].mxu1 %v2585_v19 }
 0x865   :  { %2701 = vmatpush1.bf16.msra.mxu0 %v4016_v9  ;;  %2742 = vmatpush1.bf16.msra.mxu1 %v5282_v41  ;;  %v4021_v41 = vld [vmem:[#allocation8 + $0x64] ss:$16 sps:$4 sm:$0xff]  }
 0x866   :  { %2702 = vmatprep.subr.bf16.mxu0 %v4017_v20  ;;  %2743 = vmatprep.subr.bf16.mxu1 %v5286_v42  ;;  %v4022_v42 = vld [vmem:[#allocation8 + $0x60] ss:$16 sps:$4 sm:$0xff]  }
 0x867   :  { %2732 = vmatprep.mubr.bf16.mxu0 %v6198_v52  ;;  %2773 = vmatprep.mubr.bf16.mxu1 %v6198_v52  ;;  %v4023_v52 = vld [vmem:[#allocation8 + $0x84] ss:$16 sps:$4 sm:$0xff]  }
 0x869   :  { %2703 = vmatpush1.bf16.msra.mxu0 %v4018_v60  ;;  %2744 = vmatpush1.bf16.msra.mxu1 %v5292_v43  ;;  %v6521_v43 = vld [vmem:[#allocation86_spill] sm:$0xff] }
 0x86a   :  { %2704 = vmatprep.subr.bf16.mxu0 %v4019_v18  ;;  %2745 = vmatprep.subr.bf16.mxu1 %v5426_v25  ;;  %v6529_v25 = vld [vmem:[#allocation77_spill] sm:$0xff] }
 0x86d   :  { %2705 = vmatpush1.bf16.msra.mxu0 %v4020_v6  ;;  %2746 = vmatpush1.bf16.msra.mxu1 %v5430_v26  ;;  %v6530_v26 = vld [vmem:[#allocation59_spill] sm:$0xff] }
 0x86e   :  { %2706 = vmatprep.subr.bf16.mxu0 %v4021_v41  ;;  %2747 = vmatprep.subr.bf16.mxu1 %v5434_v34  ;;  %v6531_v34 = vld [vmem:[#allocation73_spill] sm:$0xff] }
 0x871   :  { %2707 = vmatpush1.bf16.msra.mxu0 %v4022_v42  ;;  %2748 = vmatpush1.bf16.msra.mxu1 %v5438_v22  ;;  %v6532_v22 = vld [vmem:[#allocation72_spill] sm:$0xff] }
 0x872   :  { %2708 = vmatprep.subr.bf16.mxu0 %v4023_v52  ;;  %2749 = vmatprep.subr.bf16.mxu1 %v5442_v31  ;;  %v6533_v31 = vld [vmem:[#allocation64_spill] sm:$0xff] }
 0x873   :  { %v6569_v52 = vld [vmem:[#allocation88_spill] sm:$0xff] }
 0x875   :  { %2709 = vmatpush1.bf16.msra.mxu0 %v5305_v28  ;;  %2750 = vmatpush1.bf16.msra.mxu1 %v5446_v48  ;;  %v6522_v28 = vld [vmem:[#allocation60_spill] sm:$0xff]  ;;  %v6534_v48 = vld [vmem:[#allocation78_spill] sm:$0xff] }
 0x876   :  { %2710 = vmatprep.subr.bf16.mxu0 %v5309_v30  ;;  %2751 = vmatprep.subr.bf16.mxu1 %v5450_v49  ;;  %v6523_v30 = vld [vmem:[#allocation74_spill] sm:$0xff]  ;;  %v6535_v49 = vld [vmem:[#allocation65_spill] sm:$0xff] }
 0x879   :  { %2711 = vmatpush1.bf16.msra.mxu0 %v5313_v47  ;;  %2752 = vmatpush1.bf16.msra.mxu1 %v5454_v0  ;;  %v6524_v47 = vld [vmem:[#allocation61_spill] sm:$0xff]  ;;  %v6536_v0 = vld [vmem:[#allocation79_spill] sm:$0xff] }
 0x87a   :  { %2712 = vmatprep.subr.bf16.mxu0 %v5317_v44  ;;  %2753 = vmatprep.subr.bf16.mxu1 %v5458_v46  ;;  %v6525_v44 = vld [vmem:[#allocation75_spill] sm:$0xff]  ;;  %v6537_v46 = vld [vmem:[#allocation14_spill] sm:$0xff] }
 0x87d   :  { %2713 = vmatpush1.bf16.msra.mxu0 %v5321_v53  ;;  %2754 = vmatpush1.bf16.msra.mxu1 %v5462_v21  ;;  %v6526_v53 = vld [vmem:[#allocation62_spill] sm:$0xff]  ;;  %v6538_v21 = vld [vmem:[#allocation15_spill] sm:$0xff] }
 0x87e   :  { %2714 = vmatprep.subr.bf16.mxu0 %v5325_v50  ;;  %2755 = vmatprep.subr.bf16.mxu1 %v5466_v13  ;;  %v6527_v50 = vld [vmem:[#allocation76_spill] sm:$0xff] }
 0x87f   :  { %v6539_v13 = vld [vmem:[#allocation16_spill] sm:$0xff] }
 0x881   :  { %2715 = vmatpush1.bf16.msra.mxu0 %v5329_v56  ;;  %2756 = vmatpush1.bf16.msra.mxu1 %v5470_v1  ;;  %v6528_v56 = vld [vmem:[#allocation63_spill] sm:$0xff]  ;;  %v6540_v1 = vld [vmem:[#allocation17_spill] sm:$0xff] }
 0x882   :  { %2811 = vmatprep.subr.bf16.mxu0 %v5473_v62  ;;  %2852 = vmatprep.subr.bf16.mxu1 %v5476_v3  ;;  %v6541_v62 = vld [vmem:[#allocation18_spill] sm:$0xff]  ;;  %v6542_v3 = vld [vmem:[#allocation19_spill] sm:$0xff] }
 0x884   :  { %2733 = vmatmul.mubr.bf16.vlgmr.msra.gmra.mrb[56].mxu0 %v2585_v19  ;;  %2774 = vmatmul.mubr.bf16.vlgmr.msra.gmra.mrb[88].mxu1 %v2585_v19  ;;  %v6568_v19 = vld [vmem:[#allocation87_spill] sm:$0xff] }
 0x885   :  { %2812 = vmatpush1.bf16.msra.mxu0 %v5479_v23  ;;  %2853 = vmatpush1.bf16.msra.mxu1 %v5482_v55  ;;  %v6543_v23 = vld [vmem:[#allocation20_spill] sm:$0xff]  ;;  %v6544_v55 = vld [vmem:[#allocation21_spill] sm:$0xff] }
 0x886   :  { %2813 = vmatprep.subr.bf16.mxu0 %v5485_v57  ;;  %2854 = vmatprep.subr.bf16.mxu1 %v5488_v32  ;;  %v6545_v57 = vld [vmem:[#allocation22_spill] sm:$0xff]  ;;  %v6546_v32 = vld [vmem:[#allocation23_spill] sm:$0xff] }
 0x889   :  { %2814 = vmatpush1.bf16.msra.mxu0 %v5491_v54  ;;  %2855 = vmatpush1.bf16.msra.mxu1 %v5494_v37  ;;  %v6547_v54 = vld [vmem:[#allocation24_spill] sm:$0xff]  ;;  %v6548_v37 = vld [vmem:[#allocation25_spill] sm:$0xff] }
 0x88a   :  { %2815 = vmatprep.subr.bf16.mxu0 %v5497_v36  ;;  %2856 = vmatprep.subr.bf16.mxu1 %v5500_v38  ;;  %v6549_v36 = vld [vmem:[#allocation26_spill] sm:$0xff]  ;;  %v6550_v38 = vld [vmem:[#allocation27_spill] sm:$0xff] }
 0x88d   :  { %2816 = vmatpush1.bf16.msra.mxu0 %v5503_v29  ;;  %2857 = vmatpush1.bf16.msra.mxu1 %v5506_v4  ;;  %v6551_v29 = vld [vmem:[#allocation28_spill] sm:$0xff]  ;;  %v6552_v4 = vld [vmem:[#allocation29_spill] sm:$0xff] }
 0x88e   :  { %2817 = vmatprep.subr.bf16.mxu0 %v5509_v7  ;;  %2858 = vmatprep.subr.bf16.mxu1 %v5512_v8  ;;  %v6553_v7 = vld [vmem:[#allocation30_spill] sm:$0xff]  ;;  %v6554_v8 = vld [vmem:[#allocation31_spill] sm:$0xff] }
 0x891   :  { %2818 = vmatpush1.bf16.msra.mxu0 %v5515_v10  ;;  %2859 = vmatpush1.bf16.msra.mxu1 %v5518_v11  ;;  %v6555_v10 = vld [vmem:[#allocation32_spill] sm:$0xff]  ;;  %v6556_v11 = vld [vmem:[#allocation33_spill] sm:$0xff] }
 0x892   :  { %2819 = vmatprep.subr.bf16.mxu0 %v5521_v51  ;;  %2860 = vmatprep.subr.bf16.mxu1 %v5524_v12  ;;  %v6557_v51 = vld [vmem:[#allocation34_spill] sm:$0xff]  ;;  %v6558_v12 = vld [vmem:[#allocation35_spill] sm:$0xff] }
 0x895   :  { %2820 = vmatpush1.bf16.msra.mxu0 %v6521_v43  ;;  %2861 = vmatpush1.bf16.msra.mxu1 %v6522_v28 }
 0x896   :  { %2821 = vmatprep.subr.bf16.mxu0 %v6523_v30  ;;  %2862 = vmatprep.subr.bf16.mxu1 %v6524_v47  ;;  %v6570_v30 = vld [vmem:[#allocation89_spill] sm:$0xff] }
 0x899   :  { %2822 = vmatpush1.bf16.msra.mxu0 %v6525_v44  ;;  %2863 = vmatpush1.bf16.msra.mxu1 %v6526_v53 }
 0x89a   :  { %2823 = vmatprep.subr.bf16.mxu0 %v6527_v50  ;;  %2864 = vmatprep.subr.bf16.mxu1 %v6528_v56 }
 0x89d   :  { %2824 = vmatpush1.bf16.msra.mxu0 %v6529_v25  ;;  %2865 = vmatpush1.bf16.msra.mxu1 %v6530_v26 }
 0x89e   :  { %2825 = vmatprep.subr.bf16.mxu0 %v6531_v34  ;;  %2866 = vmatprep.subr.bf16.mxu1 %v6532_v22 }
 0x8a1   :  { %2826 = vmatpush1.bf16.msra.mxu0 %v6533_v31  ;;  %2867 = vmatpush1.bf16.msra.mxu1 %v6534_v48 }
 0x8a2   :  { %2827 = vmatprep.subr.bf16.mxu0 %v6535_v49  ;;  %2868 = vmatprep.subr.bf16.mxu1 %v6536_v0 }
 0x8a5   :  { %2828 = vmatpush1.bf16.msra.mxu0 %v6537_v46  ;;  %2869 = vmatpush1.bf16.msra.mxu1 %v6538_v21 }
 0x8a6   :  { %2829 = vmatprep.subr.bf16.mxu0 %v6539_v13  ;;  %2870 = vmatprep.subr.bf16.mxu1 %v6540_v1  ;;  %v6571_v13 = vld [vmem:[#allocation70_spill] sm:$0xff] }
 0x8a9   :  { %2830 = vmatpush1.bf16.msra.mxu0 %v6541_v62  ;;  %2871 = vmatpush1.bf16.msra.mxu1 %v6542_v3  ;;  %v6572_v62 = vld [vmem:[#allocation84_spill] sm:$0xff] }
 0x8aa   :  { %2831 = vmatprep.subr.bf16.mxu0 %v6543_v23  ;;  %2872 = vmatprep.subr.bf16.mxu1 %v6544_v55 }
 0x8ad   :  { %2832 = vmatpush1.bf16.msra.mxu0 %v6545_v57  ;;  %2873 = vmatpush1.bf16.msra.mxu1 %v6546_v32  ;;  %v6573_v57 = vld [vmem:[#allocation71_spill] sm:$0xff] }
 0x8ae   :  { %2833 = vmatprep.subr.bf16.mxu0 %v6547_v54  ;;  %2874 = vmatprep.subr.bf16.mxu1 %v6548_v37  ;;  %v6574_v54 = vld [vmem:[#allocation85_spill] sm:$0xff] }
 0x8b1   :  { %2834 = vmatpush1.bf16.msra.mxu0 %v6549_v36  ;;  %2875 = vmatpush1.bf16.msra.mxu1 %v6550_v38 }
 0x8b2   :  { %2835 = vmatprep.subr.bf16.mxu0 %v6551_v29  ;;  %2876 = vmatprep.subr.bf16.mxu1 %v6552_v4 }
 0x8b5   :  { %2836 = vmatpush1.bf16.msra.mxu0 %v6553_v7  ;;  %2877 = vmatpush1.bf16.msra.mxu1 %v6554_v8 }
 0x8b6   :  { %2837 = vmatprep.subr.bf16.mxu0 %v6555_v10  ;;  %2878 = vmatprep.subr.bf16.mxu1 %v6556_v11 }
 0x8b9   :  { %2838 = vmatpush1.bf16.msra.mxu0 %v6557_v51  ;;  %2879 = vmatpush1.bf16.msra.mxu1 %v6558_v12 }
 0x8ba   :  { %2839 = vmatprep.subr.bf16.mxu0 %v6559_v61  ;;  %2880 = vmatprep.subr.bf16.mxu1 %v6560_v63 }
 0x8bd   :  { %2840 = vmatpush1.bf16.msra.mxu0 %v6561_v35  ;;  %2881 = vmatpush1.bf16.msra.mxu1 %v6562_v15 }
 0x8be   :  { %2841 = vmatprep.subr.bf16.mxu0 %v6563_v2  ;;  %2882 = vmatprep.subr.bf16.mxu1 %v6564_v17 }
 0x8c1   :  { %2842 = vmatpush1.bf16.msra.mxu0 %v6565_v16  ;;  %2883 = vmatpush1.bf16.msra.mxu1 %v6566_v58 }
 0x8c2   :  { %3330 = vmatprep.subr.bf16.mxu0 %v5774_v39 }
 0x937   :  { %v2620_v24 = vpop.f32.mrb[52].mxu0  ;;  %v2661_v59 = vpop.f32.mrb[84].mxu1 }
 0x938   :  { %v2621_v40 = vadd.f32 %v2620_v24, %v6567_v14  ;;  %v2622_v45 = vpop.f32.mrb[53].mxu0  ;;  %v2663_v27 = vpop.f32.mrb[85].mxu1  ;;  %v2662_v47 = vadd.f32 %v2661_v59, %v6570_v30 }
 0x939   :  { %v2623_v9 = vadd.f32 %v2622_v45, %v6568_v19  ;;  %v2624_v20 = vpop.f32.mrb[54].mxu0  ;;  %v2665_v60 = vpop.f32.mrb[86].mxu1  ;;  %v2664_v43 = vadd.f32 %v2663_v27, %v6569_v52 }
 0x93a   :  { %v3294_v18 = vmul.f32 -1.442695, %v2621_v40  ;;  %v2625_v6 = vpop.f32.mrb[55].mxu0  ;;  %v2666_v41 = vpop.f32.mrb[87].mxu1 }
 0x93b   :  { %v3295_v42 = vmul.f32 -1.442695, %v2623_v9  ;;  %v3296_v28 = vmul.f32 -1.442695, %v2664_v43  ;;  %v3559_v6 = vld [vmem:[%s5864_s8 + $0x10] sm:$0xff]   ;;  %v3560_v41 = vld [vmem:[%s5864_s8 + $0x18] sm:$0xff]  }
 0x93c   :  { %3776 = vpow2.f32 %v3294_v18  ;;  %v3558_v18 = vld [vmem:[%s5864_s8 + $0x8] sm:$0xff]   ;;  %v3563_v43 = vld [vmem:[%s5864_s8 + $0x30] sm:$0xff]  }
 0x93d   :  { %3778 = vpow2.f32 %v3295_v42  ;;  %v3561_v42 = vld [vmem:[%s5864_s8 + $0x20] sm:$0xff]  }
 0x93e   :  { %3780 = vpow2.f32 %v3296_v28  ;;  %v3564_v28 = vld [vmem:[%s5864_s8 + $0x38] sm:$0xff]  }
 0x93f   :  { %3782 = vtanh.f32 %v2662_v47  ;;  %v3565_v47 = vld [vmem:[#allocation5 + $0x8] sm:$0xff]  }
 0x946   :  { %v3777_v44 = vpop.eup %3776 }
 0x947   :  { %v3779_v53 = vpop.eup %3778  ;;  %v2671_v50 = vadd.f32 1.0, %v3777_v44  ;;  %v3566_v44 = vld [vmem:[#allocation5 + $0x10] sm:$0xff]  }
 0x948   :  { %v2677_v56 = vadd.f32 1.0, %v3779_v53  ;;  %v3781_v25 = vpop.eup %3780 }
 0x949   :  { %3784 = vrcp.f32 %v2671_v50  ;;  %v3783_v26 = vpop.eup %3782  ;;  %v2684_v48 = vadd.f32 1.0, %v3781_v25 }
 0x94a   :  { %3786 = vrcp.f32 %v2677_v56 }
 0x94b   :  { %3788 = vrcp.f32 %v2684_v48 }
 0x953   :  { %v3785_v34 = vpop.eup %3784 }
 0x954   :  { %v3787_v22 = vpop.eup %3786  ;;  %v2688_v31 = vmul.f32 %v3785_v34, %v3783_v26 }
 0x955   :  { %v2687_v49 = vmul.f32 %v3787_v22, %v5672_v33  ;;  %v3789_v8 = vpop.eup %3788 }
 0x957   :  { %v2734_v0 = vpop.f32.mrb[56].mxu0  ;;  %v2775_v46 = vpop.f32.mrb[88].mxu1  ;;  %v5782_v21 = vadd.f32 %v2688_v31, %v2687_v49 }
 0x958   :  { %v2782_v1 = vadd.f32 %v2734_v0, %v6571_v13  ;;  %v2784_v3 = vadd.f32 %v2775_v46, %v6572_v62  ;;  %v2736_v23 = vpop.f32.mrb[57].mxu0  ;;  %v2777_v55 = vpop.f32.mrb[89].mxu1 }
 0x959   :  { %v2783_v32 = vadd.f32 %v2736_v23, %v6573_v57  ;;  %v2785_v37 = vadd.f32 %v2777_v55, %v6574_v54  ;;  %v2738_v36 = vpop.f32.mrb[58].mxu0  ;;  %v2779_v38 = vpop.f32.mrb[90].mxu1  ;;  %3790 = vtanh.f32 %v5782_v21 }
 0x95a   :  { %v3297_v33 = vmul.f32 -1.442695, %v2782_v1  ;;  %v2739_v29 = vpop.f32.mrb[59].mxu0  ;;  %v2780_v4 = vpop.f32.mrb[91].mxu1 }
 0x95b   :  { %v3298_v7 = vmul.f32 -1.442695, %v2783_v32  ;;  %v3299_v11 = vmul.f32 -1.442695, %v2785_v37 }
 0x95c   :  { %3792 = vpow2.f32 %v3297_v33 }
 0x95d   :  { %3794 = vpow2.f32 %v3298_v7 }
 0x95e   :  { %3796 = vpow2.f32 %v3299_v11 }
 0x95f   :  { %3798 = vtanh.f32 %v2784_v3 }
 0x963   :  { %v3791_v10 = vpop.eup %3790 }
 0x964   :  { %v2691_v51 = vmul.f32 %v3791_v10, %v3789_v8 }
 0x966   :  { %v3793_v12 = vpop.eup %3792  ;;  %v2692_v61 = vpack.c.bf16 %v2691_v51, %v2691_v51 }
 0x967   :  { %v3795_v63 = vpop.eup %3794  ;;  %v2789_v35 = vadd.f32 1.0, %v3793_v12 }
 0x968   :  { %v2795_v15 = vadd.f32 1.0, %v3795_v63  ;;  %2694 = vst [vmem:[#allocation5 + $0x18] sm:$0xf] %v2692_v61  ;;  %2843 = vmatprep.mubr.bf16.mxu0 %v2692_v61  ;;  %2884 = vmatprep.mubr.bf16.mxu1 %v2692_v61  ;;  %v3797_v2 = vpop.eup %3796 }
 0x969   :  { %3800 = vrcp.f32 %v2789_v35  ;;  %v3799_v17 = vpop.eup %3798  ;;  %v2802_v59 = vadd.f32 1.0, %v3797_v2 }
 0x96a   :  { %3802 = vrcp.f32 %v2795_v15 }
 0x96b   :  { %3804 = vrcp.f32 %v2802_v59 }
 0x973   :  { %v3801_v16 = vpop.eup %3800 }
 0x974   :  { %v3803_v58 = vpop.eup %3802  ;;  %v2806_v24 = vmul.f32 %v3801_v16, %v3799_v17 }
 0x975   :  { %v2805_v40 = vmul.f32 %v3803_v58, %v5680_v5  ;;  %v3805_v27 = vpop.eup %3804  ;;  %v3557_v5 = vld [vmem:[#allocation5] sm:$0xff]  }
 0x977   :  { %v2807_v45 = vadd.f32 %v2806_v24, %v2805_v40 }
 0x979   :  { %3806 = vtanh.f32 %v2807_v45  ;;  %3104 = vst [vmem:[%s5868_s12] sm:$0xff] %v2807_v45 }
 0x983   :  { %v3807_v9 = vpop.eup %3806 }
 0x984   :  { %v2809_v20 = vmul.f32 %v3807_v9, %v3805_v27 }
 0x986   :  { %v2810_v60 = vpack.c.bf16 %v2809_v20, %v2809_v20  ;;  %3103 = vst [vmem:[%s5867_s11] sm:$0xff] %v2809_v20 }
 0x988   :  { %2844 = vmatmul.mubr.bf16.vlgmr.msra.gmra.mrb[60].mxu0 %v2810_v60  ;;  %2885 = vmatmul.mubr.bf16.vlgmr.msra.gmra.mrb[92].mxu1 %v2810_v60 }
 0x989   :  { %3331 = vmatpush3.bf16.msra.mxu0 %v5774_v39  ;;  %3346 = vmatprep.mubr.bf16.mxu0 %v3557_v5  ;;  %v3562_v39 = vld [vmem:[%s5864_s8 + $0x28] sm:$0xff]  }
 0x98a   :  { %3332 = vmatprep.subr.bf16.mxu0 %v3558_v18 }
 0x98d   :  { %3333 = vmatpush3.bf16.msra.mxu0 %v3558_v18 }
 0x98e   :  { %3334 = vmatprep.subr.bf16.mxu0 %v3559_v6 }
 0x991   :  { %3335 = vmatpush3.bf16.msra.mxu0 %v3559_v6 }
 0x992   :  { %3336 = vmatprep.subr.bf16.mxu0 %v3560_v41 }
 0x995   :  { %3337 = vmatpush3.bf16.msra.mxu0 %v3560_v41 }
 0x996   :  { %3338 = vmatprep.subr.bf16.mxu0 %v3561_v42 }
 0x999   :  { %3339 = vmatpush3.bf16.msra.mxu0 %v3561_v42 }
 0x99a   :  { %3340 = vmatprep.subr.bf16.mxu0 %v3562_v39 }
 0x99d   :  { %3341 = vmatpush3.bf16.msra.mxu0 %v3562_v39 }
 0x99e   :  { %3342 = vmatprep.subr.bf16.mxu0 %v3563_v43 }
 0x9a1   :  { %3343 = vmatpush3.bf16.msra.mxu0 %v3563_v43 }
 0x9a2   :  { %3344 = vmatprep.subr.bf16.mxu0 %v3564_v28 }
 0x9a5   :  { %3345 = vmatpush3.bf16.msra.mxu0 %v3564_v28 }
 0x9a8   :  { %3347 = vmatmul.mubr.bf16.vlgmr.msra.gmra.mrb[64].mxu0 %v3565_v47 }
 0x9a9   :  { %3350 = vmatprep.mubr.bf16.mxu0 %v3566_v44 }
 0xa5b   :  { %v2845_v53 = vpop.f32.mrb[60].mxu0  ;;  %v2886_v50 = vpop.f32.mrb[92].mxu1 }
 0xa5c   :  { %v2846_v56 = vadd.f32 %v2845_v53, %v6567_v14  ;;  %v2847_v25 = vpop.f32.mrb[61].mxu0  ;;  %v2888_v26 = vpop.f32.mrb[93].mxu1  ;;  %v2887_v62 = vadd.f32 %v2886_v50, %v6570_v30 }
 0xa5d   :  { %v2848_v34 = vadd.f32 %v2847_v25, %v6568_v19  ;;  %v2849_v22 = vpop.f32.mrb[62].mxu0  ;;  %v2890_v31 = vpop.f32.mrb[94].mxu1  ;;  %v2889_v13 = vadd.f32 %v2888_v26, %v6569_v52  ;;  %v3303_v52 = vld [vmem:[%s5865_s9] ss:$0 sm:$0xff] }
 0xa5e   :  { %v3300_v48 = vmul.f32 -1.442695, %v2846_v56  ;;  %v2850_v49 = vpop.f32.mrb[63].mxu0  ;;  %v2891_v0 = vpop.f32.mrb[95].mxu1 }
 0xa5f   :  { %v3301_v46 = vmul.f32 -1.442695, %v2848_v34  ;;  %v3302_v1 = vmul.f32 -1.442695, %v2889_v13 }
 0xa60   :  { %3808 = vpow2.f32 %v3300_v48 }
 0xa61   :  { %3810 = vpow2.f32 %v3301_v46 }
 0xa62   :  { %3812 = vpow2.f32 %v3302_v1 }
 0xa63   :  { %3814 = vtanh.f32 %v2887_v62 }
 0xa6a   :  { %v3809_v3 = vpop.eup %3808 }
 0xa6b   :  { %v3811_v23 = vpop.eup %3810  ;;  %v2896_v14 = vadd.f32 1.0, %v3809_v3 }
 0xa6c   :  { %v2902_v55 = vadd.f32 1.0, %v3811_v23  ;;  %v3813_v19 = vpop.eup %3812 }
 0xa6d   :  { %3816 = vrcp.f32 %v2896_v14  ;;  %v3815_v57 = vpop.eup %3814  ;;  %v2909_v36 = vadd.f32 1.0, %v3813_v19 }
 0xa6e   :  { %3818 = vrcp.f32 %v2902_v55 }
 0xa6f   :  { %3820 = vrcp.f32 %v2909_v36 }
 0xa77   :  { %v3817_v32 = vpop.eup %3816 }
 0xa78   :  { %v3819_v54 = vpop.eup %3818  ;;  %v2913_v37 = vmul.f32 %v3817_v32, %v3815_v57 }
 0xa79   :  { %v2912_v38 = vmul.f32 %v3819_v54, %v5782_v21  ;;  %v3821_v51 = vpop.eup %3820 }
 0xa7b   :  { %v2914_v30 = vadd.f32 %v2913_v37, %v2912_v38  ;;  %v3348_v33 = vpop.f32.mrb[64].mxu0 }
 0xa7c   :  { %v3070_v29 = vadd.f32 %v3348_v33, %v3303_v52  ;;  %v3061_v4 = vpop.f32.mrb[65].mxu0 }
 0xa7d   :  { %3822 = vtanh.f32 %v2914_v30  ;;  %3317 = vst [vmem:[%s5868_s12 + $0x8] sm:$0xff] %v2914_v30  ;;  %v3062_v7 = vadd.f32 %v3303_v52, %v3061_v4  ;;  %v3349_v8 = vpop.f32.mrb[66].mxu0 }
 0xa7e   :  { %3094 = vst [vmem:[%s5866_s10 + $0x10] sm:$0xff] %v3070_v29  ;;  %v3073_v21 = vadd.f32 %v3349_v8, %v3303_v52  ;;  %v3064_v10 = vpop.f32.mrb[67].mxu0 }
 0xa7f   :  { %3092 = vst [vmem:[%s5866_s10] sm:$0xff] %v3062_v7  ;;  %v3065_v11 = vadd.f32 %v3303_v52, %v3064_v10 }
 0xa80   :  { %3095 = vst [vmem:[%s5866_s10 + $0x18] sm:$0xff] %v3073_v21 }
 0xa81   :  { %3093 = vst [vmem:[%s5866_s10 + $0x8] sm:$0xff] %v3065_v11 }
 0xa87   :  { %v3823_v12 = vpop.eup %3822 }
 0xa88   :  { %v2916_v61 = vmul.f32 %v3823_v12, %v3821_v51 }
 0xa8a   :  { %v2917_v63 = vpack.c.bf16 %v2916_v61, %v2916_v61  ;;  %3316 = vst [vmem:[%s5867_s11 + $0x8] sm:$0xff] %v2916_v61 }
 0xa8c   :  { %2919 = vst [vmem:[#allocation5 + $0x1c] sm:$0xf] %v2917_v63 }
 0xa93   :  { %v3567_v35 = vld [vmem:[#allocation5 + $0x18] sm:$0xff]  }
 0xa94   :  { %3351 = vmatmul.mubr.bf16.gmra.mrb[68].mxu0 %v3567_v35 }
 0xb67   :  { %v3352_v15 = vpop.f32.mrb[68].mxu0 }
 0xb68   :  { %v3086_v2 = vadd.f32 %v3352_v15, %v3303_v52  ;;  %v3077_v17 = vpop.f32.mrb[69].mxu0 }
 0xb69   :  { %v3078_v16 = vadd.f32 %v3303_v52, %v3077_v17  ;;  %v3353_v58 = vpop.f32.mrb[70].mxu0 }
 0xb6a   :  { %3098 = vst [vmem:[%s5866_s10 + $0x30] sm:$0xff] %v3086_v2  ;;  %v3089_v24 = vadd.f32 %v3353_v58, %v3303_v52  ;;  %v3080_v59 = vpop.f32.mrb[71].mxu0 }
 0xb6b   :  { %3096 = vst [vmem:[%s5866_s10 + $0x20] sm:$0xff] %v3078_v16  ;;  %v3081_v40 = vadd.f32 %v3303_v52, %v3080_v59 }
 0xb6c   :  { %3099 = vst [vmem:[%s5866_s10 + $0x38] sm:$0xff] %v3089_v24 }
 0xb6d   :  { %3097 = vst [vmem:[%s5866_s10 + $0x28] sm:$0xff] %v3081_v40 }
 0xb6e   :  { %3121 = vsyncpa [#allocation7], 1 }
 0xb6f   :  { %3122 = vsyncpa [#allocation9], 1 }

</bundles_post_ra>
